<compile_context>
chip_gen: v7x
topology: tpu7x:2x2x1
jax: 0.10.0
libtpu: 0.0.40
codegen_flags: <defaults>
</compile_context>

<pallas_src>
import math

import jax
import jax.numpy as jnp
import numpy as np
from jax import lax
from jax.experimental import pallas as pl
from jax.experimental.pallas import tpu as pltpu


# ---------------------------------------------------------------------------
# Fused kernel: all-head QKV projection + attention + concat + out-projection
# ---------------------------------------------------------------------------
def _make_fused_kernel(n_heads, d_k, d_v):
    bf16 = jnp.bfloat16
    f32 = jnp.float32

    def kernel(xq_ref, xk_ref, xv_ref, wq_ref, wk_ref, wv_ref, wo_ref, bo_ref,
               o_ref, q_s, k_s, v_s, cat_s):
        qi = pl.program_id(1)

        # K/V projections depend only on the batch element, not on the query
        # tile: compute them once per batch (qi == 0) into persistent VMEM
        # scratch and reuse for every query-row tile.
        @pl.when(qi == 0)
        def _():
            k_s[...] = jnp.dot(xk_ref[0], wk_ref[...],
                               preferred_element_type=f32).astype(bf16)
            v_s[...] = jnp.dot(xv_ref[0], wv_ref[...],
                               preferred_element_type=f32).astype(bf16)

        # Q projection for all heads at once (1/sqrt(d_k) already folded into
        # wq in prepare_params, so no in-kernel scale multiply).
        q_s[...] = jnp.dot(xq_ref[0], wq_ref[...],
                           preferred_element_type=f32).astype(bf16)

        # Per-head attention, statically unrolled (small H).  Each head's
        # output is written into the concat scratch at its column offset.
        for h in range(n_heads):
            q = q_s[:, h * d_k:(h + 1) * d_k]          # (TQ, d_k) bf16
            k = k_s[:, h * d_k:(h + 1) * d_k]          # (S,  d_k) bf16
            v = v_s[:, h * d_v:(h + 1) * d_v]          # (S,  d_v) bf16

            # Contract on d_k of both operands: no explicit k.T / XLU transpose.
            s = lax.dot_general(q, k, (((1,), (1,)), ((), ())),
                                preferred_element_type=f32)          # (TQ, S)
            s = s - jnp.max(s, axis=-1, keepdims=True)
            p = jnp.exp(s)
            denom = jnp.sum(p, axis=-1, keepdims=True)               # (TQ, 1)
            # Unnormalized P @ V on the MXU ...
            o_h = jnp.dot(p.astype(bf16), v,
                          preferred_element_type=f32)                # (TQ, d_v)
            # ... then exact, deferred normalization on the small output
            # (TQ*d_v divides instead of TQ*S multiplies).
            cat_s[:, h * d_v:(h + 1) * d_v] = (o_h / denom).astype(bf16)

        # Fused output projection + bias; lane-dense (D) store.
        o_ref[0] = (jnp.dot(cat_s[...], wo_ref[...],
                            preferred_element_type=f32)
                    + bo_ref[...]).astype(o_ref.dtype)

    return kernel


# ---------------------------------------------------------------------------
# One-time parameter preparation (outside the per-forward path)
# ---------------------------------------------------------------------------
def prepare_params(params, d_k):
    """Stack per-head weights into wide bf16 matrices, fold in 1/sqrt(d_k)."""
    wq, wk, wv = params["wq"], params["wk"], params["wv"]     # (H, D, d_k/d_v)
    H, D, _ = wq.shape
    scale = np.float32(1.0 / math.sqrt(d_k))
    wq_all = (jnp.transpose(wq, (1, 0, 2)).reshape(D, -1) * scale)
    wk_all = jnp.transpose(wk, (1, 0, 2)).reshape(D, -1)
    wv_all = jnp.transpose(wv, (1, 0, 2)).reshape(D, -1)
    return {
        "wq_all": wq_all.astype(jnp.bfloat16),
        "wk_all": wk_all.astype(jnp.bfloat16),
        "wv_all": wv_all.astype(jnp.bfloat16),
        "w_out": params["w_out"].astype(jnp.bfloat16),        # (H*d_v, D)
        "b_out": params["b_out"].astype(jnp.float32),         # (1, D)
    }


# ---------------------------------------------------------------------------
# Wrapper
# ---------------------------------------------------------------------------
def multi_attention_forward(inputs, prepped, n_heads, d_k, d_v):
    """inputs: 3 arrays (B, S, D) float32; prepped: output of prepare_params."""
    xq, xk, xv = inputs
    B, S, D = xq.shape

    # Cast activations to bf16 once in the wrapper: halves the HBM->VMEM DMA
    # bytes for the (S, D) K/V blocks and feeds the MXU its native dtype.
    xq = xq.astype(jnp.bfloat16)
    xk = xk.astype(jnp.bfloat16)
    xv = xv.astype(jnp.bfloat16)

    # Query-row tile: as large as VMEM comfortably allows; full S at demo size.
    tq = S if S <= 512 else 512
    assert S % tq == 0, "sequence length must be divisible by the query tile"
    assert D % 128 == 0 and S % 8 == 0, "demo shapes must be TPU-tile friendly"

    kernel = _make_fused_kernel(n_heads, d_k, d_v)

    out = pl.pallas_call(
        kernel,
        out_shape=jax.ShapeDtypeStruct((B, S, D), jnp.float32),
        grid_spec=pltpu.PrefetchScalarGridSpec(
            num_scalar_prefetch=0,
            grid=(B, S // tq),
            in_specs=[
                pl.BlockSpec((1, tq, D), lambda b, qi: (b, qi, 0)),       # x_q tile
                pl.BlockSpec((1, S, D), lambda b, qi: (b, 0, 0)),         # x_k (full S)
                pl.BlockSpec((1, S, D), lambda b, qi: (b, 0, 0)),         # x_v (full S)
                pl.BlockSpec((D, n_heads * d_k), lambda b, qi: (0, 0)),   # Wq_all (scaled)
                pl.BlockSpec((D, n_heads * d_k), lambda b, qi: (0, 0)),   # Wk_all
                pl.BlockSpec((D, n_heads * d_v), lambda b, qi: (0, 0)),   # Wv_all
                pl.BlockSpec((n_heads * d_v, D), lambda b, qi: (0, 0)),   # W_out
                pl.BlockSpec((1, D), lambda b, qi: (0, 0)),               # b_out
            ],
            out_specs=pl.BlockSpec((1, tq, D), lambda b, qi: (b, qi, 0)),
            scratch_shapes=[
                pltpu.VMEM((tq, n_heads * d_k), jnp.bfloat16),   # q_all
                pltpu.VMEM((S, n_heads * d_k), jnp.bfloat16),    # k_all (per-batch carry)
                pltpu.VMEM((S, n_heads * d_v), jnp.bfloat16),    # v_all (per-batch carry)
                pltpu.VMEM((tq, n_heads * d_v), jnp.bfloat16),   # concat of head outputs
            ],
        ),
        compiler_params=pltpu.CompilerParams(
            # batch axis megacore-parallel; query-tile axis must be
            # "arbitrary" because k_all/v_all scratch carries across it.
            dimension_semantics=("parallel", "arbitrary"),
            # Above the 32 MiB scoped default (lets bigger tiles on v5e/v6e),
            # still inside v7x's 64 MiB physical VMEM.
            vmem_limit_bytes=48 * 1024 * 1024),
    )(xq, xk, xv, prepped["wq_all"], prepped["wk_all"], prepped["wv_all"],
      prepped["w_out"], prepped["b_out"])

    return out


# ---------------------------------------------------------------------------
# Deterministic parameter init (xavier-uniform-like, torch-shaped weights)
# ---------------------------------------------------------------------------
def init_params(key, d_k, d_v, input_shape, n_heads):
    def xavier(key, fan_in, fan_out, shape):
        bound = math.sqrt(6.0 / (fan_in + fan_out))
        return jax.random.uniform(key, shape, jnp.float32, -bound, bound)

    keys = jax.random.split(key, 3 * n_heads + 1)
    wq = jnp.stack([xavier(keys[3 * h + 0], input_shape, d_k,
                           (input_shape, d_k)) for h in range(n_heads)])
    wk = jnp.stack([xavier(keys[3 * h + 1], input_shape, d_k,
                           (input_shape, d_k)) for h in range(n_heads)])
    wv = jnp.stack([xavier(keys[3 * h + 2], input_shape, d_v,
                           (input_shape, d_v)) for h in range(n_heads)])
    # torch weight: (input_shape, n_heads*d_v); we store its transpose.
    w_out = xavier(keys[-1], n_heads * d_v, input_shape,
                   (n_heads * d_v, input_shape))
    b_out = jnp.zeros((1, input_shape), jnp.float32)       # bias filled with 0
    return {"wq": wq, "wk": wk, "wv": wv, "w_out": w_out, "b_out": b_out}


# ---------------------------------------------------------------------------
# Pure-JAX reference that mirrors the kernel's mixed precision exactly
# (bf16 MXU operands, f32 accumulation, deferred exact normalization).
# ---------------------------------------------------------------------------
def reference_forward(inputs, prepped, n_heads, d_k, d_v):
    bf16, f32 = jnp.bfloat16, jnp.float32
    xq, xk, xv = (x.astype(bf16) for x in inputs)
    q_all = jnp.einsum("bsd,de->bse", xq, prepped["wq_all"],
                       preferred_element_type=f32).astype(bf16)
    k_all = jnp.einsum("bsd,de->bse", xk, prepped["wk_all"],
                       preferred_element_type=f32).astype(bf16)
    v_all = jnp.einsum("bsd,de->bse", xv, prepped["wv_all"],
                       preferred_element_type=f32).astype(bf16)
    heads = []
    for h in range(n_heads):
        q = q_all[..., h * d_k:(h + 1) * d_k]
        k = k_all[..., h * d_k:(h + 1) * d_k]
        v = v_all[..., h * d_v:(h + 1) * d_v]
        s = jnp.einsum("bqc,bkc->bqk", q, k, preferred_element_type=f32)
        s = s - jnp.max(s, axis=-1, keepdims=True)
        p = jnp.exp(s)
        denom = jnp.sum(p, axis=-1, keepdims=True)
        o_h = jnp.einsum("bqk,bkv->bqv", p.astype(bf16), v,
                         preferred_element_type=f32)
        heads.append((o_h / denom).astype(bf16))
    concat = jnp.concatenate(heads, axis=-1)
    out = jnp.einsum("bqe,ed->bqd", concat, prepped["w_out"],
                     preferred_element_type=f32) + prepped["b_out"][0]
    return out


if __name__ == "__main__":
    # Lane-dense demo shapes: D = n_heads*d_k = n_heads*d_v = 128.
    B, S, D = 2, 128, 128
    d_k, d_v, n_heads = 32, 32, 4

    key = jax.random.PRNGKey(0)
    k_in, k_par = jax.random.split(key)
    kq, kk, kv = jax.random.split(k_in, 3)
    xq = jax.random.normal(kq, (B, S, D), jnp.float32)
    xk = jax.random.normal(kk, (B, S, D), jnp.float32)
    xv = jax.random.normal(kv, (B, S, D), jnp.float32)

    params = init_params(k_par, d_k, d_v, D, n_heads)
    prepped = prepare_params(params, d_k)          # one-time weight stacking

    out = multi_attention_forward((xq, xk, xv), prepped, n_heads, d_k, d_v)
    out = jax.block_until_ready(out)

    ref = reference_forward((xq, xk, xv), prepped, n_heads, d_k, d_v)
    ref = jax.block_until_ready(ref)

    # Reference uses the identical bf16-operand / f32-accumulate recipe, so
    # only accumulation-order differences remain -> tight tolerance holds.
    np.testing.assert_allclose(np.asarray(out), np.asarray(ref),
                               rtol=2e-3, atol=2e-3)
    print("KERNEL_OK")
</pallas_src>

<mosaic_0001>
module attributes {stable_mosaic.version = 11 : i64} {
  func.func @kernel(%arg0: i32, %arg1: i32, %arg2: memref<1x128x128xbf16, #tpu.memory_space<vmem>>, %arg3: memref<1x128x128xbf16, #tpu.memory_space<vmem>>, %arg4: memref<1x128x128xbf16, #tpu.memory_space<vmem>>, %arg5: memref<128x128xbf16, #tpu.memory_space<vmem>>, %arg6: memref<128x128xbf16, #tpu.memory_space<vmem>>, %arg7: memref<128x128xbf16, #tpu.memory_space<vmem>>, %arg8: memref<128x128xbf16, #tpu.memory_space<vmem>>, %arg9: memref<1x128xf32, #tpu.memory_space<vmem>>, %arg10: memref<1x128x128xf32, #tpu.memory_space<vmem>>, %arg11: memref<128x128xbf16, #tpu.memory_space<vmem>>, %arg12: memref<128x128xbf16, #tpu.memory_space<vmem>>, %arg13: memref<128x128xbf16, #tpu.memory_space<vmem>>, %arg14: memref<128x128xbf16, #tpu.memory_space<vmem>>) attributes {dimension_semantics = [#tpu.dimension_semantics<parallel>, #tpu.dimension_semantics<arbitrary>], iteration_bounds = array<i64: 2, 1>, scalar_prefetch = 0 : i64, scratch_operands = 4 : i64, tpu.core_type = #tpu.core_type<tc>, window_params = [{transform_indices = @transform_0, window_bounds = array<i64: 1, 128, 128>}, {transform_indices = @transform_1, window_bounds = array<i64: 1, 128, 128>}, {transform_indices = @transform_2, window_bounds = array<i64: 1, 128, 128>}, {pipeline_mode = #tpu.pipeline_mode<synchronous>, transform_indices = @transform_3, window_bounds = array<i64: 128, 128>}, {pipeline_mode = #tpu.pipeline_mode<synchronous>, transform_indices = @transform_4, window_bounds = array<i64: 128, 128>}, {pipeline_mode = #tpu.pipeline_mode<synchronous>, transform_indices = @transform_5, window_bounds = array<i64: 128, 128>}, {pipeline_mode = #tpu.pipeline_mode<synchronous>, transform_indices = @transform_6, window_bounds = array<i64: 128, 128>}, {pipeline_mode = #tpu.pipeline_mode<synchronous>, transform_indices = @transform_7, window_bounds = array<i64: 1, 128>}, {transform_indices = @transform_8, window_bounds = array<i64: 1, 128, 128>}]} {
    %c0_i32 = arith.constant 0 : i32
    %0 = arith.cmpi eq, %arg1, %c0_i32 : i32
    %1 = arith.extui %0 : i1 to i32
    %c0_i32_0 = arith.constant 0 : i32
    %2 = arith.cmpi ne, %1, %c0_i32_0 : i32
    scf.if %2 {
      %c0_62 = arith.constant 0 : index
      %c0_63 = arith.constant 0 : index
      %c0_64 = arith.constant 0 : index
      %86 = vector.load %arg3[%c0_62, %c0_63, %c0_64] : memref<1x128x128xbf16, #tpu.memory_space<vmem>>, vector<1x128x128xbf16>
      %87 = vector.shape_cast %86 : vector<1x128x128xbf16> to vector<128x128xbf16>
      %c0_65 = arith.constant 0 : index
      %c0_66 = arith.constant 0 : index
      %88 = vector.load %arg6[%c0_65, %c0_66] : memref<128x128xbf16, #tpu.memory_space<vmem>>, vector<128x128xbf16>
      %cst_67 = arith.constant dense<0.000000e+00> : vector<128x128xf32>
      %89 = tpu.matmul %87, %88, %cst_67 {dimension_numbers = #tpu.dot_dimension_numbers<[1], [0], [0], [1], [0, 0, 1, 1], [], []>} : vector<128x128xbf16>, vector<128x128xbf16>, vector<128x128xf32> -> vector<128x128xf32>
      %90 = arith.truncf %89 : vector<128x128xf32> to vector<128x128xbf16>
      %c0_68 = arith.constant 0 : index
      %c0_69 = arith.constant 0 : index
      %91 = vector.load %arg12[%c0_68, %c0_69] : memref<128x128xbf16, #tpu.memory_space<vmem>>, vector<128x128xbf16>
      tpu.vector_store %arg12[%c0_68, %c0_69], %90 {strides = array<i32>} : memref<128x128xbf16, #tpu.memory_space<vmem>>, vector<128x128xbf16>,
      %c0_70 = arith.constant 0 : index
      %c0_71 = arith.constant 0 : index
      %c0_72 = arith.constant 0 : index
      %92 = vector.load %arg4[%c0_70, %c0_71, %c0_72] : memref<1x128x128xbf16, #tpu.memory_space<vmem>>, vector<1x128x128xbf16>
      %93 = vector.shape_cast %92 : vector<1x128x128xbf16> to vector<128x128xbf16>
      %c0_73 = arith.constant 0 : index
      %c0_74 = arith.constant 0 : index
      %94 = vector.load %arg7[%c0_73, %c0_74] : memref<128x128xbf16, #tpu.memory_space<vmem>>, vector<128x128xbf16>
      %cst_75 = arith.constant dense<0.000000e+00> : vector<128x128xf32>
      %95 = tpu.matmul %93, %94, %cst_75 {dimension_numbers = #tpu.dot_dimension_numbers<[1], [0], [0], [1], [0, 0, 1, 1], [], []>} : vector<128x128xbf16>, vector<128x128xbf16>, vector<128x128xf32> -> vector<128x128xf32>
      %96 = arith.truncf %95 : vector<128x128xf32> to vector<128x128xbf16>
      %c0_76 = arith.constant 0 : index
      %c0_77 = arith.constant 0 : index
      %97 = vector.load %arg13[%c0_76, %c0_77] : memref<128x128xbf16, #tpu.memory_space<vmem>>, vector<128x128xbf16>
      tpu.vector_store %arg13[%c0_76, %c0_77], %96 {strides = array<i32>} : memref<128x128xbf16, #tpu.memory_space<vmem>>, vector<128x128xbf16>,
    } else {
    }
    %c0 = arith.constant 0 : index
    %c0_1 = arith.constant 0 : index
    %c0_2 = arith.constant 0 : index
    %3 = vector.load %arg2[%c0, %c0_1, %c0_2] : memref<1x128x128xbf16, #tpu.memory_space<vmem>>, vector<1x128x128xbf16>
    %4 = vector.shape_cast %3 : vector<1x128x128xbf16> to vector<128x128xbf16>
    %c0_3 = arith.constant 0 : index
    %c0_4 = arith.constant 0 : index
    %5 = vector.load %arg5[%c0_3, %c0_4] : memref<128x128xbf16, #tpu.memory_space<vmem>>, vector<128x128xbf16>
    %cst = arith.constant dense<0.000000e+00> : vector<128x128xf32>
    %6 = tpu.matmul %4, %5, %cst {dimension_numbers = #tpu.dot_dimension_numbers<[1], [0], [0], [1], [0, 0, 1, 1], [], []>} : vector<128x128xbf16>, vector<128x128xbf16>, vector<128x128xf32> -> vector<128x128xf32>
    %7 = arith.truncf %6 : vector<128x128xf32> to vector<128x128xbf16>
    %c0_5 = arith.constant 0 : index
    %c0_6 = arith.constant 0 : index
    %8 = vector.load %arg11[%c0_5, %c0_6] : memref<128x128xbf16, #tpu.memory_space<vmem>>, vector<128x128xbf16>
    tpu.vector_store %arg11[%c0_5, %c0_6], %7 {strides = array<i32>} : memref<128x128xbf16, #tpu.memory_space<vmem>>, vector<128x128xbf16>,
    %c0_7 = arith.constant 0 : index
    %c0_8 = arith.constant 0 : index
    %9 = vector.load %arg11[%c0_7, %c0_8] : memref<128x128xbf16, #tpu.memory_space<vmem>>, vector<128x32xbf16>
    %c0_9 = arith.constant 0 : index
    %c0_10 = arith.constant 0 : index
    %10 = vector.load %arg12[%c0_9, %c0_10] : memref<128x128xbf16, #tpu.memory_space<vmem>>, vector<128x32xbf16>
    %c0_11 = arith.constant 0 : index
    %c0_12 = arith.constant 0 : index
    %11 = vector.load %arg13[%c0_11, %c0_12] : memref<128x128xbf16, #tpu.memory_space<vmem>>, vector<128x32xbf16>
    %cst_13 = arith.constant dense<0.000000e+00> : vector<128x128xf32>
    %12 = tpu.matmul %9, %10, %cst_13 {dimension_numbers = #tpu.dot_dimension_numbers<[1], [1], [0], [0], [0, 0, 1, 0], [], []>} : vector<128x32xbf16>, vector<128x32xbf16>, vector<128x128xf32> -> vector<128x128xf32>
    %cst_14 = arith.constant dense<0xFF800000> : vector<128xf32>
    %13 = vector.multi_reduction <maximumf>, %12, %cst_14 [1] : vector<128x128xf32> to vector<128xf32>
    %14 = vector.shape_cast %13 : vector<128xf32> to vector<128x1xf32>
    %15 = vector.broadcast %14 : vector<128x1xf32> to vector<128x128xf32>
    %16 = arith.subf %12, %15 : vector<128x128xf32>
    %17 = math.exp %16 : vector<128x128xf32>
    %cst_15 = arith.constant dense<0.000000e+00> : vector<128xf32>
    %18 = vector.multi_reduction <add>, %17, %cst_15 [1] : vector<128x128xf32> to vector<128xf32>
    %19 = vector.shape_cast %18 : vector<128xf32> to vector<128x1xf32>
    %20 = arith.truncf %17 : vector<128x128xf32> to vector<128x128xbf16>
    %cst_16 = arith.constant dense<0.000000e+00> : vector<128x32xf32>
    %21 = tpu.matmul %20, %11, %cst_16 {dimension_numbers = #tpu.dot_dimension_numbers<[1], [0], [0], [1], [0, 0, 1, 1], [], []>} : vector<128x128xbf16>, vector<128x32xbf16>, vector<128x32xf32> -> vector<128x32xf32>
    %22 = vector.broadcast %19 : vector<128x1xf32> to vector<128x32xf32>
    %23 = arith.divf %21, %22 : vector<128x32xf32>
    %24 = arith.truncf %23 : vector<128x32xf32> to vector<128x32xbf16>
    %c0_17 = arith.constant 0 : index
    %c0_18 = arith.constant 0 : index
    %25 = vector.load %arg14[%c0_17, %c0_18] : memref<128x128xbf16, #tpu.memory_space<vmem>>, vector<128x32xbf16>
    tpu.vector_store %arg14[%c0_17, %c0_18], %24 {strides = array<i32>} : memref<128x128xbf16, #tpu.memory_space<vmem>>, vector<128x32xbf16>,
    %c0_19 = arith.constant 0 : index
    %c32 = arith.constant 32 : index
    %26 = vector.load %arg11[%c0_19, %c32] : memref<128x128xbf16, #tpu.memory_space<vmem>>, vector<128x32xbf16>
    %c0_20 = arith.constant 0 : index
    %c32_21 = arith.constant 32 : index
    %27 = vector.load %arg12[%c0_20, %c32_21] : memref<128x128xbf16, #tpu.memory_space<vmem>>, vector<128x32xbf16>
    %c0_22 = arith.constant 0 : index
    %c32_23 = arith.constant 32 : index
    %28 = vector.load %arg13[%c0_22, %c32_23] : memref<128x128xbf16, #tpu.memory_space<vmem>>, vector<128x32xbf16>
    %cst_24 = arith.constant dense<0.000000e+00> : vector<128x128xf32>
    %29 = tpu.matmul %26, %27, %cst_24 {dimension_numbers = #tpu.dot_dimension_numbers<[1], [1], [0], [0], [0, 0, 1, 0], [], []>} : vector<128x32xbf16>, vector<128x32xbf16>, vector<128x128xf32> -> vector<128x128xf32>
    %cst_25 = arith.constant dense<0xFF800000> : vector<128xf32>
    %30 = vector.multi_reduction <maximumf>, %29, %cst_25 [1] : vector<128x128xf32> to vector<128xf32>
    %31 = vector.shape_cast %30 : vector<128xf32> to vector<128x1xf32>
    %32 = vector.broadcast %31 : vector<128x1xf32> to vector<128x128xf32>
    %33 = arith.subf %29, %32 : vector<128x128xf32>
    %34 = math.exp %33 : vector<128x128xf32>
    %cst_26 = arith.constant dense<0.000000e+00> : vector<128xf32>
    %35 = vector.multi_reduction <add>, %34, %cst_26 [1] : vector<128x128xf32> to vector<128xf32>
    %36 = vector.shape_cast %35 : vector<128xf32> to vector<128x1xf32>
    %37 = arith.truncf %34 : vector<128x128xf32> to vector<128x128xbf16>
    %cst_27 = arith.constant dense<0.000000e+00> : vector<128x32xf32>
    %38 = tpu.matmul %37, %28, %cst_27 {dimension_numbers = #tpu.dot_dimension_numbers<[1], [0], [0], [1], [0, 0, 1, 1], [], []>} : vector<128x128xbf16>, vector<128x32xbf16>, vector<128x32xf32> -> vector<128x32xf32>
    %39 = vector.broadcast %36 : vector<128x1xf32> to vector<128x32xf32>
    %40 = arith.divf %38, %39 : vector<128x32xf32>
    %41 = arith.truncf %40 : vector<128x32xf32> to vector<128x32xbf16>
    %c0_28 = arith.constant 0 : index
    %c32_29 = arith.constant 32 : index
    %42 = vector.load %arg14[%c0_28, %c32_29] : memref<128x128xbf16, #tpu.memory_space<vmem>>, vector<128x32xbf16>
    tpu.vector_store %arg14[%c0_28, %c32_29], %41 {strides = array<i32>} : memref<128x128xbf16, #tpu.memory_space<vmem>>, vector<128x32xbf16>,
    %c0_30 = arith.constant 0 : index
    %c64 = arith.constant 64 : index
    %43 = vector.load %arg11[%c0_30, %c64] : memref<128x128xbf16, #tpu.memory_space<vmem>>, vector<128x32xbf16>
    %c0_31 = arith.constant 0 : index
    %c64_32 = arith.constant 64 : index
    %44 = vector.load %arg12[%c0_31, %c64_32] : memref<128x128xbf16, #tpu.memory_space<vmem>>, vector<128x32xbf16>
    %c0_33 = arith.constant 0 : index
    %c64_34 = arith.constant 64 : index
    %45 = vector.load %arg13[%c0_33, %c64_34] : memref<128x128xbf16, #tpu.memory_space<vmem>>, vector<128x32xbf16>
    %cst_35 = arith.constant dense<0.000000e+00> : vector<128x128xf32>
    %46 = tpu.matmul %43, %44, %cst_35 {dimension_numbers = #tpu.dot_dimension_numbers<[1], [1], [0], [0], [0, 0, 1, 0], [], []>} : vector<128x32xbf16>, vector<128x32xbf16>, vector<128x128xf32> -> vector<128x128xf32>
    %cst_36 = arith.constant dense<0xFF800000> : vector<128xf32>
    %47 = vector.multi_reduction <maximumf>, %46, %cst_36 [1] : vector<128x128xf32> to vector<128xf32>
    %48 = vector.shape_cast %47 : vector<128xf32> to vector<128x1xf32>
    %49 = vector.broadcast %48 : vector<128x1xf32> to vector<128x128xf32>
    %50 = arith.subf %46, %49 : vector<128x128xf32>
    %51 = math.exp %50 : vector<128x128xf32>
    %cst_37 = arith.constant dense<0.000000e+00> : vector<128xf32>
    %52 = vector.multi_reduction <add>, %51, %cst_37 [1] : vector<128x128xf32> to vector<128xf32>
    %53 = vector.shape_cast %52 : vector<128xf32> to vector<128x1xf32>
    %54 = arith.truncf %51 : vector<128x128xf32> to vector<128x128xbf16>
    %cst_38 = arith.constant dense<0.000000e+00> : vector<128x32xf32>
    %55 = tpu.matmul %54, %45, %cst_38 {dimension_numbers = #tpu.dot_dimension_numbers<[1], [0], [0], [1], [0, 0, 1, 1], [], []>} : vector<128x128xbf16>, vector<128x32xbf16>, vector<128x32xf32> -> vector<128x32xf32>
    %56 = vector.broadcast %53 : vector<128x1xf32> to vector<128x32xf32>
    %57 = arith.divf %55, %56 : vector<128x32xf32>
    %58 = arith.truncf %57 : vector<128x32xf32> to vector<128x32xbf16>
    %c0_39 = arith.constant 0 : index
    %c64_40 = arith.constant 64 : index
    %59 = vector.load %arg14[%c0_39, %c64_40] : memref<128x128xbf16, #tpu.memory_space<vmem>>, vector<128x32xbf16>
    tpu.vector_store %arg14[%c0_39, %c64_40], %58 {strides = array<i32>} : memref<128x128xbf16, #tpu.memory_space<vmem>>, vector<128x32xbf16>,
    %c0_41 = arith.constant 0 : index
    %c96 = arith.constant 96 : index
    %60 = vector.load %arg11[%c0_41, %c96] : memref<128x128xbf16, #tpu.memory_space<vmem>>, vector<128x32xbf16>
    %c0_42 = arith.constant 0 : index
    %c96_43 = arith.constant 96 : index
    %61 = vector.load %arg12[%c0_42, %c96_43] : memref<128x128xbf16, #tpu.memory_space<vmem>>, vector<128x32xbf16>
    %c0_44 = arith.constant 0 : index
    %c96_45 = arith.constant 96 : index
    %62 = vector.load %arg13[%c0_44, %c96_45] : memref<128x128xbf16, #tpu.memory_space<vmem>>, vector<128x32xbf16>
    %cst_46 = arith.constant dense<0.000000e+00> : vector<128x128xf32>
    %63 = tpu.matmul %60, %61, %cst_46 {dimension_numbers = #tpu.dot_dimension_numbers<[1], [1], [0], [0], [0, 0, 1, 0], [], []>} : vector<128x32xbf16>, vector<128x32xbf16>, vector<128x128xf32> -> vector<128x128xf32>
    %cst_47 = arith.constant dense<0xFF800000> : vector<128xf32>
    %64 = vector.multi_reduction <maximumf>, %63, %cst_47 [1] : vector<128x128xf32> to vector<128xf32>
    %65 = vector.shape_cast %64 : vector<128xf32> to vector<128x1xf32>
    %66 = vector.broadcast %65 : vector<128x1xf32> to vector<128x128xf32>
    %67 = arith.subf %63, %66 : vector<128x128xf32>
    %68 = math.exp %67 : vector<128x128xf32>
    %cst_48 = arith.constant dense<0.000000e+00> : vector<128xf32>
    %69 = vector.multi_reduction <add>, %68, %cst_48 [1] : vector<128x128xf32> to vector<128xf32>
    %70 = vector.shape_cast %69 : vector<128xf32> to vector<128x1xf32>
    %71 = arith.truncf %68 : vector<128x128xf32> to vector<128x128xbf16>
    %cst_49 = arith.constant dense<0.000000e+00> : vector<128x32xf32>
    %72 = tpu.matmul %71, %62, %cst_49 {dimension_numbers = #tpu.dot_dimension_numbers<[1], [0], [0], [1], [0, 0, 1, 1], [], []>} : vector<128x128xbf16>, vector<128x32xbf16>, vector<128x32xf32> -> vector<128x32xf32>
    %73 = vector.broadcast %70 : vector<128x1xf32> to vector<128x32xf32>
    %74 = arith.divf %72, %73 : vector<128x32xf32>
    %75 = arith.truncf %74 : vector<128x32xf32> to vector<128x32xbf16>
    %c0_50 = arith.constant 0 : index
    %c96_51 = arith.constant 96 : index
    %76 = vector.load %arg14[%c0_50, %c96_51] : memref<128x128xbf16, #tpu.memory_space<vmem>>, vector<128x32xbf16>
    tpu.vector_store %arg14[%c0_50, %c96_51], %75 {strides = array<i32>} : memref<128x128xbf16, #tpu.memory_space<vmem>>, vector<128x32xbf16>,
    %c0_52 = arith.constant 0 : index
    %c0_53 = arith.constant 0 : index
    %77 = vector.load %arg14[%c0_52, %c0_53] : memref<128x128xbf16, #tpu.memory_space<vmem>>, vector<128x128xbf16>
    %c0_54 = arith.constant 0 : index
    %c0_55 = arith.constant 0 : index
    %78 = vector.load %arg8[%c0_54, %c0_55] : memref<128x128xbf16, #tpu.memory_space<vmem>>, vector<128x128xbf16>
    %cst_56 = arith.constant dense<0.000000e+00> : vector<128x128xf32>
    %79 = tpu.matmul %77, %78, %cst_56 {dimension_numbers = #tpu.dot_dimension_numbers<[1], [0], [0], [1], [0, 0, 1, 1], [], []>} : vector<128x128xbf16>, vector<128x128xbf16>, vector<128x128xf32> -> vector<128x128xf32>
    %c0_57 = arith.constant 0 : index
    %c0_58 = arith.constant 0 : index
    %80 = vector.load %arg9[%c0_57, %c0_58] : memref<1x128xf32, #tpu.memory_space<vmem>>, vector<1x128xf32>
    %81 = vector.broadcast %80 : vector<1x128xf32> to vector<128x128xf32>
    %82 = arith.addf %79, %81 : vector<128x128xf32>
    %c0_59 = arith.constant 0 : index
    %c0_60 = arith.constant 0 : index
    %c0_61 = arith.constant 0 : index
    %83 = vector.load %arg10[%c0_59, %c0_60, %c0_61] : memref<1x128x128xf32, #tpu.memory_space<vmem>>, vector<1x128x128xf32>
    %84 = vector.shape_cast %83 : vector<1x128x128xf32> to vector<128x128xf32>
    %85 = vector.shape_cast %82 : vector<128x128xf32> to vector<1x128x128xf32>
    tpu.vector_store %arg10[%c0_59, %c0_60, %c0_61], %85 {strides = array<i32>} : memref<1x128x128xf32, #tpu.memory_space<vmem>>, vector<1x128x128xf32>,
    return
  }
  func.func @transform_0(%arg0: i32, %arg1: i32) -> (i32, i32, i32) {
    %c0_i32 = arith.constant 0 : i32
    %c0_i32_0 = arith.constant 0 : i32
    return %arg0, %arg1, %c0_i32 : i32, i32, i32
  }
  func.func @transform_1(%arg0: i32, %arg1: i32) -> (i32, i32, i32) {
    %c0_i32 = arith.constant 0 : i32
    %c0_i32_0 = arith.constant 0 : i32
    %c0_i32_1 = arith.constant 0 : i32
    return %arg0, %c0_i32, %c0_i32_0 : i32, i32, i32
  }
  func.func @transform_2(%arg0: i32, %arg1: i32) -> (i32, i32, i32) {
    %c0_i32 = arith.constant 0 : i32
    %c0_i32_0 = arith.constant 0 : i32
    %c0_i32_1 = arith.constant 0 : i32
    return %arg0, %c0_i32, %c0_i32_0 : i32, i32, i32
  }
  func.func @transform_3(%arg0: i32, %arg1: i32) -> (i32, i32) {
    %c0_i32 = arith.constant 0 : i32
    %c0_i32_0 = arith.constant 0 : i32
    %c0_i32_1 = arith.constant 0 : i32
    return %c0_i32, %c0_i32_0 : i32, i32
  }
  func.func @transform_4(%arg0: i32, %arg1: i32) -> (i32, i32) {
    %c0_i32 = arith.constant 0 : i32
    %c0_i32_0 = arith.constant 0 : i32
    %c0_i32_1 = arith.constant 0 : i32
    return %c0_i32, %c0_i32_0 : i32, i32
  }
  func.func @transform_5(%arg0: i32, %arg1: i32) -> (i32, i32) {
    %c0_i32 = arith.constant 0 : i32
    %c0_i32_0 = arith.constant 0 : i32
    %c0_i32_1 = arith.constant 0 : i32
    return %c0_i32, %c0_i32_0 : i32, i32
  }
  func.func @transform_6(%arg0: i32, %arg1: i32) -> (i32, i32) {
    %c0_i32 = arith.constant 0 : i32
    %c0_i32_0 = arith.constant 0 : i32
    %c0_i32_1 = arith.constant 0 : i32
    return %c0_i32, %c0_i32_0 : i32, i32
  }
  func.func @transform_7(%arg0: i32, %arg1: i32) -> (i32, i32) {
    %c0_i32 = arith.constant 0 : i32
    %c0_i32_0 = arith.constant 0 : i32
    %c0_i32_1 = arith.constant 0 : i32
    return %c0_i32, %c0_i32_0 : i32, i32
  }
  func.func @transform_8(%arg0: i32, %arg1: i32) -> (i32, i32, i32) {
    %c0_i32 = arith.constant 0 : i32
    %c0_i32_0 = arith.constant 0 : i32
    return %arg0, %arg1, %c0_i32 : i32, i32, i32
  }
}

</mosaic_0001>

<bundles_post_ra>
// kernel: tpu_custom_call.1
= control target key start
LH: loop header
LB: loop body
LE: loop exit
PB: predicated region body
PF: predicated region fallthrough
CT: control target
= control target key end

     0   :  { %s6712_s0 = inlined_call_operand.hbm [shape: bf16[2,128,128], index: 0, kind: input, shape index: {}]   ;;  %s6713_s1 = inlined_call_operand.hbm [shape: bf16[2,128,128], index: 1, kind: input, shape index: {}]   ;;  %s6714_s2 = inlined_call_operand.hbm [shape: bf16[2,128,128], index: 2, kind: input, shape index: {}]   ;;  %s6715_s3 = inlined_call_operand.hbm [shape: bf16[128,128], index: 3, kind: input, shape index: {}]   ;;  %s6716_s4 = inlined_call_operand.hbm [shape: bf16[128,128], index: 4, kind: input, shape index: {}]   ;;  %s6717_s5 = inlined_call_operand.hbm [shape: bf16[128,128], index: 5, kind: input, shape index: {}]   ;;  %s6718_s6 = inlined_call_operand.hbm [shape: bf16[128,128], index: 6, kind: input, shape index: {}]   ;;  %s6719_s7 = inlined_call_operand.vmem [shape: f32[1,128], index: 7, kind: input, shape index: {}]   ;;  %s6720_s8 = inlined_call_operand.hbm [shape: f32[2,128,128], index: 8, kind: output, shape index: {}]  }
   0x1   :  { %6754 = sst [smem:[#allocation82_spill]] %s6713_s1 }
   0x2   :  { %6755 = sst [smem:[#allocation83_spill]] %s6715_s3 }
   0x3   :  { %6756 = sst [smem:[#allocation84_spill]] %s6717_s5 }
   0x4   :  { %6757 = sst [smem:[#allocation85_spill]] %s6719_s7 }
   0x5   :  { %6758 = sst [smem:[#allocation86_spill]] %s6720_s8 }
   0x6   :  { %13 = vsyncpa [#allocation7], 0 }
   0x7   :  { %15 = vsyncpa [#allocation7 + $0x1], 0 }
   0x8   :  { %16 = vsyncpa [#allocation10], 0 }
   0x9   :  { %18 = vsyncpa [#allocation10 + $0x1], 0 }
   0xa   :  { %19 = vsyncpa [#allocation13], 0 }
   0xb   :  { %20 = vsyncpa [#allocation16], 0 }
   0xc   :  { %21 = vsyncpa [#allocation8], 0 }
   0xd   :  { %23 = vsyncpa [#allocation8 + $0x1], 0  ;;  %s5181_s27 = smov 0   ;;  %s5183_s28 = smov 0  }
   0xe   :  { %s5185_s29 = smov 0   ;;  %s5187_s30 = smov 0  }
   0xf   :  { %s5189_s9 = smov 0   ;;  %s5191_s10 = smov 0  }
  0x10 LB: > { %6759 = sst [smem:[#allocation24_spill]] %s5099_s27  ;;  %s5212_s11 = sadd.s32 4294967295, %s5119_s10   ;;  %s5119_s10 = sphi %s5191_s10, %s29_s10   ;;  %s5115_s9 = sphi %s5189_s9, %s6905_s9   ;;  %s5111_s30 = sphi %s5187_s30, %s6904_s30   ;;  %s5107_s29 = sphi %s5185_s29, %s6908_s29   ;;  %s5103_s28 = sphi %s5183_s28, %s6907_s28   ;;  %s5099_s27 = sphi %s5181_s27, %s6906_s27  }
  0x11   : > { %6760 = sst [smem:[#allocation25_spill]] %s5111_s30  ;;  %s3660_s12 = sadd.s32 4294967294, %s5119_s10  }
  0x12   : > { %6761 = sst [smem:[#allocation26_spill]] %s5115_s9  ;;  %p63_p0 = scmp.ne.s32.totalorder %s5103_s28, %s5099_s27 }
  0x13   : > { %6762 = sst [smem:[#allocation27_spill]] %s5119_s10  ;;  %p6721_p1 = scmp.eq.s32.totalorder %s5212_s11, 0 }
  0x14   : > { %p252_p3 = scmp.eq.s32.totalorder %s3660_s12, 1  ;;  %p3661_p5 = scmp.ge.s32.totalorder %s5119_s10, 1 }
  0x15   : > { %p5221_p4 = por %p6721_p1, %p63_p0  ;;  %p259_p7 = scmp.lt.s32.totalorder %s5119_s10, 3 }
  0x16   : > { %p5226_p6 = por %p252_p3, %p63_p0  ;;  %s5121_s16 = smov [#allocation12]  }
  0x17   : > { %s6763_s13 = scalar_select %p5221_p4, 1, 0 }
  0x18   : > { %s6764_s14 = scalar_select %p5226_p6, 1, 0 }
  0x19   : > { %p5231_p8 = pnand %p3661_p5, %p259_p7  ;;  %s271_s17 = sshll.u32 %s5121_s16, 4  ;;  %s5235_s17 = int_to_ptr.vmem [resolvable:$true] %s271_s17 }
  0x1a   : > { %6765 = sst [smem:[#allocation28_spill]] %s6764_s14  ;;  %s5122_s19 = smov [#allocation15]  }
  0x1b   : > { %s6766_s15 = scalar_select %p5231_p8, 1, 0 }
  0x1c   : > { %p4415_p9 = pneg %p5231_p8  ;;  %s297_s20 = sshll.u32 %s5122_s19, 4  ;;  %s5246_s20 = int_to_ptr.vmem [resolvable:$true] %s297_s20 }
  0x1d   : > { %s6768_s3 = sld [smem:[#allocation83_spill]] }
  0x1e   : > { %p5242_p11 = pnand %p4415_p9, %p6721_p1 }
  0x20   : > { %s6767_s18 = scalar_select %p5242_p11, 1, 0 }
  0x21   : > { %p5256_p13 = pneg %p5242_p11 }
  0x23   : > { %s4823_s23 = scalar_lea.hbm %s6768_s3, 1024 }
  0x24   : > { %p4824_p12 = scmp.ne.s32.totalorder %s6768_s3, %s4823_s23  ;;  %p4830_p5 = scmp.lt.u32.totalorder %s4823_s23, %s6768_s3 }
  0x25   : > { %s6769_s26 = scalar_select %p5256_p13, 1, 0 }
  0x26   : > { %p4826_p0 = pnand %p5256_p13, %p4824_p12 }
  0x28   : > { %p4827_p3 = pneg %p4826_p0 }
  0x2a   : > { %p4832_p7 = pnand %p4830_p5, %p4827_p3 }
  0x2c   : > { %4835 = shalt.err (!%p4832_p7)
}
  0x2d   : > { %s4836_s19 = scalar_lea.vmem %s5235_s17, 1024  ;;  %p4844_p2 = scmp.lt.s32.totalorder %s5235_s17, %s5235_s17 }
  0x2e   : > { %p4837_p9 = scmp.ne.s32.totalorder %s5235_s17, %s4836_s19  ;;  %p4845_p6 = scmp.lt.s32.totalorder %s4836_s19, %s4836_s19 }
  0x30   : > { %p4839_p10 = pnand %p4837_p9, %p5256_p13  ;;  %p4846_p12 = por %p4845_p6, %p4844_p2 }
  0x32   : > { %p4840_p1 = pneg %p4839_p10 }
  0x34   : > { %p4847_p0 = pnand %p4846_p12, %p4840_p1 }
  0x36   : > { %4850 = shalt.err (!%p4847_p0)
}
  0x37   : > { %s6725_s21 = smov 64   ;;  %s6727_s22 = smov 4  }
  0x38   : > { %4418 = dma.hbm_to_vmem [thread:$0]  (!%p5242_p11), %s6768_s3, 1024, %s5235_s17, [#allocation13], %s6725_s21, %s6725_s21, %s6727_s22  }
  0x39   : > { %s6770_s5 = sld [smem:[#allocation84_spill]] }
  0x3f   : > { %s4851_s16 = scalar_lea.hbm %s6770_s5, 1024 }
  0x40   : > { %p4852_p1 = scmp.ne.s32.totalorder %s6770_s5, %s4851_s16  ;;  %p4858_p10 = scmp.lt.u32.totalorder %s4851_s16, %s6770_s5 }
  0x42   : > { %p4854_p2 = pnand %p4852_p1, %p5256_p13 }
  0x44   : > { %p4855_p6 = pneg %p4854_p2 }
  0x46   : > { %p4860_p3 = pnand %p4858_p10, %p4855_p6 }
  0x48   : > { %4863 = shalt.err (!%p4860_p3)
}
  0x49   : > { %s4864_s17 = scalar_lea.vmem %s5246_s20, 1024  ;;  %p4872_p12 = scmp.lt.s32.totalorder %s5246_s20, %s5246_s20 }
  0x4a   : > { %p4865_p5 = scmp.ne.s32.totalorder %s5246_s20, %s4864_s17  ;;  %p4873_p0 = scmp.lt.s32.totalorder %s4864_s17, %s4864_s17 }
  0x4c   : > { %p4867_p7 = pnand %p4865_p5, %p5256_p13  ;;  %p4874_p1 = por %p4873_p0, %p4872_p12 }
  0x4e   : > { %p4868_p9 = pneg %p4867_p7 }
  0x50   : > { %p4875_p2 = pnand %p4874_p1, %p4868_p9 }
  0x52   : > { %4878 = shalt.err (!%p4875_p2)
}
  0x53   : > { %4424 = dma.hbm_to_vmem [thread:$0]  (!%p5242_p11), %s6770_s5, 1024, %s5246_s20, [#allocation16], %s6725_s21, %s6725_s21, %s6727_s22  }
  0x54   : > { %s41_s14 = sadd.s32 1, %s5115_s9  ;;  %s50_s23 = sadd.s32 1, %s5107_s29 }
  0x55   : > { %p43_p6 = scmp.ge.s32.totalorder %s41_s14, 2  ;;  %p57_p10 = scmp.ne.s32.totalorder %s5107_s29, %s5103_s28 }
  0x56   : > { %p58_p3 = scmp.eq.s32.totalorder %s5119_s10, 0  ;;  %p4446_p5 = scmp.lt.s32.totalorder %s5119_s10, 2 }
  0x57   : > { %s6910_s14 = smov (%p43_p6, %s41_s14), 0  ;;  %p6772_p9 = scmp.eq.s32.totalorder %s5212_s11, 1 }
  0x58   : > { %6771 = sst [smem:[#allocation29_spill]] %s6910_s14  ;;  %p59_p7 = por %p58_p3, %p57_p10 }
  0x59   : > { %p5316_p12 = por %p6772_p9, %p57_p10  ;;  %s45_s25 = ssub.s32 %s5115_s9, %s6910_s14 }
  0x5a   : > { %s6729_s12 = sand.u32 1, %s5107_s29   ;;  %p48_p0 = scmp.eq.s32.totalorder %s45_s25, 0 }
  0x5b   : > { %s6773_s24 = scalar_select %p5316_p12, 1, 0 }
  0x5c   : > { %s5325_s20 = sshll.u32 %s6729_s12, 6  ;;  %s5328_s16 = sshll.u32 %s5115_s9, 10 }
  0x5d   : > { %6774 = sst [smem:[#allocation30_spill]] %s6773_s24  ;;  %p5330_p1 = pnand %p4446_p5, %p59_p7 }
  0x5e   : > { %s5335_s17 = scalar_select %p48_p0, %s5107_s29, %s50_s23  }
  0x5f   : > { %s6775_s19 = scalar_select %p5330_p1, 1, 0 }
  0x60   : > { %6776 = sst [smem:[#allocation31_spill]] %s5335_s17  ;;  %s350_s8 = sand.u32 1, %s5119_s10  }
  0x61   : > { %s6777_s1 = sld [smem:[#allocation82_spill]]  ;;  %s354_s25 = scalar_lea.vmem [#allocation9], %s5325_s20 }
  0x62   : > { %s361_s12 = sshll.u32 %s354_s25, 4  ;;  %s5347_s3 = scalar_lea.sflag [#allocation10], %s350_s8  ;;  %s5345_s12 = int_to_ptr.vmem [resolvable:$true] %s361_s12 }
  0x63   : > { %p5353_p6 = pneg %p5330_p1 }
  0x65   : > { %s6778_s23 = scalar_select %p5353_p6, 1, 0 }
  0x67   : > { %s5342_s22 = scalar_lea.hbm %s6777_s1, %s5328_s16  ;;  %s4884_s14 = scalar_lea.hbm %s6777_s1, 2048 }
  0x68   : > { %s4879_s5 = scalar_lea.hbm %s5342_s22, 1024  ;;  %p4885_p5 = scmp.lt.u32.totalorder %s5342_s22, %s6777_s1 }
  0x69   : > { %p4880_p2 = scmp.ne.s32.totalorder %s5342_s22, %s4879_s5  ;;  %p4886_p7 = scmp.lt.u32.totalorder %s4884_s14, %s4879_s5 }
  0x6a   : > { %p4888_p0 = scmp.lt.u32.totalorder %s4879_s5, %s5342_s22 }
  0x6b   : > { %p4882_p10 = pnand %p5353_p6, %p4880_p2  ;;  %p4887_p9 = por %p4886_p7, %p4885_p5 }
  0x6d   : > { %p4883_p3 = pneg %p4882_p10  ;;  %p4889_p12 = por %p4888_p0, %p4887_p9 }
  0x6f   : > { %p4890_p4 = pnand %p4889_p12, %p4883_p3 }
  0x71   : > { %4893 = shalt.err (!%p4890_p4)
}
  0x72   : > { %s4894_s8 = scalar_lea.vmem %s5345_s12, 1024  ;;  %s5125_s21 = smov [#allocation9]  }
  0x73   : > { %p4895_p2 = scmp.ne.s32.totalorder %s5345_s12, %s4894_s8  ;;  %s4899_s27 = sshll.u32 %s5125_s21, 4  ;;  %s4900_s27 = int_to_ptr.vmem [resolvable:$false] %s4899_s27 }
  0x74   : > { %s4901_s9 = scalar_lea.vmem %s4900_s27, 2048  ;;  %p4902_p11 = scmp.lt.s32.totalorder %s5345_s12, %s4900_s27 }
  0x75   : > { %p4897_p10 = pnand %p4895_p2, %p5353_p6  ;;  %p4903_p13 = scmp.lt.s32.totalorder %s4901_s9, %s4894_s8 }
  0x77   : > { %p4898_p8 = pneg %p4897_p10  ;;  %p4904_p5 = por %p4903_p13, %p4902_p11 }
  0x79   : > { %p4905_p7 = pnand %p4904_p5, %p4898_p8 }
  0x7b   : > { %4908 = shalt.err (!%p4905_p7)
}
  0x7c   : > { %s6779_s5 = smov 4   ;;  %s6780_s14 = smov 64  }
  0x7d   : > { %4434 = dma.hbm_to_vmem [thread:$0]  (!%p5330_p1), %s5342_s22, 1024, %s5345_s12, %s5347_s3, %s6780_s14, %s6780_s14, %s6779_s5  }
  0x7e   : > { %s5126_s25 = smov [#allocation14]   ;;  %s5127_s21 = smov [#allocation17]  }
  0x7f   : > { %s284_s1 = sshll.u32 %s5126_s25, 4  ;;  %s310_s17 = sshll.u32 %s5127_s21, 4  ;;  %s285_s1 = int_to_ptr.vmem [resolvable:$true] %s284_s1  ;;  %s311_s17 = int_to_ptr.vmem [resolvable:$true] %s310_s17 }
  0x80   : > { %s4909_s9 = scalar_lea.hbm %s6716_s4, 1024  ;;  %p6781_p8 = scmp.ne.s32.totalorder %s6769_s26, 0 }
  0x81   : > { %p4910_p4 = scmp.ne.s32.totalorder %s6716_s4, %s4909_s9  ;;  %p4916_p12 = scmp.lt.u32.totalorder %s4909_s9, %s6716_s4 }
  0x83   : > { %p4912_p11 = pnand %p4910_p4, %p6781_p8 }
  0x85   : > { %p4913_p13 = pneg %p4912_p11 }
  0x87   : > { %p4918_p3 = pnand %p4916_p12, %p4913_p13 }
  0x89   : > { %4921 = shalt.err (!%p4918_p3)
}
  0x8a   : > { %s4922_s22 = scalar_lea.vmem %s285_s1, 1024  ;;  %p4930_p10 = scmp.lt.s32.totalorder %s285_s1, %s285_s1 }
  0x8b   : > { %p4923_p9 = scmp.ne.s32.totalorder %s285_s1, %s4922_s22  ;;  %p4931_p5 = scmp.lt.s32.totalorder %s4922_s22, %s4922_s22 }
  0x8d   : > { %p4925_p0 = pnand %p4923_p9, %p6781_p8  ;;  %p4932_p7 = por %p4931_p5, %p4930_p10 }
  0x8f   : > { %p4926_p2 = pneg %p4925_p0 }
  0x91   : > { %p4933_p1 = pnand %p4932_p7, %p4926_p2 }
  0x93   : > { %4936 = shalt.err (!%p4933_p1)
}
  0x94   : > { %p6782_p4 = scmp.ne.s32.totalorder %s6767_s18, 0  ;;  %s4937_s12 = scalar_lea.hbm %s6718_s6, 1024 }
  0x95   : > { %p4938_p11 = scmp.ne.s32.totalorder %s6718_s6, %s4937_s12  ;;  %p4944_p12 = scmp.lt.u32.totalorder %s4937_s12, %s6718_s6 }
  0x96   : > { %4421 = dma.hbm_to_vmem [thread:$0]  (!%p6782_p4), %s6716_s4, 1024, %s285_s1, [#allocation13], %s6780_s14, %s6780_s14, %s6779_s5  }
  0x97   : > { %p4940_p1 = pnand %p4938_p11, %p6781_p8 }
  0x99   : > { %p4941_p13 = pneg %p4940_p1 }
  0x9b   : > { %p4946_p3 = pnand %p4944_p12, %p4941_p13 }
  0x9d   : > { %4949 = shalt.err (!%p4946_p3)
}
  0x9e   : > { %s4950_s9 = scalar_lea.vmem %s311_s17, 1024  ;;  %p4958_p10 = scmp.lt.s32.totalorder %s311_s17, %s311_s17 }
  0x9f   : > { %p4951_p9 = scmp.ne.s32.totalorder %s311_s17, %s4950_s9  ;;  %p4959_p5 = scmp.lt.s32.totalorder %s4950_s9, %s4950_s9 }
  0xa1   : > { %p4953_p0 = pnand %p4951_p9, %p6781_p8  ;;  %p4960_p7 = por %p4959_p5, %p4958_p10 }
  0xa3   : > { %p4954_p2 = pneg %p4953_p0 }
  0xa5   : > { %p4961_p6 = pnand %p4960_p7, %p4954_p2 }
  0xa7   : > { %4964 = shalt.err (!%p4961_p6)
}
  0xa8   : > { %4427 = dma.hbm_to_vmem [thread:$0]  (!%p6782_p4), %s6718_s6, 1024, %s311_s17, [#allocation16], %s6780_s14, %s6780_s14, %s6779_s5  }
  0xa9   : > { %s5426_s30 = scalar_lea.hbm %s6712_s0, %s5328_s16  ;;  %s331_s18 = scalar_lea.vmem [#allocation6], %s5325_s20 }
  0xaa   : > { %s340_s10 = sshll.u32 %s331_s18, 4  ;;  %s5435_s25 = scalar_lea.hbm %s6714_s2, %s5328_s16  ;;  %s5429_s10 = int_to_ptr.vmem [resolvable:$true] %s340_s10 }
  0xab   : > { %s6783_s21 = sand.u32 1, %s5107_s29   ;;  %s4965_s27 = scalar_lea.hbm %s5426_s30, 1024 }
  0xac   : > { %s5439_s17 = scalar_lea.sflag [#allocation7], %s6783_s21  ;;  %p4966_p6 = scmp.ne.s32.totalorder %s5426_s30, %s4965_s27 }
  0xad   : > { %p6784_p8 = scmp.ne.s32.totalorder %s6778_s23, 0  ;;  %s4970_s1 = scalar_lea.hbm %s6712_s0, 2048 }
  0xae   : > { %p4971_p1 = scmp.lt.u32.totalorder %s5426_s30, %s6712_s0  ;;  %p4972_p13 = scmp.lt.u32.totalorder %s4970_s1, %s4965_s27 }
  0xaf   : > { %p4968_p4 = pnand %p4966_p6, %p6784_p8  ;;  %p4974_p3 = scmp.lt.u32.totalorder %s4965_s27, %s5426_s30 }
  0xb0   : > { %p4973_p12 = por %p4972_p13, %p4971_p1 }
  0xb1   : > { %p4969_p11 = pneg %p4968_p4 }
  0xb2   : > { %p4975_p9 = por %p4974_p3, %p4973_p12 }
  0xb4   : > { %p4976_p0 = pnand %p4975_p9, %p4969_p11 }
  0xb6   : > { %4979 = shalt.err (!%p4976_p0)
}
  0xb7   : > { %s4980_s16 = scalar_lea.vmem %s5429_s10, 1024  ;;  %s5128_s7 = smov [#allocation6]  }
  0xb8   : > { %p4981_p2 = scmp.ne.s32.totalorder %s5429_s10, %s4980_s16  ;;  %s4985_s18 = sshll.u32 %s5128_s7, 4  ;;  %s4986_s18 = int_to_ptr.vmem [resolvable:$false] %s4985_s18 }
  0xb9   : > { %s4987_s24 = scalar_lea.vmem %s4986_s18, 2048  ;;  %p4988_p7 = scmp.lt.s32.totalorder %s5429_s10, %s4986_s18 }
  0xba   : > { %p4983_p10 = pnand %p4981_p2, %p6784_p8  ;;  %p4989_p6 = scmp.lt.s32.totalorder %s4987_s24, %s4980_s16 }
  0xbc   : > { %p4984_p5 = pneg %p4983_p10  ;;  %p4990_p4 = por %p4989_p6, %p4988_p7 }
  0xbe   : > { %p4991_p1 = pnand %p4990_p4, %p4984_p5 }
  0xc0   : > { %4994 = shalt.err (!%p4991_p1)
}
  0xc1   : > { %p6785_p11 = scmp.ne.s32.totalorder %s6775_s19, 0  ;;  %s375_s12 = scalar_lea.vmem [#allocation11], %s5325_s20 }
  0xc2   : > { %s382_s21 = sshll.u32 %s375_s12, 4  ;;  %s4995_s27 = scalar_lea.hbm %s5435_s25, 1024  ;;  %s5467_s21 = int_to_ptr.vmem [resolvable:$true] %s382_s21 }
  0xc3   : > { %4431 = dma.hbm_to_vmem [thread:$0]  (!%p6785_p11), %s5426_s30, 1024, %s5429_s10, %s5439_s17, %s6780_s14, %s6780_s14, %s6779_s5  }
  0xc4   : > { %p4996_p13 = scmp.ne.s32.totalorder %s5435_s25, %s4995_s27  ;;  %s5000_s1 = scalar_lea.hbm %s6714_s2, 2048 }
  0xc5   : > { %p5001_p9 = scmp.lt.u32.totalorder %s5435_s25, %s6714_s2  ;;  %p5002_p0 = scmp.lt.u32.totalorder %s5000_s1, %s4995_s27 }
  0xc6   : > { %p4998_p12 = pnand %p4996_p13, %p6784_p8  ;;  %p5004_p10 = scmp.lt.u32.totalorder %s4995_s27, %s5435_s25 }
  0xc7   : > { %p5003_p2 = por %p5002_p0, %p5001_p9 }
  0xc8   : > { %p4999_p3 = pneg %p4998_p12 }
  0xc9   : > { %p5005_p5 = por %p5004_p10, %p5003_p2 }
  0xcb   : > { %p5006_p7 = pnand %p5005_p5, %p4999_p3 }
  0xcd   : > { %5009 = shalt.err (!%p5006_p7)
}
  0xce   : > { %s5010_s20 = scalar_lea.vmem %s5467_s21, 1024  ;;  %s5129_s30 = smov [#allocation11]  }
  0xcf   : > { %p5011_p6 = scmp.ne.s32.totalorder %s5467_s21, %s5010_s20  ;;  %s5015_s10 = sshll.u32 %s5129_s30, 4  ;;  %s5016_s10 = int_to_ptr.vmem [resolvable:$false] %s5015_s10 }
  0xd0   : > { %s5017_s17 = scalar_lea.vmem %s5016_s10, 2048  ;;  %p5018_p13 = scmp.lt.s32.totalorder %s5467_s21, %s5016_s10 }
  0xd1   : > { %p5013_p4 = pnand %p5011_p6, %p6784_p8  ;;  %p5019_p12 = scmp.lt.s32.totalorder %s5017_s17, %s5010_s20 }
  0xd3   : > { %p5014_p1 = pneg %p5013_p4  ;;  %p5020_p9 = por %p5019_p12, %p5018_p13 }
  0xd5   : > { %p5021_p0 = pnand %p5020_p9, %p5014_p1 }
  0xd7   : > { %5024 = shalt.err (!%p5021_p0)
}
  0xd8   : > { %4437 = dma.hbm_to_vmem [thread:$0]  (!%p6785_p11), %s5435_s25, 1024, %s5467_s21, %s5347_s3, %s6780_s14, %s6780_s14, %s6779_s5  }
  0xd9   : > { %p6786_p8 = scmp.ne.s32.totalorder %s6766_s15, 0 }
  0xdb   : > { %394 = sbr.rel (%p6786_p8) target bundleno = 2968 (0xb98), region = 52 }
  0xe2   : > { %s5497_s23 = sand.u32 1, %s5103_s28   ;;  %p6787_p3 = scmp.ne.s32.totalorder %s6763_s13, 0 }
  0xe3   : > { %s3677_s16 = sshll.u32 %s5497_s23, 6  ;;  %s397_s7 = scalar_lea.sflag [#allocation7], %s5497_s23 }
  0xe4   : > { %s5501_s18 = scalar_lea.vmem [#allocation6], %s3677_s16 }
  0xe5   : > { %5078 = dma.done.wait (%p6787_p3), %s397_s7, 1024  }
  0xe6   : > { %5080 = vsyncadd (%p6787_p3), %s397_s7, 4294966272  ;;  %s405_s3 = sand.u32 1, %s5212_s11   ;;  %s5508_s19 = scalar_lea.vmem [#allocation9], %s3677_s16 }
  0xe7   : > { %s406_s15 = scalar_lea.sflag [#allocation10], %s405_s3 }
  0xe8   : > { %5082 = dma.done.wait (%p6787_p3), %s406_s15, 2048  }
  0xe9   : > { %5084 = vsyncadd (%p6787_p3), %s406_s15, 4294965248  ;;  %s5514_s5 = scalar_lea.vmem [#allocation11], %s3677_s16  ;;  %p6788_p11 = scmp.eq.s32.totalorder %s5212_s11, 0 }
  0xeb   : > { %5086 = dma.done.wait (%p6788_p11), [#allocation13], 2048   ;;  %p6789_p2 = pmov %p6788_p11 }
  0xed   : > { %5088 = vsyncadd (%p6789_p2), [#allocation13], 4294965248  ;;  %p6790_p10 = pmov %p6789_p2 }
  0xee   : > { %p6791_p5 = pmov %p6789_p2 }
  0xef   : > { %5090 = dma.done.wait (%p6790_p10), [#allocation16], 2048  }
  0xf0   : > { %5092 = vsyncadd (%p6791_p5), [#allocation16], 4294965248  ;;  %v4511_v0 = vld [vmem:[#allocation14] sm:$0xff]   ;;  %v4512_v1 = vld [vmem:[#allocation14 + $0x8] sm:$0xff]   ;;  %vm1231_vm0 = vcmask 261120   ;;  %s5130_s11 = smov 96  }
  0xf1   : > { %3975 = vmatprep.subr.bf16.mxu0 %v4511_v0  ;;  %v4513_v2 = vld [vmem:[#allocation14 + $0x10] sm:$0xff]   ;;  %v4514_v3 = vld [vmem:[#allocation14 + $0x18] sm:$0xff]   ;;  %v4519_v4 = vld [vmem:[%s5508_s19] sm:$0xff]   ;;  %s5131_s13 = smov 64   ;;  %s5132_s14 = smov 32   ;;  %vm2180_vm1 = vcmask 523520  }
  0xf2   : > { %3976 = vmatpush3.bf16.msra.mxu0 %v4511_v0  ;;  %3991 = vmatprep.mubr.bf16.mxu0 %v4519_v4  ;;  %v4515_v5 = vld [vmem:[#allocation14 + $0x20] sm:$0xff]   ;;  %v4516_v6 = vld [vmem:[#allocation14 + $0x28] sm:$0xff]   ;;  %v4517_v7 = vld [vmem:[#allocation14 + $0x30] sm:$0xff]   ;;  %vm2727_vm2 = vcmask 785920   ;;  %vm3274_vm3 = vcmask 1048320   ;;  %s3684_s25 = sshll.u32 %s5497_s23, 7 }
  0xf3   : > { %3977 = vmatprep.subr.bf16.mxu0 %v4512_v1  ;;  %v4534_v8 = vld [vmem:[#allocation15] sm:$0xff]   ;;  %v4518_v9 = vld [vmem:[#allocation14 + $0x38] sm:$0xff]   ;;  %v4536_v10 = vld [vmem:[#allocation15 + $0x8] sm:$0xff]   ;;  %s6892_s21 = sld [smem:[#allocation85_spill]]  ;;  %s6638_s27 = scalar_lea.vmem [#allocation18], %s3684_s25 }
  0xf4   : > { %4007 = vmatprep.subr.bf16.mxu1 %v4534_v8  ;;  %v4524_v11 = vld [vmem:[#allocation12] sm:$0xff]   ;;  %v4539_v12 = vld [vmem:[#allocation15 + $0x10] sm:$0xff]   ;;  %v4520_v13 = vld [vmem:[%s5508_s19 + $0x8] sm:$0xff]   ;;  %s6893_s8 = sld [smem:[#allocation25_spill]]  ;;  %s3491_s1 = sshll.u32 %s6638_s27, 4  ;;  %s6660_s1 = int_to_ptr.vmem [resolvable:$true] %s3491_s1 }
  0xf5   : > { %4008 = vmatpush3.bf16.msra.mxu1 %v4534_v8  ;;  %v4521_v14 = vld [vmem:[%s5508_s19 + $0x10] sm:$0xff]   ;;  %v4526_v15 = vld [vmem:[#allocation12 + $0x8] sm:$0xff]   ;;  %v4540_v16 = vld [vmem:[#allocation15 + $0x18] sm:$0xff]   ;;  %s6894_s22 = sld [smem:[#allocation30_spill]]  ;;  %s3476_s16 = scalar_lea.sflag [#allocation8], %s5497_s23 }
  0xf6   : > { %3978 = vmatpush3.bf16.msra.mxu0 %v4512_v1  ;;  %4009 = vmatprep.subr.bf16.mxu1 %v4536_v10  ;;  %v4545_v17 = vld [vmem:[%s5514_s5] sm:$0xff]   ;;  %v4527_v19 = vld [vmem:[#allocation12 + $0x10] sm:$0xff]   ;;  %v4522_v20 = vld [vmem:[%s5508_s19 + $0x18] sm:$0xff]   ;;  %s6895_s30 = sld [smem:[#allocation86_spill]]  ;;  %s5025_s7 = scalar_lea.vmem %s6660_s1, 2048 }
  0xf7   : > { %3979 = vmatprep.subr.bf16.mxu0 %v4513_v2  ;;  %v4541_v18 = vld [vmem:[#allocation15 + $0x20] sm:$0xff]   ;;  %4023 = vmatprep.mubr.bf16.mxu1 %v4545_v17  ;;  %v4528_v22 = vld [vmem:[#allocation12 + $0x18] sm:$0xff]   ;;  %v4542_v23 = vld [vmem:[#allocation15 + $0x28] sm:$0xff]   ;;  %p5026_p7 = scmp.ne.s32.totalorder %s6660_s1, %s5025_s7 }
  0xf8   : > { %v4523_v21 = vld [vmem:[%s5508_s19 + $0x20] sm:$0xff]   ;;  %v4543_v24 = vld [vmem:[#allocation15 + $0x30] sm:$0xff]   ;;  %v4525_v25 = vld [vmem:[%s5508_s19 + $0x28] sm:$0xff]  }
  0xf9   : > { %4010 = vmatpush3.bf16.msra.mxu1 %v4536_v10  ;;  %v4530_v26 = vld [vmem:[#allocation12 + $0x20] sm:$0xff]   ;;  %v4529_v27 = vld [vmem:[%s5508_s19 + $0x30] sm:$0xff]   ;;  %v4532_v28 = vld [vmem:[#allocation12 + $0x28] sm:$0xff]  }
  0xfa   : > { %3980 = vmatpush3.bf16.msra.mxu0 %v4513_v2  ;;  %4011 = vmatprep.subr.bf16.mxu1 %v4539_v12  ;;  %v4544_v29 = vld [vmem:[#allocation15 + $0x38] sm:$0xff]   ;;  %v4533_v30 = vld [vmem:[#allocation12 + $0x30] sm:$0xff]   ;;  %v4546_v31 = vld [vmem:[%s5514_s5 + $0x8] sm:$0xff]   ;;  %s3782_s9 = sshll.u32 %s6893_s8, 11 }
  0xfb   : > { %3981 = vmatprep.subr.bf16.mxu0 %v4514_v3  ;;  %v4531_v32 = vld [vmem:[%s5508_s19 + $0x38] sm:$0xff]   ;;  %v4547_v33 = vld [vmem:[%s5514_s5 + $0x10] sm:$0xff]   ;;  %v4537_v34 = vld [vmem:[%s5501_s18] sm:$0xff]   ;;  %p6897_p6 = scmp.ne.s32.totalorder %s6894_s22, 0 }
  0xfc   : > { %v4535_v35 = vld [vmem:[#allocation12 + $0x38] sm:$0xff]   ;;  %v4538_v37 = vld [vmem:[%s5501_s18 + $0x8] sm:$0xff]   ;;  %v4549_v38 = vld [vmem:[%s5514_s5 + $0x20] sm:$0xff]   ;;  %s6896_s17 = smov %s6895_s30  ;;  %s6658_s10 = scalar_lea.hbm %s6895_s30, %s3782_s9 }
  0xfd   : > { %4012 = vmatpush3.bf16.msra.mxu1 %v4539_v12  ;;  %v4548_v36 = vld [vmem:[%s5514_s5 + $0x18] sm:$0xff]   ;;  %v4553_v39 = vld [vmem:[%s5501_s18 + $0x10] sm:$0xff]   ;;  %v4550_v40 = vld [vmem:[%s5514_s5 + $0x28] sm:$0xff]   ;;  %p5027_p4 = pnand %p5026_p7, %p6897_p6 }
  0xfe   : > { %3982 = vmatpush3.bf16.msra.mxu0 %v4514_v3  ;;  %4013 = vmatprep.subr.bf16.mxu1 %v4540_v16  ;;  %v4551_v41 = vld [vmem:[%s5514_s5 + $0x30] sm:$0xff]   ;;  %v4554_v42 = vld [vmem:[%s5501_s18 + $0x18] sm:$0xff]   ;;  %v4555_v43 = vld [vmem:[%s5501_s18 + $0x20] sm:$0xff]  }
  0xff   : > { %3983 = vmatprep.subr.bf16.mxu0 %v4515_v5  ;;  %v4552_v44 = vld [vmem:[%s5514_s5 + $0x38] sm:$0xff]   ;;  %v4556_v45 = vld [vmem:[%s5501_s18 + $0x28] sm:$0xff]   ;;  %v4557_v46 = vld [vmem:[%s5501_s18 + $0x30] sm:$0xff]   ;;  %p5028_p1 = pneg %p5027_p4 }
 0x100   : > { %v4558_v47 = vld [vmem:[%s5501_s18 + $0x38] sm:$0xff]   ;;  %s5133_s18 = smov [#allocation18]  }
 0x101   : > { %4014 = vmatpush3.bf16.msra.mxu1 %v4540_v16  ;;  %s5029_s3 = sshll.u32 %s5133_s18, 4  ;;  %s5030_s3 = int_to_ptr.vmem [resolvable:$false] %s5029_s3 }
 0x102   : > { %3984 = vmatpush3.bf16.msra.mxu0 %v4515_v5  ;;  %4015 = vmatprep.subr.bf16.mxu1 %v4541_v18  ;;  %s5031_s15 = scalar_lea.vmem %s5030_s3, 4096  ;;  %p5032_p13 = scmp.lt.s32.totalorder %s6660_s1, %s5030_s3 }
 0x103   : > { %3985 = vmatprep.subr.bf16.mxu0 %v4516_v6  ;;  %p5033_p12 = scmp.lt.s32.totalorder %s5031_s15, %s5025_s7 }
 0x105   : > { %4016 = vmatpush3.bf16.msra.mxu1 %v4541_v18  ;;  %p5034_p9 = por %p5033_p12, %p5032_p13 }
 0x106   : > { %3986 = vmatpush3.bf16.msra.mxu0 %v4516_v6  ;;  %4017 = vmatprep.subr.bf16.mxu1 %v4542_v23 }
 0x107   : > { %3987 = vmatprep.subr.bf16.mxu0 %v4517_v7  ;;  %p5035_p0 = pnand %p5034_p9, %p5028_p1 }
 0x109   : > { %4018 = vmatpush3.bf16.msra.mxu1 %v4542_v23 }
 0x10a   : > { %3988 = vmatpush3.bf16.msra.mxu0 %v4517_v7  ;;  %4019 = vmatprep.subr.bf16.mxu1 %v4543_v24 }
 0x10b   : > { %3989 = vmatprep.subr.bf16.mxu0 %v4518_v9 }
 0x10d   : > { %4020 = vmatpush3.bf16.msra.mxu1 %v4543_v24 }
 0x10e   : > { %3990 = vmatpush3.bf16.msra.mxu0 %v4518_v9  ;;  %4021 = vmatprep.subr.bf16.mxu1 %v4544_v29 }
 0x10f   : > { %4039 = vmatprep.subr.bf16.mxu0 %v4524_v11 }
 0x111   : > { %3992 = vmatmul.mubr.bf16.vlgmr.msra.gmra.mrb[0].mxu0 %v4520_v13  ;;  %4022 = vmatpush3.bf16.msra.mxu1 %v4544_v29 }
 0x112   : > { %3995 = vmatprep.mubr.bf16.mxu0 %v4521_v14  ;;  %4040 = vmatpush3.bf16.msra.mxu0 %v4524_v11 }
 0x113   : > { %4041 = vmatprep.subr.bf16.mxu0 %v4526_v15 }
 0x114   : > { %4024 = vmatmul.mubr.bf16.vlgmr.msra.gmra.mrb[0].mxu1 %v4546_v31 }
 0x115   : > { %4027 = vmatprep.mubr.bf16.mxu1 %v4547_v33 }
 0x116   : > { %4042 = vmatpush3.bf16.msra.mxu0 %v4526_v15 }
 0x117   : > { %4043 = vmatprep.subr.bf16.mxu0 %v4527_v19 }
 0x119   : > { %3996 = vmatmul.mubr.bf16.gmra.mrb[4].mxu0 %v4522_v20 }
 0x11a   : > { %3999 = vmatprep.mubr.bf16.mxu0 %v4523_v21  ;;  %4044 = vmatpush3.bf16.msra.mxu0 %v4527_v19 }
 0x11b   : > { %4045 = vmatprep.subr.bf16.mxu0 %v4528_v22 }
 0x11c   : > { %4028 = vmatmul.mubr.bf16.gmra.mrb[4].mxu1 %v4548_v36 }
 0x11d   : > { %4031 = vmatprep.mubr.bf16.mxu1 %v4549_v38 }
 0x11e   : > { %4046 = vmatpush3.bf16.msra.mxu0 %v4528_v22 }
 0x11f   : > { %4047 = vmatprep.subr.bf16.mxu0 %v4530_v26 }
 0x121   : > { %4000 = vmatmul.mubr.bf16.gmra.mrb[8].mxu0 %v4525_v25 }
 0x122   : > { %4003 = vmatprep.mubr.bf16.mxu0 %v4529_v27  ;;  %4048 = vmatpush3.bf16.msra.mxu0 %v4530_v26 }
 0x123   : > { %4049 = vmatprep.subr.bf16.mxu0 %v4532_v28 }
 0x124   : > { %4032 = vmatmul.mubr.bf16.gmra.mrb[8].mxu1 %v4550_v40 }
 0x125   : > { %4035 = vmatprep.mubr.bf16.mxu1 %v4551_v41 }
 0x126   : > { %4050 = vmatpush3.bf16.msra.mxu0 %v4532_v28 }
 0x127   : > { %4051 = vmatprep.subr.bf16.mxu0 %v4533_v30 }
 0x129   : > { %4004 = vmatmul.mubr.bf16.gmra.mrb[12].mxu0 %v4531_v32 }
 0x12a   : > { %4052 = vmatpush3.bf16.msra.mxu0 %v4533_v30  ;;  %4055 = vmatprep.mubr.bf16.mxu0 %v4537_v34 }
 0x12b   : > { %4053 = vmatprep.subr.bf16.mxu0 %v4535_v35 }
 0x12c   : > { %4036 = vmatmul.mubr.bf16.gmra.mrb[12].mxu1 %v4552_v44 }
 0x12e   : > { %4054 = vmatpush3.bf16.msra.mxu0 %v4535_v35 }
 0x131   : > { %4056 = vmatmul.mubr.bf16.vlgmr.msra.gmra.mrb[16].mxu0 %v4538_v37 }
 0x132   : > { %4059 = vmatprep.mubr.bf16.mxu0 %v4553_v39 }
 0x139   : > { %4060 = vmatmul.mubr.bf16.gmra.mrb[20].mxu0 %v4554_v42 }
 0x13a   : > { %4063 = vmatprep.mubr.bf16.mxu0 %v4555_v43 }
 0x141   : > { %4064 = vmatmul.mubr.bf16.gmra.mrb[24].mxu0 %v4556_v45 }
 0x142   : > { %4067 = vmatprep.mubr.bf16.mxu0 %v4557_v46 }
 0x149   : > { %4068 = vmatmul.mubr.bf16.gmra.mrb[28].mxu0 %v4558_v47 }
 0x1e4   : > { %v3993_v48 = vpop.f32.mrb[0].mxu0 }
 0x1e5   : > { %v646_v49 = vpop.f32.mrb[1].mxu0 }
 0x1e6   : > { %v3994_v50 = vpop.f32.mrb[2].mxu0 }
 0x1e7   : > { %v5548_v51 = vpack.c.bf16 %v3994_v50, %v3993_v48  ;;  %v649_v52 = vpop.f32.mrb[3].mxu0  ;;  %v4025_v5 = vpop.f32.mrb[0].mxu1 }
 0x1e8   : > { %v5550_v53 = vpack.c.bf16 %v649_v52, %v646_v49  ;;  %v887_v7 = vpop.f32.mrb[1].mxu1 }
 0x1e9   : > { %1700 = vrot.lane.b32.xlu1 %v5548_v51, %s5130_s11  ;;  %v1260_v61 = vsel %vm1231_vm0, %v5548_v51, 0  ;;  %v4026_v9 = vpop.f32.mrb[2].mxu1 }
 0x1ea   : > { %1698 = vrot.lane.b32.xlu0 %v5550_v53, %s5130_s11  ;;  %4359 = vmatprep.subr.msk.bf16.mxu1 %vm1231_vm0, %v5550_v53  ;;  %v1257_v54 = vsel %vm1231_vm0, %v5550_v53, 0  ;;  %v5580_v11 = vpack.c.bf16 %v4026_v9, %v4025_v5  ;;  %v890_v12 = vpop.f32.mrb[3].mxu1 }
 0x1eb   : > { %4072 = vmatpush3.bf16.xpose.msra.mxu1 %v1257_v54  ;;  %v5584_v15 = vpack.c.bf16 %v890_v12, %v887_v7 }
 0x1ec   : > { %4360 = vmatprep.subr.msk.bf16.mxu1 %vm1231_vm0, %v5548_v51  ;;  %v3997_v55 = vpop.f32.mrb[4].mxu0 }
 0x1ed   : > { %v662_v56 = vpop.f32.mrb[5].mxu0  ;;  %4103 = vmatprep.subr.bf16.mxu0 %v5584_v15 }
 0x1ee   : > { %v3998_v57 = vpop.f32.mrb[6].mxu0  ;;  %4104 = vmatpush3.bf16.msra.mxu0 %v5584_v15 }
 0x1ef   : > { %v5562_v58 = vpack.c.bf16 %v3998_v57, %v3997_v55  ;;  %v665_v59 = vpop.f32.mrb[7].mxu0  ;;  %v4029_v18 = vpop.f32.mrb[4].mxu1  ;;  %4105 = vmatprep.subr.bf16.mxu0 %v5580_v11 }
 0x1f0   : > { %v5564_v60 = vpack.c.bf16 %v665_v59, %v662_v56  ;;  %v903_v20 = vpop.f32.mrb[5].mxu1 }
 0x1f1   : > { %v1266_v17 = vsel %vm1231_vm0, %v5562_v58, 0  ;;  %v4030_v22 = vpop.f32.mrb[6].mxu1 }
 0x1f2   : > { %1702 = vrot.lane.b32.xlu0 %v5564_v60, %s5130_s11  ;;  %v1263_v4 = vsel %vm1231_vm0, %v5564_v60, 0  ;;  %v5595_v24 = vpack.c.bf16 %v4030_v22, %v4029_v18  ;;  %v906_v25 = vpop.f32.mrb[7].mxu1  ;;  %4106 = vmatpush3.bf16.msra.mxu0 %v5580_v11 }
 0x1f3   : > { %4074 = vmatpush3.bf16.xpose.msra.mxu1 %v1260_v61  ;;  %v5600_v28 = vpack.c.bf16 %v906_v25, %v903_v20 }
 0x1f4   : > { %4361 = vmatprep.subr.msk.bf16.mxu1 %vm1231_vm0, %v5564_v60  ;;  %v4001_v62 = vpop.f32.mrb[8].mxu0 }
 0x1f5   : > { %v678_v63 = vpop.f32.mrb[9].mxu0  ;;  %4107 = vmatprep.subr.bf16.mxu0 %v5600_v28 }
 0x1f6   : > { %v4002_v0 = vpop.f32.mrb[10].mxu0  ;;  %4108 = vmatpush3.bf16.msra.mxu0 %v5600_v28 }
 0x1f7   : > { %v5572_v1 = vpack.c.bf16 %v4002_v0, %v4001_v62  ;;  %v681_v2 = vpop.f32.mrb[11].mxu0  ;;  %v4033_v31 = vpop.f32.mrb[8].mxu1  ;;  %4109 = vmatprep.subr.bf16.mxu0 %v5595_v24 }
 0x1f8   : > { %v5574_v3 = vpack.c.bf16 %v681_v2, %v678_v63  ;;  %v919_v32 = vpop.f32.mrb[9].mxu1 }
 0x1f9   : > { %v4034_v34 = vpop.f32.mrb[10].mxu1  ;;  %v1272_v43 = vsel %vm1231_vm0, %v5572_v1, 0 }
 0x1fa   : > { %v1269_v30 = vsel %vm1231_vm0, %v5574_v3, 0  ;;  %v5613_v36 = vpack.c.bf16 %v4034_v34, %v4033_v31  ;;  %v922_v37 = vpop.f32.mrb[11].mxu1  ;;  %4110 = vmatpush3.bf16.msra.mxu0 %v5595_v24 }
 0x1fb   : > { %4076 = vmatpush3.bf16.xpose.msra.mxu1 %v1263_v4  ;;  %v5616_v39 = vpack.c.bf16 %v922_v37, %v919_v32 }
 0x1fc   : > { %4362 = vmatprep.subr.msk.bf16.mxu1 %vm1231_vm0, %v5562_v58  ;;  %v4005_v6 = vpop.f32.mrb[12].mxu0 }
 0x1fd   : > { %v694_v8 = vpop.f32.mrb[13].mxu0  ;;  %4111 = vmatprep.subr.bf16.mxu0 %v5616_v39 }
 0x1fe   : > { %v4006_v10 = vpop.f32.mrb[14].mxu0  ;;  %4112 = vmatpush3.bf16.msra.mxu0 %v5616_v39 }
 0x1ff   : > { %v5582_v13 = vpack.c.bf16 %v4006_v10, %v4005_v6  ;;  %v697_v14 = vpop.f32.mrb[15].mxu0  ;;  %v4037_v44 = vpop.f32.mrb[12].mxu1  ;;  %4113 = vmatprep.subr.bf16.mxu0 %v5613_v36 }
 0x200   : > { %v5586_v16 = vpack.c.bf16 %v697_v14, %v694_v8  ;;  %v935_v45 = vpop.f32.mrb[13].mxu1 }
 0x201   : > { %v4038_v47 = vpop.f32.mrb[14].mxu1  ;;  %v1278_v5 = vsel %vm1231_vm0, %v5582_v13, 0 }
 0x202   : > { %v5629_v49 = vpack.c.bf16 %v4038_v47, %v4037_v44  ;;  %v938_v50 = vpop.f32.mrb[15].mxu1  ;;  %4114 = vmatpush3.bf16.msra.mxu0 %v5613_v36  ;;  %v1275_v59 = vsel %vm1231_vm0, %v5586_v16, 0 }
 0x203   : > { %4078 = vmatpush3.bf16.xpose.msra.mxu1 %v1266_v17  ;;  %v5632_v54 = vpack.c.bf16 %v938_v50, %v935_v45 }
 0x204   : > { %4363 = vmatprep.subr.msk.bf16.mxu1 %vm1231_vm0, %v5574_v3  ;;  %v4057_v19 = vpop.f32.mrb[16].mxu0 }
 0x205   : > { %v1128_v21 = vpop.f32.mrb[17].mxu0  ;;  %4115 = vmatprep.subr.bf16.mxu0 %v5632_v54 }
 0x206   : > { %v4058_v23 = vpop.f32.mrb[18].mxu0  ;;  %4116 = vmatpush3.bf16.msra.mxu0 %v5632_v54 }
 0x207   : > { %v5598_v26 = vpack.c.bf16 %v4058_v23, %v4057_v19  ;;  %v1131_v27 = vpop.f32.mrb[19].mxu0  ;;  %4117 = vmatprep.subr.bf16.mxu0 %v5629_v49 }
 0x208   : > { %v5602_v29 = vpack.c.bf16 %v1131_v27, %v1128_v21 }
 0x20a   : > { %4087 = vmatprep.mubr.msk.bf16.mxu1 %vm1231_vm0, %v5602_v29  ;;  %4118 = vmatpush3.bf16.msra.mxu0 %v5629_v49 }
 0x20b   : > { %4080 = vmatpush3.bf16.xpose.msra.mxu1 %v1269_v30 }
 0x20c   : > { %4364 = vmatprep.subr.msk.bf16.mxu1 %vm1231_vm0, %v5572_v1  ;;  %v4061_v33 = vpop.f32.mrb[20].mxu0 }
 0x20d   : > { %v1144_v35 = vpop.f32.mrb[21].mxu0 }
 0x20e   : > { %v4062_v38 = vpop.f32.mrb[22].mxu0 }
 0x20f   : > { %v5618_v40 = vpack.c.bf16 %v4062_v38, %v4061_v33  ;;  %v1147_v41 = vpop.f32.mrb[23].mxu0 }
 0x210   : > { %v5620_v42 = vpack.c.bf16 %v1147_v41, %v1144_v35 }
 0x213   : > { %4082 = vmatpush3.bf16.xpose.msra.mxu1 %v1272_v43 }
 0x214   : > { %4365 = vmatprep.subr.msk.bf16.mxu1 %vm1231_vm0, %v5586_v16  ;;  %v4065_v46 = vpop.f32.mrb[24].mxu0 }
 0x215   : > { %v1160_v48 = vpop.f32.mrb[25].mxu0 }
 0x216   : > { %v4066_v52 = vpop.f32.mrb[26].mxu0 }
 0x217   : > { %v5634_v55 = vpack.c.bf16 %v4066_v52, %v4065_v46  ;;  %v1163_v56 = vpop.f32.mrb[27].mxu0 }
 0x218   : > { %v5636_v57 = vpack.c.bf16 %v1163_v56, %v1160_v48 }
 0x21b   : > { %4084 = vmatpush3.bf16.xpose.msra.mxu1 %v1275_v59 }
 0x21c   : > { %4366 = vmatprep.subr.msk.bf16.mxu1 %vm1231_vm0, %v5582_v13  ;;  %v4069_v61 = vpop.f32.mrb[28].mxu0 }
 0x21d   : > { %v1176_v62 = vpop.f32.mrb[29].mxu0 }
 0x21e   : > { %v4070_v63 = vpop.f32.mrb[30].mxu0 }
 0x21f   : > { %v5646_v0 = vpack.c.bf16 %v4070_v63, %v4069_v61  ;;  %v1179_v2 = vpop.f32.mrb[31].mxu0 }
 0x220   : > { %v5648_v4 = vpack.c.bf16 %v1179_v2, %v1176_v62 }
 0x223   : > { %4086 = vmatpush3.bf16.xpose.msra.mxu1 %v1278_v5 }
 0x22a   : > { %4088 = vmatmul.mubr.msk.bf16.vlgmr.msra.gmra.mrb[16].mxu1 %vm1231_vm0, %v5598_v26 }
 0x22b   : > { %4091 = vmatprep.mubr.msk.bf16.mxu1 %vm1231_vm0, %v5620_v42 }
 0x232   : > { %4092 = vmatmul.mubr.msk.bf16.gmra.mrb[20].mxu1 %vm1231_vm0, %v5618_v40 }
 0x233   : > { %4095 = vmatprep.mubr.msk.bf16.mxu1 %vm1231_vm0, %v5636_v57 }
 0x23a   : > { %4096 = vmatmul.mubr.msk.bf16.gmra.mrb[24].mxu1 %vm1231_vm0, %v5634_v55 }
 0x23b   : > { %4099 = vmatprep.mubr.msk.bf16.mxu1 %vm1231_vm0, %v5648_v4 }
 0x242   : > { %4100 = vmatmul.mubr.msk.bf16.gmra.mrb[28].mxu1 %vm1231_vm0, %v5646_v0 }
 0x25b   : > { %v1701_v31 = vpop.permute.xlu1 %1700 }
 0x25c   : > { %v5666_v6 = vpop.permute.xlu0 %1698  ;;  %v1742_v2 = vsel %vm1231_vm0, %v1701_v31, 0 }
 0x25d   : > { %4367 = vmatprep.subr.msk.bf16.mxu0 %vm1231_vm0, %v5666_v6  ;;  %v1739_v63 = vsel %vm1231_vm0, %v5666_v6, 0 }
 0x264   : > { %v1703_v32 = vpop.permute.xlu0 %1702 }
 0x265   : > { %v1745_v5 = vsel %vm1231_vm0, %v1703_v32, 0 }
 0x2fd   : > { %v5670_v7 = vpop.f32.mrb[16].mxu1 }
 0x2fe   : > { %1381 = vmax.xlane.f32.xlu1 %v5670_v7  ;;  %v1314_v8 = vpop.f32.mrb[17].mxu1 }
 0x2ff   : > { %1377 = vmax.xlane.f32.xlu0 %v1314_v8  ;;  %v5673_v9 = vpop.f32.mrb[18].mxu1 }
 0x300   : > { %v5675_v10 = vpop.f32.mrb[19].mxu1 }
 0x302   : > { %1383 = vmax.xlane.f32.xlu1 %v5673_v9 }
 0x303   : > { %1379 = vmax.xlane.f32.xlu0 %v5675_v10 }
 0x305   : > { %v5679_v12 = vpop.f32.mrb[20].mxu1 }
 0x306   : > { %v5681_v14 = vpop.f32.mrb[21].mxu1 }
 0x307   : > { %v5683_v17 = vpop.f32.mrb[22].mxu1 }
 0x308   : > { %v5685_v18 = vpop.f32.mrb[23].mxu1 }
 0x30d   : > { %v5687_v19 = vpop.f32.mrb[24].mxu1 }
 0x30e   : > { %v5689_v20 = vpop.f32.mrb[25].mxu1 }
 0x30f   : > { %v5691_v21 = vpop.f32.mrb[26].mxu1 }
 0x310   : > { %v5693_v22 = vpop.f32.mrb[27].mxu1 }
 0x313   : > { %1704 = vrot.lane.b32.xlu1 %v5562_v58, %s5130_s11 }
 0x315   : > { %v5697_v23 = vpop.f32.mrb[28].mxu1 }
 0x316   : > { %v5699_v25 = vpop.f32.mrb[29].mxu1 }
 0x317   : > { %v5701_v27 = vpop.f32.mrb[30].mxu1 }
 0x318   : > { %v5703_v30 = vpop.f32.mrb[31].mxu1 }
 0x319   : > { %1706 = vrot.lane.b32.xlu0 %v5574_v3, %s5130_s11 }
 0x337   : > { %1385 = vmax.xlane.f32.xlu1 %v5681_v14 }
 0x338   : > { %1389 = vmax.xlane.f32.xlu0 %v5679_v12 }
 0x33b   : > { %1391 = vmax.xlane.f32.xlu1 %v5683_v17 }
 0x33c   : > { %1393 = vmax.xlane.f32.xlu0 %v5689_v20 }
 0x33f   : > { %1387 = vmax.xlane.f32.xlu1 %v5685_v18 }
 0x340   : > { %1395 = vmax.xlane.f32.xlu0 %v5693_v22 }
 0x343   : > { %1397 = vmax.xlane.f32.xlu1 %v5687_v19 }
 0x344   : > { %1405 = vmax.xlane.f32.xlu0 %v5697_v23 }
 0x347   : > { %1399 = vmax.xlane.f32.xlu1 %v5691_v21 }
 0x34b   : > { %1401 = vmax.xlane.f32.xlu1 %v5699_v25 }
 0x34f   : > { %1407 = vmax.xlane.f32.xlu1 %v5701_v27 }
 0x353   : > { %1403 = vmax.xlane.f32.xlu1 %v5703_v30 }
 0x35a   : > { %1710 = vrot.lane.b32.xlu0 %v5586_v16, %s5130_s11 }
 0x35e   : > { %1712 = vrot.lane.b32.xlu0 %v5582_v13, %s5130_s11 }
 0x362   : > { %1674 = vrot.lane.b32.xlu0 %v5602_v29, %s5130_s11 }
 0x364   : > { %1708 = vrot.lane.b32.xlu1 %v5572_v1, %s5130_s11 }
 0x366   : > { %1678 = vrot.lane.b32.xlu0 %v5620_v42, %s5130_s11 }
 0x368   : > { %1676 = vrot.lane.b32.xlu1 %v5598_v26, %s5130_s11 }
 0x36a   : > { %1682 = vrot.lane.b32.xlu0 %v5636_v57, %s5130_s11 }
 0x36c   : > { %1680 = vrot.lane.b32.xlu1 %v5618_v40, %s5130_s11 }
 0x36e   : > { %1686 = vrot.lane.b32.xlu0 %v5648_v4, %s5130_s11 }
 0x370   : > { %1684 = vrot.lane.b32.xlu1 %v5634_v55, %s5130_s11 }
 0x372   : > { %1987 = vrot.lane.b32.xlu0 %v5584_v15, %s5130_s11 }
 0x374   : > { %1688 = vrot.lane.b32.xlu1 %v5646_v0, %s5130_s11 }
 0x376   : > { %1991 = vrot.lane.b32.xlu0 %v5600_v28, %s5130_s11 }
 0x378   : > { %1989 = vrot.lane.b32.xlu1 %v5580_v11, %s5130_s11 }
 0x37a   : > { %1999 = vrot.lane.b32.xlu0 %v5632_v54, %s5130_s11 }
 0x37c   : > { %1993 = vrot.lane.b32.xlu1 %v5595_v24, %s5130_s11 }
 0x37e   : > { %2245 = vrot.lane.b32.xlu0 %v5550_v53, %s5131_s13 }
 0x380   : > { %1995 = vrot.lane.b32.xlu1 %v5616_v39, %s5130_s11 }
 0x382   : > { %2247 = vrot.lane.b32.xlu0 %v5548_v51, %s5131_s13 }
 0x384   : > { %1997 = vrot.lane.b32.xlu1 %v5613_v36, %s5130_s11 }
 0x386   : > { %2251 = vrot.lane.b32.xlu0 %v5562_v58, %s5131_s13 }
 0x388   : > { %2001 = vrot.lane.b32.xlu1 %v5629_v49, %s5130_s11 }
 0x38b   : > { %v1382_v33 = vpop.xlane.xlu1 %1381 }
 0x38c   : > { %v1378_v34 = vpop.xlane.xlu0 %1377  ;;  %2249 = vrot.lane.b32.xlu1 %v5564_v60, %s5131_s13  ;;  %v1411_v37 = vsub.f32 %v5670_v7, %v1382_v33 }
 0x38d   : > { %v1409_v35 = vsub.f32 %v1314_v8, %v1378_v34 }
 0x38e   : > { %v1429_v46 = vmul.f32 1.442695, %v1411_v37 }
 0x38f   : > { %v1425_v38 = vmul.f32 1.442695, %v1409_v35  ;;  %v1384_v41 = vpop.xlane.xlu1 %1383 }
 0x390   : > { %v1412_v43 = vsub.f32 %v5673_v9, %v1384_v41  ;;  %v1380_v44 = vpop.xlane.xlu0 %1379 }
 0x391   : > { %v1410_v45 = vsub.f32 %v5675_v10, %v1380_v44  ;;  %4567 = vpow2.f32 %v1425_v38 }
 0x392   : > { %v1431_v47 = vmul.f32 1.442695, %v1412_v43 }
 0x393   : > { %v1427_v48 = vmul.f32 1.442695, %v1410_v45  ;;  %v1705_v7 = vpop.permute.xlu1 %1704 }
 0x394   : > { %4569 = vpow2.f32 %v1431_v47  ;;  %v1748_v8 = vsel %vm1231_vm0, %v1705_v7, 0  ;;  %v1707_v9 = vpop.permute.xlu0 %1706 }
 0x395   : > { %4571 = vpow2.f32 %v1427_v48  ;;  %v1751_v6 = vsel %vm1231_vm0, %v1707_v9, 0 }
 0x396   : > { %4573 = vpow2.f32 %v1429_v46 }
 0x39b   : > { %v5768_v50 = vpop.eup %4567 }
 0x39e   : > { %v5770_v52 = vpop.eup %4569 }
 0x39f   : > { %v5772_v56 = vpop.eup %4571 }
 0x3a0   : > { %v5774_v59 = vpop.eup %4573  ;;  %v1489_v61 = vpack.c.bf16 %v5772_v56, %v5768_v50 }
 0x3a1   : > { %v1490_v62 = vpack.c.bf16 %v5770_v52, %v5774_v59 }
 0x3a2   : > { %4119 = vmatprep.mubr.bf16.mxu0 %v1489_v61 }
 0x3a3   : > { %4120 = vmatmul.mubr.bf16.vlgmr.msra.gmra.mrb[32].mxu0 %v1490_v62 }
 0x3a4   : > { %4136 = vmatpush3.bf16.xpose.msra.mxu0 %v1739_v63 }
 0x3a5   : > { %4368 = vmatprep.subr.msk.bf16.mxu0 %vm1231_vm0, %v1701_v31 }
 0x3ac   : > { %4138 = vmatpush3.bf16.xpose.msra.mxu0 %v1742_v2 }
 0x3ad   : > { %4369 = vmatprep.subr.msk.bf16.mxu0 %vm1231_vm0, %v1703_v32 }
 0x3b4   : > { %4140 = vmatpush3.bf16.xpose.msra.mxu0 %v1745_v5 }
 0x3b5   : > { %4370 = vmatprep.subr.msk.bf16.mxu0 %vm1231_vm0, %v1705_v7 }
 0x3bc   : > { %4142 = vmatpush3.bf16.xpose.msra.mxu0 %v1748_v8 }
 0x3bd   : > { %4371 = vmatprep.subr.msk.bf16.mxu0 %vm1231_vm0, %v1707_v9 }
 0x3c4   : > { %4144 = vmatpush3.bf16.xpose.msra.mxu0 %v1751_v6  ;;  %v1386_v10 = vpop.xlane.xlu1 %1385 }
 0x3c5   : > { %v1413_v31 = vsub.f32 %v5681_v14, %v1386_v10  ;;  %v1390_v33 = vpop.xlane.xlu0 %1389 }
 0x3c6   : > { %v1415_v34 = vsub.f32 %v5679_v12, %v1390_v33 }
 0x3c7   : > { %v1433_v35 = vmul.f32 1.442695, %v1413_v31 }
 0x3c8   : > { %v1392_v32 = vpop.xlane.xlu1 %1391  ;;  %v1437_v41 = vmul.f32 1.442695, %v1415_v34 }
 0x3c9   : > { %v1416_v37 = vsub.f32 %v5683_v17, %v1392_v32  ;;  %v1394_v38 = vpop.xlane.xlu0 %1393  ;;  %4575 = vpow2.f32 %v1433_v35 }
 0x3ca   : > { %v1417_v43 = vsub.f32 %v5689_v20, %v1394_v38  ;;  %4577 = vpow2.f32 %v1437_v41 }
 0x3cb   : > { %v1439_v44 = vmul.f32 1.442695, %v1416_v37 }
 0x3cc   : > { %v1441_v45 = vmul.f32 1.442695, %v1417_v43  ;;  %v1388_v46 = vpop.xlane.xlu1 %1387 }
 0x3cd   : > { %v1414_v47 = vsub.f32 %v5685_v18, %v1388_v46  ;;  %v1396_v48 = vpop.xlane.xlu0 %1395  ;;  %4579 = vpow2.f32 %v1439_v44 }
 0x3ce   : > { %v1418_v14 = vsub.f32 %v5693_v22, %v1396_v48  ;;  %4581 = vpow2.f32 %v1441_v45 }
 0x3cf   : > { %v1435_v12 = vmul.f32 1.442695, %v1414_v47 }
 0x3d0   : > { %v1443_v61 = vmul.f32 1.442695, %v1418_v14  ;;  %v1398_v62 = vpop.xlane.xlu1 %1397 }
 0x3d1   : > { %4583 = vpow2.f32 %v1435_v12  ;;  %v1419_v17 = vsub.f32 %v5687_v19, %v1398_v62  ;;  %v1406_v63 = vpop.xlane.xlu0 %1405 }
 0x3d2   : > { %4585 = vpow2.f32 %v1443_v61  ;;  %v1423_v43 = vsub.f32 %v5697_v23, %v1406_v63 }
 0x3d3   : > { %v1445_v20 = vmul.f32 1.442695, %v1419_v17  ;;  %v5798_v18 = vpop.eup %4575 }
 0x3d4   : > { %v1400_v2 = vpop.xlane.xlu1 %1399  ;;  %v5800_v9 = vpop.eup %4577 }
 0x3d5   : > { %v1420_v5 = vsub.f32 %v5691_v21, %v1400_v2  ;;  %v1711_v7 = vpop.permute.xlu0 %1710  ;;  %4587 = vpow2.f32 %v1445_v20 }
 0x3d7   : > { %v1447_v8 = vmul.f32 1.442695, %v1420_v5  ;;  %v5802_v6 = vpop.eup %4579 }
 0x3d8   : > { %v1402_v22 = vpop.xlane.xlu1 %1401  ;;  %v5804_v31 = vpop.eup %4581  ;;  %v1492_v38 = vpack.c.bf16 %v5802_v6, %v5800_v9 }
 0x3d9   : > { %4589 = vpow2.f32 %v1447_v8  ;;  %v1713_v10 = vpop.permute.xlu0 %1712  ;;  %6792 = vst [vmem:[#allocation32_spill] sm:$0xff] %v5804_v31  ;;  %v1421_v33 = vsub.f32 %v5699_v25, %v1402_v22  ;;  %v1757_v8 = vsel %vm1231_vm0, %v1711_v7, 0 }
 0x3db   : > { %v5806_v19 = vpop.eup %4583  ;;  %v1449_v44 = vmul.f32 1.442695, %v1421_v33 }
 0x3dc   : > { %v5809_v34 = vpop.eup %4585  ;;  %v1408_v21 = vpop.xlane.xlu1 %1407  ;;  %v1491_v32 = vpack.c.bf16 %v5806_v19, %v5798_v18 }
 0x3dd   : > { %v1424_v35 = vsub.f32 %v5701_v27, %v1408_v21  ;;  %v1675_v37 = vpop.permute.xlu0 %1674  ;;  %v1493_v41 = vpack.c.bf16 %v5809_v34, %v5804_v31  ;;  %v1453_v27 = vmul.f32 1.442695, %v1423_v43  ;;  %4591 = vpow2.f32 %v1449_v44 }
 0x3de   : > { %4123 = vmatprep.mubr.bf16.mxu0 %v1491_v32 }
 0x3df   : > { %4124 = vmatmul.mubr.bf16.gmra.mrb[36].mxu0 %v1492_v38  ;;  %v1455_v25 = vmul.f32 1.442695, %v1424_v35  ;;  %v5820_v48 = vpop.eup %4587 }
 0x3e0   : > { %4127 = vmatprep.mubr.bf16.mxu0 %v1493_v41  ;;  %v1404_v45 = vpop.xlane.xlu1 %1403  ;;  %6793 = vst [vmem:[#allocation33_spill] sm:$0xff] %v5820_v48  ;;  %v1760_v41 = vsel %vm1231_vm0, %v1713_v10, 0 }
 0x3e1   : > { %v1422_v46 = vsub.f32 %v5703_v30, %v1404_v45  ;;  %v1679_v47 = vpop.permute.xlu0 %1678  ;;  %4593 = vpow2.f32 %v1455_v25 }
 0x3e3   : > { %v5822_v14 = vpop.eup %4589  ;;  %v1451_v12 = vmul.f32 1.442695, %v1422_v46 }
 0x3e4   : > { %6794 = vst [vmem:[#allocation34_spill] sm:$0xff] %v5822_v14  ;;  %v1709_v61 = vpop.permute.xlu1 %1708  ;;  %v1494_v23 = vpack.c.bf16 %v5822_v14, %v5820_v48 }
 0x3e5   : > { %4595 = vpow2.f32 %v1451_v12  ;;  %v1683_v62 = vpop.permute.xlu0 %1682  ;;  %4372 = vmatprep.subr.msk.bf16.mxu0 %vm1231_vm0, %v1709_v61  ;;  %v1754_v17 = vsel %vm1231_vm0, %v1709_v61, 0 }
 0x3e6   : > { %4597 = vpow2.f32 %v1453_v27  ;;  %4146 = vmatpush3.bf16.xpose.msra.mxu0 %v1754_v17 }
 0x3e7   : > { %4128 = vmatmul.mubr.bf16.gmra.mrb[40].mxu0 %v1494_v23  ;;  %4373 = vmatprep.subr.msk.bf16.mxu0 %vm1231_vm0, %v1711_v7  ;;  %v5829_v2 = vpop.eup %4591 }
 0x3e8   : > { %v1677_v30 = vpop.permute.xlu1 %1676  ;;  %6795 = vst [vmem:[#allocation35_spill] sm:$0xff] %v5829_v2 }
 0x3e9   : > { %v1687_v63 = vpop.permute.xlu0 %1686 }
 0x3eb   : > { %v5832_v22 = vpop.eup %4593 }
 0x3ec   : > { %v1681_v20 = vpop.permute.xlu1 %1680  ;;  %6796 = vst [vmem:[#allocation36_spill] sm:$0xff] %v5832_v22 }
 0x3ed   : > { %v1988_v5 = vpop.permute.xlu0 %1987 }
 0x3ee   : > { %4148 = vmatpush3.bf16.xpose.msra.mxu0 %v1757_v8  ;;  %4167 = vmatprep.subr.bf16.mxu1 %v1988_v5 }
 0x3ef   : > { %v5834_v33 = vpop.eup %4595  ;;  %4374 = vmatprep.subr.msk.bf16.mxu0 %vm1231_vm0, %v1713_v10  ;;  %4168 = vmatpush3.bf16.msra.mxu1 %v1988_v5 }
 0x3f0   : > { %6797 = vst [vmem:[#allocation37_spill] sm:$0xff] %v5834_v33  ;;  %v5837_v21 = vpop.eup %4597  ;;  %v1685_v32 = vpop.permute.xlu1 %1684  ;;  %v1495_v35 = vpack.c.bf16 %v5834_v33, %v5829_v2 }
 0x3f1   : > { %6798 = vst [vmem:[#allocation38_spill] sm:$0xff] %v5837_v21  ;;  %v1496_v38 = vpack.c.bf16 %v5832_v22, %v5837_v21  ;;  %v1992_v44 = vpop.permute.xlu0 %1991 }
 0x3f2   : > { %4131 = vmatprep.mubr.bf16.mxu0 %v1495_v35 }
 0x3f3   : > { %4132 = vmatmul.mubr.bf16.gmra.mrb[44].mxu0 %v1496_v38 }
 0x3f4   : > { %4151 = vmatprep.mubr.msk.bf16.mxu0 %vm1231_vm0, %v1675_v37  ;;  %v1689_v7 = vpop.permute.xlu1 %1688 }
 0x3f5   : > { %v2000_v10 = vpop.permute.xlu0 %1999 }
 0x3f6   : > { %4150 = vmatpush3.bf16.xpose.msra.mxu0 %v1760_v41 }
 0x3f8   : > { %v1990_v43 = vpop.permute.xlu1 %1989 }
 0x3f9   : > { %4169 = vmatprep.subr.bf16.mxu1 %v1990_v43 }
 0x3fa   : > { %4170 = vmatpush3.bf16.msra.mxu1 %v1990_v43 }
 0x3fb   : > { %4171 = vmatprep.subr.bf16.mxu1 %v1992_v44 }
 0x3fc   : > { %v1994_v25 = vpop.permute.xlu1 %1993 }
 0x3fd   : > { %4152 = vmatmul.mubr.msk.bf16.vlgmr.msra.gmra.mrb[48].mxu0 %vm1231_vm0, %v1677_v30 }
 0x3fe   : > { %4155 = vmatprep.mubr.msk.bf16.mxu0 %vm1231_vm0, %v1679_v47  ;;  %4172 = vmatpush3.bf16.msra.mxu1 %v1992_v44  ;;  %v5851_v47 = vpop.permute.xlu0 %2245 }
 0x3ff   : > { %4173 = vmatprep.subr.bf16.mxu1 %v1994_v25 }
 0x400   : > { %v1996_v45 = vpop.permute.xlu1 %1995 }
 0x402   : > { %4174 = vmatpush3.bf16.msra.mxu1 %v1994_v25 }
 0x403   : > { %4175 = vmatprep.subr.bf16.mxu1 %v1996_v45 }
 0x404   : > { %v1998_v37 = vpop.permute.xlu1 %1997 }
 0x405   : > { %4156 = vmatmul.mubr.msk.bf16.gmra.mrb[52].mxu0 %vm1231_vm0, %v1681_v20 }
 0x406   : > { %4159 = vmatprep.mubr.msk.bf16.mxu0 %vm1231_vm0, %v1683_v62  ;;  %4176 = vmatpush3.bf16.msra.mxu1 %v1996_v45 }
 0x407   : > { %4177 = vmatprep.subr.bf16.mxu1 %v1998_v37 }
 0x408   : > { %v2002_v46 = vpop.permute.xlu1 %2001 }
 0x40a   : > { %4178 = vmatpush3.bf16.msra.mxu1 %v1998_v37 }
 0x40b   : > { %4179 = vmatprep.subr.bf16.mxu1 %v2000_v10 }
 0x40d   : > { %4160 = vmatmul.mubr.msk.bf16.gmra.mrb[56].mxu0 %vm1231_vm0, %v1685_v32 }
 0x40e   : > { %4163 = vmatprep.mubr.msk.bf16.mxu0 %vm1231_vm0, %v1687_v63  ;;  %4180 = vmatpush3.bf16.msra.mxu1 %v2000_v10 }
 0x40f   : > { %4181 = vmatprep.subr.bf16.mxu1 %v2002_v46 }
 0x412   : > { %4182 = vmatpush3.bf16.msra.mxu1 %v2002_v46 }
 0x413   : > { %4375 = vmatprep.subr.msk.bf16.mxu1 %vm1231_vm0, %v5851_v47 }
 0x415   : > { %4164 = vmatmul.mubr.msk.bf16.gmra.mrb[60].mxu0 %vm1231_vm0, %v1689_v7 }
 0x476   : > { %v5856_v27 = vpop.f32.mrb[32].mxu0 }
 0x477   : > { %6799 = vst [vmem:[#allocation39_spill] sm:$0xff] %v5856_v27  ;;  %v5858_v12 = vpop.f32.mrb[33].mxu0 }
 0x478   : > { %6800 = vst [vmem:[#allocation40_spill] sm:$0xff] %v5858_v12  ;;  %v5860_v61 = vpop.f32.mrb[34].mxu0 }
 0x479   : > { %6801 = vst [vmem:[#allocation41_spill] sm:$0xff] %v5860_v61  ;;  %v5862_v23 = vpop.f32.mrb[35].mxu0 }
 0x47a   : > { %6802 = vst [vmem:[#allocation42_spill] sm:$0xff] %v5862_v23 }
 0x4b2   : > { %v5864_v62 = vpop.f32.mrb[36].mxu0 }
 0x4b3   : > { %6803 = vst [vmem:[#allocation43_spill] sm:$0xff] %v5864_v62  ;;  %v5866_v17 = vpop.f32.mrb[37].mxu0 }
 0x4b4   : > { %6804 = vst [vmem:[#allocation44_spill] sm:$0xff] %v5866_v17  ;;  %v5868_v30 = vpop.f32.mrb[38].mxu0 }
 0x4b5   : > { %6805 = vst [vmem:[#allocation45_spill] sm:$0xff] %v5868_v30  ;;  %v5870_v63 = vpop.f32.mrb[39].mxu0 }
 0x4b6   : > { %6806 = vst [vmem:[#allocation46_spill] sm:$0xff] %v5870_v63  ;;  %v5981_v63 = vpop.permute.xlu1 %2249 }
 0x4ba   : > { %v5872_v20 = vpop.f32.mrb[40].mxu0 }
 0x4bb   : > { %6807 = vst [vmem:[#allocation47_spill] sm:$0xff] %v5872_v20  ;;  %v5874_v5 = vpop.f32.mrb[41].mxu0 }
 0x4bc   : > { %6808 = vst [vmem:[#allocation48_spill] sm:$0xff] %v5874_v5  ;;  %v5876_v8 = vpop.f32.mrb[42].mxu0 }
 0x4bd   : > { %6809 = vst [vmem:[#allocation49_spill] sm:$0xff] %v5876_v8  ;;  %v5878_v32 = vpop.f32.mrb[43].mxu0 }
 0x4be   : > { %6810 = vst [vmem:[#allocation50_spill] sm:$0xff] %v5878_v32 }
 0x4c6   : > { %v5880_v35 = vpop.f32.mrb[44].mxu0 }
 0x4c7   : > { %6811 = vst [vmem:[#allocation51_spill] sm:$0xff] %v5880_v35  ;;  %v5882_v38 = vpop.f32.mrb[45].mxu0 }
 0x4c8   : > { %6812 = vst [vmem:[#allocation52_spill] sm:$0xff] %v5882_v38  ;;  %v5884_v7 = vpop.f32.mrb[46].mxu0 }
 0x4c9   : > { %6813 = vst [vmem:[#allocation53_spill] sm:$0xff] %v5884_v7  ;;  %v5886_v41 = vpop.f32.mrb[47].mxu0 }
 0x4ca   : > { %6814 = vst [vmem:[#allocation54_spill] sm:$0xff] %v5886_v41 }
 0x4d0   : > { %v5888_v43 = vpop.f32.mrb[48].mxu0 }
 0x4d1   : > { %1863 = vmax.xlane.f32.xlu0 %v5888_v43  ;;  %v5891_v44 = vpop.f32.mrb[49].mxu0 }
 0x4d2   : > { %v5893_v25 = vpop.f32.mrb[50].mxu0 }
 0x4d3   : > { %v1799_v45 = vpop.f32.mrb[51].mxu0 }
 0x4d4   : > { %1861 = vmax.xlane.f32.xlu1 %v1799_v45 }
 0x4d5   : > { %1859 = vmax.xlane.f32.xlu0 %v5891_v44 }
 0x4d8   : > { %v5896_v37 = vpop.f32.mrb[52].mxu0 }
 0x4d9   : > { %1865 = vmax.xlane.f32.xlu0 %v5893_v25  ;;  %1871 = vmax.xlane.f32.xlu1 %v5896_v37  ;;  %v5900_v10 = vpop.f32.mrb[53].mxu0 }
 0x4da   : > { %v5902_v46 = vpop.f32.mrb[54].mxu0 }
 0x4db   : > { %v5904_v35 = vpop.f32.mrb[55].mxu0 }
 0x4dd   : > { %1867 = vmax.xlane.f32.xlu1 %v5900_v10  ;;  %1869 = vmax.xlane.f32.xlu0 %v5904_v35 }
 0x4e0   : > { %v5908_v7 = vpop.f32.mrb[56].mxu0 }
 0x4e1   : > { %1873 = vmax.xlane.f32.xlu1 %v5902_v46  ;;  %1879 = vmax.xlane.f32.xlu0 %v5908_v7  ;;  %v5912_v38 = vpop.f32.mrb[57].mxu0 }
 0x4e2   : > { %v5914_v41 = vpop.f32.mrb[58].mxu0 }
 0x4e3   : > { %v5916_v20 = vpop.f32.mrb[59].mxu0 }
 0x4e5   : > { %1875 = vmax.xlane.f32.xlu1 %v5912_v38 }
 0x4e8   : > { %v5919_v8 = vpop.f32.mrb[60].mxu0 }
 0x4e9   : > { %1881 = vmax.xlane.f32.xlu1 %v5914_v41  ;;  %v5922_v5 = vpop.f32.mrb[61].mxu0 }
 0x4ea   : > { %1883 = vmax.xlane.f32.xlu0 %v5922_v5  ;;  %v5925_v32 = vpop.f32.mrb[62].mxu0 }
 0x4eb   : > { %v5927_v30 = vpop.f32.mrb[63].mxu0 }
 0x4ed   : > { %1877 = vmax.xlane.f32.xlu1 %v5916_v20 }
 0x4f1   : > { %1887 = vmax.xlane.f32.xlu1 %v5919_v8 }
 0x4f5   : > { %1889 = vmax.xlane.f32.xlu1 %v5925_v32 }
 0x500   : > { %2255 = vrot.lane.b32.xlu0 %v5572_v1, %s5131_s13 }
 0x506   : > { %2253 = vrot.lane.b32.xlu1 %v5574_v3, %s5131_s13 }
 0x50a   : > { %2223 = vrot.lane.b32.xlu1 %v5598_v26, %s5131_s13 }
 0x50e   : > { %2227 = vrot.lane.b32.xlu1 %v5618_v40, %s5131_s13 }
 0x512   : > { %2231 = vrot.lane.b32.xlu1 %v5634_v55, %s5131_s13 }
 0x516   : > { %2235 = vrot.lane.b32.xlu1 %v5646_v0, %s5131_s13 }
 0x51a   : > { %2536 = vrot.lane.b32.xlu1 %v5580_v11, %s5131_s13 }
 0x51e   : > { %2540 = vrot.lane.b32.xlu1 %v5595_v24, %s5131_s13 }
 0x51f   : > { %1885 = vmax.xlane.f32.xlu0 %v5927_v30 }
 0x522   : > { %2542 = vrot.lane.b32.xlu1 %v5616_v39, %s5131_s13 }
 0x526   : > { %2544 = vrot.lane.b32.xlu1 %v5613_v36, %s5131_s13 }
 0x52a   : > { %2548 = vrot.lane.b32.xlu1 %v5629_v49, %s5131_s13 }
 0x52e   : > { %2796 = vrot.lane.b32.xlu1 %v5564_v60, %s5132_s14  ;;  %v5973_v60 = vpop.permute.xlu0 %2247 }
 0x532   : > { %v5979_v62 = vpop.permute.xlu0 %2251 }
 0x535   : > { %2257 = vrot.lane.b32.xlu0 %v5586_v16, %s5131_s13 }
 0x539   : > { %2259 = vrot.lane.b32.xlu0 %v5582_v13, %s5131_s13 }
 0x53d   : > { %2221 = vrot.lane.b32.xlu0 %v5602_v29, %s5131_s13 }
 0x541   : > { %2225 = vrot.lane.b32.xlu0 %v5620_v42, %s5131_s13 }
 0x545   : > { %2229 = vrot.lane.b32.xlu0 %v5636_v57, %s5131_s13 }
 0x549   : > { %2233 = vrot.lane.b32.xlu0 %v5648_v4, %s5131_s13 }
 0x54d   : > { %2534 = vrot.lane.b32.xlu0 %v5584_v15, %s5131_s13 }
 0x551   : > { %2538 = vrot.lane.b32.xlu0 %v5600_v28, %s5131_s13 }
 0x555   : > { %2546 = vrot.lane.b32.xlu0 %v5632_v54, %s5131_s13 }
 0x559   : > { %2792 = vrot.lane.b32.xlu0 %v5550_v53, %s5132_s14 }
 0x55d   : > { %2794 = vrot.lane.b32.xlu0 %v5548_v51, %s5132_s14 }
 0x55e   : > { %v1864_v17 = vpop.xlane.xlu0 %1863 }
 0x55f   : > { %v1893_v27 = vsub.f32 %v5888_v43, %v1864_v17 }
 0x561   : > { %2798 = vrot.lane.b32.xlu0 %v5562_v58, %s5132_s14  ;;  %v1862_v61 = vpop.xlane.xlu1 %1861  ;;  %v1911_v48 = vmul.f32 1.442695, %v1893_v27 }
 0x562   : > { %v1892_v23 = vsub.f32 %v1799_v45, %v1862_v61  ;;  %v1860_v12 = vpop.xlane.xlu0 %1859 }
 0x563   : > { %v1891_v21 = vsub.f32 %v5891_v44, %v1860_v12 }
 0x564   : > { %v1909_v2 = vmul.f32 1.442695, %v1892_v23 }
 0x565   : > { %v1907_v53 = vmul.f32 1.442695, %v1891_v21 }
 0x566   : > { %4599 = vpow2.f32 %v1909_v2  ;;  %v1866_v31 = vpop.xlane.xlu0 %1865  ;;  %v1872_v22 = vpop.xlane.xlu1 %1871 }
 0x567   : > { %4601 = vpow2.f32 %v1907_v53  ;;  %v1894_v51 = vsub.f32 %v5893_v25, %v1866_v31  ;;  %v1897_v17 = vsub.f32 %v5896_v37, %v1872_v22 }
 0x568   : > { %4603 = vpow2.f32 %v1911_v48 }
 0x569   : > { %v1913_v33 = vmul.f32 1.442695, %v1894_v51  ;;  %v1919_v2 = vmul.f32 1.442695, %v1897_v17  ;;  %v2286_v51 = vsel %vm1231_vm0, %v5851_v47, 0 }
 0x56a   : > { %v1870_v14 = vpop.xlane.xlu0 %1869  ;;  %v1868_v58 = vpop.xlane.xlu1 %1867 }
 0x56b   : > { %4605 = vpow2.f32 %v1913_v33  ;;  %v1896_v61 = vsub.f32 %v5904_v35, %v1870_v14  ;;  %v1895_v12 = vsub.f32 %v5900_v10, %v1868_v58 }
 0x56d   : > { %v1917_v23 = vmul.f32 1.442695, %v1896_v61  ;;  %v1915_v21 = vmul.f32 1.442695, %v1895_v12 }
 0x56e   : > { %v1874_v27 = vpop.xlane.xlu1 %1873  ;;  %v1880_v25 = vpop.xlane.xlu0 %1879 }
 0x56f   : > { %4607 = vpow2.f32 %v1917_v23  ;;  %v1898_v43 = vsub.f32 %v5902_v46, %v1874_v27  ;;  %v1901_v53 = vsub.f32 %v5908_v7, %v1880_v25  ;;  %v2292_v25 = vsel %vm1231_vm0, %v5981_v63, 0 }
 0x570   : > { %v5994_v44 = vpop.eup %4599  ;;  %4609 = vpow2.f32 %v1915_v21 }
 0x571   : > { %v5996_v31 = vpop.eup %4601  ;;  %v1921_v48 = vmul.f32 1.442695, %v1898_v43  ;;  %4611 = vpow2.f32 %v1919_v2 }
 0x572   : > { %v1876_v33 = vpop.xlane.xlu1 %1875  ;;  %v1971_v22 = vpack.c.bf16 %v5994_v44, %v5996_v31  ;;  %v6000_v14 = vpop.eup %4603 }
 0x573   : > { %4613 = vpow2.f32 %v1921_v48  ;;  %v1899_v45 = vsub.f32 %v5912_v38, %v1876_v33 }
 0x574   : > { %4183 = vmatprep.mubr.bf16.mxu1 %v1971_v22 }
 0x575   : > { %v6002_v35 = vpop.eup %4605  ;;  %v1923_v17 = vmul.f32 1.442695, %v1899_v45 }
 0x576   : > { %v1882_v37 = vpop.xlane.xlu1 %1881  ;;  %v1972_v10 = vpack.c.bf16 %v6002_v35, %v6000_v14 }
 0x577   : > { %v1902_v46 = vsub.f32 %v5914_v41, %v1882_v37  ;;  %v1927_v41 = vmul.f32 1.442695, %v1901_v53  ;;  %4615 = vpow2.f32 %v1923_v17 }
 0x578   : > { %4184 = vmatmul.mubr.bf16.vlgmr.msra.gmra.mrb[32].mxu1 %v1972_v10 }
 0x579   : > { %v6011_v58 = vpop.eup %4607  ;;  %4200 = vmatpush3.bf16.xpose.msra.mxu1 %v2286_v51  ;;  %v1929_v12 = vmul.f32 1.442695, %v1902_v46  ;;  %v2295_v46 = vsel %vm1231_vm0, %v5979_v62, 0 }
 0x57a   : > { %v6013_v61 = vpop.eup %4609  ;;  %4376 = vmatprep.subr.msk.bf16.mxu1 %vm1231_vm0, %v5973_v60  ;;  %v1878_v38 = vpop.xlane.xlu1 %1877 }
 0x57b   : > { %v1900_v23 = vsub.f32 %v5916_v20, %v1878_v38  ;;  %v1973_v7 = vpack.c.bf16 %v6011_v58, %v6013_v61  ;;  %v6020_v21 = vpop.eup %4611  ;;  %4617 = vpow2.f32 %v1929_v12  ;;  %v2289_v20 = vsel %vm1231_vm0, %v5973_v60, 0 }
 0x57d   : > { %v1925_v47 = vmul.f32 1.442695, %v1900_v23  ;;  %4187 = vmatprep.mubr.bf16.mxu1 %v1973_v7  ;;  %v6022_v27 = vpop.eup %4613 }
 0x57e   : > { %v1974_v2 = vpack.c.bf16 %v6022_v27, %v6020_v21  ;;  %v1888_v43 = vpop.xlane.xlu1 %1887 }
 0x57f   : > { %4619 = vpow2.f32 %v1925_v47 }
 0x580   : > { %4621 = vpow2.f32 %v1927_v41  ;;  %4188 = vmatmul.mubr.bf16.gmra.mrb[36].mxu1 %v1974_v2 }
 0x581   : > { %4202 = vmatpush3.bf16.xpose.msra.mxu1 %v2289_v20  ;;  %v6030_v48 = vpop.eup %4615 }
 0x582   : > { %4377 = vmatprep.subr.msk.bf16.mxu1 %vm1231_vm0, %v5981_v63  ;;  %v1890_v10 = vpop.xlane.xlu1 %1889  ;;  %v1884_v63 = vpop.xlane.xlu0 %1883 }
 0x583   : > { %v1903_v38 = vsub.f32 %v5922_v5, %v1884_v63  ;;  %v1906_v23 = vsub.f32 %v5925_v32, %v1890_v10 }
 0x585   : > { %v6032_v33 = vpop.eup %4617  ;;  %v1931_v7 = vmul.f32 1.442695, %v1903_v38  ;;  %v1937_v41 = vmul.f32 1.442695, %v1906_v23 }
 0x586   : > { %v2254_v53 = vpop.permute.xlu1 %2253  ;;  %v2256_v17 = vpop.permute.xlu0 %2255 }
 0x587   : > { %v2298_v51 = vsel %vm1231_vm0, %v2254_v53, 0  ;;  %v2301_v12 = vsel %vm1231_vm0, %v2256_v17, 0  ;;  %4623 = vpow2.f32 %v1931_v7 }
 0x588   : > { %4625 = vpow2.f32 %v1937_v41 }
 0x589   : > { %v6034_v22 = vpop.eup %4619  ;;  %4204 = vmatpush3.bf16.xpose.msra.mxu1 %v2292_v25 }
 0x58a   : > { %v6038_v45 = vpop.eup %4621  ;;  %v1975_v60 = vpack.c.bf16 %v6034_v22, %v6030_v48  ;;  %4378 = vmatprep.subr.msk.bf16.mxu1 %vm1231_vm0, %v5979_v62  ;;  %v1905_v62 = vsub.f32 %v5919_v8, %v1888_v43 }
 0x58b   : > { %v1976_v37 = vpack.c.bf16 %v6032_v33, %v6038_v45 }
 0x58c   : > { %4191 = vmatprep.mubr.bf16.mxu1 %v1975_v60  ;;  %v1935_v20 = vmul.f32 1.442695, %v1905_v62  ;;  %v2224_v60 = vpop.permute.xlu1 %2223 }
 0x58d   : > { %4192 = vmatmul.mubr.bf16.gmra.mrb[40].mxu1 %v1976_v37 }
 0x590   : > { %v2228_v8 = vpop.permute.xlu1 %2227 }
 0x591   : > { %4206 = vmatpush3.bf16.xpose.msra.mxu1 %v2295_v46  ;;  %v6059_v10 = vpop.eup %4623 }
 0x592   : > { %4379 = vmatprep.subr.msk.bf16.mxu1 %vm1231_vm0, %v2254_v53  ;;  %v6062_v46 = vpop.eup %4625 }
 0x599   : > { %4208 = vmatpush3.bf16.xpose.msra.mxu1 %v2298_v51  ;;  %v2232_v51 = vpop.permute.xlu1 %2231 }
 0x59a   : > { %4380 = vmatprep.subr.msk.bf16.mxu1 %vm1231_vm0, %v2256_v17 }
 0x59d   : > { %v2236_v62 = vpop.permute.xlu1 %2235 }
 0x5a1   : > { %4210 = vmatpush3.bf16.xpose.msra.mxu1 %v2301_v12  ;;  %v2537_v41 = vpop.permute.xlu1 %2536 }
 0x5ac   : > { %v1886_v47 = vpop.xlane.xlu0 %1885 }
 0x5ad   : > { %v1904_v2 = vsub.f32 %v5927_v30, %v1886_v47 }
 0x5af   : > { %v1933_v25 = vmul.f32 1.442695, %v1904_v2  ;;  %v2541_v2 = vpop.permute.xlu1 %2540 }
 0x5b0   : > { %v2258_v37 = vpop.permute.xlu0 %2257 }
 0x5b1   : > { %4627 = vpow2.f32 %v1933_v25  ;;  %4381 = vmatprep.subr.msk.bf16.mxu1 %vm1231_vm0, %v2258_v37  ;;  %v2304_v5 = vsel %vm1231_vm0, %v2258_v37, 0 }
 0x5b2   : > { %4629 = vpow2.f32 %v1935_v20  ;;  %4212 = vmatpush3.bf16.xpose.msra.mxu1 %v2304_v5 }
 0x5b3   : > { %v2543_v25 = vpop.permute.xlu1 %2542 }
 0x5b4   : > { %v2260_v32 = vpop.permute.xlu0 %2259 }
 0x5b5   : > { %4382 = vmatprep.subr.msk.bf16.mxu1 %vm1231_vm0, %v2260_v32  ;;  %v2307_v30 = vsel %vm1231_vm0, %v2260_v32, 0 }
 0x5b8   : > { %v2222_v43 = vpop.permute.xlu0 %2221 }
 0x5ba   : > { %4214 = vmatpush3.bf16.xpose.msra.mxu1 %v2307_v30 }
 0x5bb   : > { %v6064_v53 = vpop.eup %4627 }
 0x5bc   : > { %v6066_v63 = vpop.eup %4629  ;;  %v2226_v17 = vpop.permute.xlu0 %2225  ;;  %v1977_v12 = vpack.c.bf16 %v6064_v53, %v6059_v10 }
 0x5bd   : > { %v1978_v38 = vpack.c.bf16 %v6062_v46, %v6066_v63 }
 0x5be   : > { %4195 = vmatprep.mubr.bf16.mxu1 %v1977_v12 }
 0x5bf   : > { %4196 = vmatmul.mubr.bf16.gmra.mrb[44].mxu1 %v1978_v38 }
 0x5c0   : > { %v2230_v23 = vpop.permute.xlu0 %2229  ;;  %4215 = vmatprep.mubr.msk.bf16.mxu1 %vm1231_vm0, %v2222_v43 }
 0x5c4   : > { %v2234_v7 = vpop.permute.xlu0 %2233 }
 0x5c7   : > { %4216 = vmatmul.mubr.msk.bf16.vlgmr.msra.gmra.mrb[48].mxu1 %vm1231_vm0, %v2224_v60  ;;  %v2545_v60 = vpop.permute.xlu1 %2544 }
 0x5c8   : > { %v2535_v47 = vpop.permute.xlu0 %2534  ;;  %4219 = vmatprep.mubr.msk.bf16.mxu1 %vm1231_vm0, %v2226_v17 }
 0x5c9   : > { %4231 = vmatprep.subr.bf16.mxu0 %v2535_v47 }
 0x5ca   : > { %4232 = vmatpush3.bf16.msra.mxu0 %v2535_v47 }
 0x5cb   : > { %4233 = vmatprep.subr.bf16.mxu0 %v2537_v41  ;;  %v2549_v5 = vpop.permute.xlu1 %2548 }
 0x5cc   : > { %v2539_v20 = vpop.permute.xlu0 %2538 }
 0x5ce   : > { %4234 = vmatpush3.bf16.msra.mxu0 %v2537_v41 }
 0x5cf   : > { %4220 = vmatmul.mubr.msk.bf16.gmra.mrb[52].mxu1 %vm1231_vm0, %v2228_v8  ;;  %4235 = vmatprep.subr.bf16.mxu0 %v2539_v20 }
 0x5d0   : > { %4223 = vmatprep.mubr.msk.bf16.mxu1 %vm1231_vm0, %v2230_v23  ;;  %v2547_v37 = vpop.permute.xlu0 %2546 }
 0x5d2   : > { %4236 = vmatpush3.bf16.msra.mxu0 %v2539_v20 }
 0x5d3   : > { %4237 = vmatprep.subr.bf16.mxu0 %v2541_v2 }
 0x5d4   : > { %v6080_v32 = vpop.permute.xlu0 %2792 }
 0x5d6   : > { %4238 = vmatpush3.bf16.msra.mxu0 %v2541_v2 }
 0x5d7   : > { %4224 = vmatmul.mubr.msk.bf16.gmra.mrb[56].mxu1 %vm1231_vm0, %v2232_v51  ;;  %4239 = vmatprep.subr.bf16.mxu0 %v2543_v25 }
 0x5d8   : > { %4227 = vmatprep.mubr.msk.bf16.mxu1 %vm1231_vm0, %v2234_v7 }
 0x5da   : > { %4240 = vmatpush3.bf16.msra.mxu0 %v2543_v25 }
 0x5db   : > { %4241 = vmatprep.subr.bf16.mxu0 %v2545_v60 }
 0x5de   : > { %4242 = vmatpush3.bf16.msra.mxu0 %v2545_v60 }
 0x5df   : > { %4228 = vmatmul.mubr.msk.bf16.gmra.mrb[60].mxu1 %vm1231_vm0, %v2236_v62  ;;  %4243 = vmatprep.subr.bf16.mxu0 %v2547_v37 }
 0x5e2   : > { %4244 = vmatpush3.bf16.msra.mxu0 %v2547_v37 }
 0x5e3   : > { %4245 = vmatprep.subr.bf16.mxu0 %v2549_v5 }
 0x5e6   : > { %4246 = vmatpush3.bf16.msra.mxu0 %v2549_v5 }
 0x5e7   : > { %4383 = vmatprep.subr.msk.bf16.mxu0 %vm1231_vm0, %v6080_v32 }
 0x64b   : > { %v6084_v8 = vpop.f32.mrb[32].mxu1 }
 0x64c   : > { %6815 = vst [vmem:[#allocation55_spill] sm:$0xff] %v6084_v8  ;;  %v6086_v43 = vpop.f32.mrb[33].mxu1 }
 0x64d   : > { %v6088_v30 = vpop.f32.mrb[34].mxu1 }
 0x64e   : > { %6816 = vst [vmem:[#allocation56_spill] sm:$0xff] %v6088_v30  ;;  %v6090_v51 = vpop.f32.mrb[35].mxu1 }
 0x64f   : > { %6817 = vst [vmem:[#allocation57_spill] sm:$0xff] %v6090_v51 }
 0x653   : > { %v6092_v17 = vpop.f32.mrb[36].mxu1 }
 0x654   : > { %6818 = vst [vmem:[#allocation58_spill] sm:$0xff] %v6092_v17  ;;  %v6094_v12 = vpop.f32.mrb[37].mxu1 }
 0x655   : > { %6819 = vst [vmem:[#allocation59_spill] sm:$0xff] %v6094_v12  ;;  %v6096_v38 = vpop.f32.mrb[38].mxu1 }
 0x656   : > { %6820 = vst [vmem:[#allocation60_spill] sm:$0xff] %v6096_v38  ;;  %v6098_v23 = vpop.f32.mrb[39].mxu1 }
 0x657   : > { %6821 = vst [vmem:[#allocation61_spill] sm:$0xff] %v6098_v23 }
 0x660   : > { %v6100_v62 = vpop.f32.mrb[40].mxu1 }
 0x661   : > { %6822 = vst [vmem:[#allocation62_spill] sm:$0xff] %v6100_v62  ;;  %v6102_v7 = vpop.f32.mrb[41].mxu1 }
 0x662   : > { %6823 = vst [vmem:[#allocation63_spill] sm:$0xff] %v6102_v7  ;;  %v6104_v41 = vpop.f32.mrb[42].mxu1 }
 0x663   : > { %6824 = vst [vmem:[#allocation64_spill] sm:$0xff] %v6104_v41  ;;  %v6106_v47 = vpop.f32.mrb[43].mxu1 }
 0x664   : > { %6825 = vst [vmem:[#allocation65_spill] sm:$0xff] %v6106_v47 }
 0x692   : > { %v6108_v2 = vpop.f32.mrb[44].mxu1 }
 0x693   : > { %6826 = vst [vmem:[#allocation66_spill] sm:$0xff] %v6108_v2  ;;  %v6110_v20 = vpop.f32.mrb[45].mxu1 }
 0x694   : > { %6827 = vst [vmem:[#allocation67_spill] sm:$0xff] %v6110_v20  ;;  %v6112_v25 = vpop.f32.mrb[46].mxu1 }
 0x695   : > { %6828 = vst [vmem:[#allocation68_spill] sm:$0xff] %v6112_v25  ;;  %v6114_v60 = vpop.f32.mrb[47].mxu1 }
 0x696   : > { %6829 = vst [vmem:[#allocation69_spill] sm:$0xff] %v6114_v60 }
 0x69a   : > { %v4217_v37 = vpop.f32.mrb[48].mxu1 }
 0x69b   : > { %2410 = vmax.xlane.f32.xlu0 %v4217_v37  ;;  %v2343_v5 = vpop.f32.mrb[49].mxu1 }
 0x69c   : > { %v6116_v38 = vpop.f32.mrb[50].mxu1 }
 0x69d   : > { %v2346_v62 = vpop.f32.mrb[51].mxu1 }
 0x69e   : > { %2408 = vmax.xlane.f32.xlu1 %v2346_v62 }
 0x69f   : > { %2406 = vmax.xlane.f32.xlu0 %v2343_v5 }
 0x6a2   : > { %v6118_v7 = vpop.f32.mrb[52].mxu1 }
 0x6a3   : > { %2412 = vmax.xlane.f32.xlu0 %v6116_v38  ;;  %2418 = vmax.xlane.f32.xlu1 %v6118_v7  ;;  %v6122_v41 = vpop.f32.mrb[53].mxu1 }
 0x6a4   : > { %v6124_v47 = vpop.f32.mrb[54].mxu1 }
 0x6a5   : > { %v6126_v25 = vpop.f32.mrb[55].mxu1 }
 0x6a7   : > { %2414 = vmax.xlane.f32.xlu1 %v6122_v41  ;;  %2416 = vmax.xlane.f32.xlu0 %v6126_v25 }
 0x6aa   : > { %v6130_v60 = vpop.f32.mrb[56].mxu1 }
 0x6ab   : > { %2420 = vmax.xlane.f32.xlu1 %v6124_v47  ;;  %2426 = vmax.xlane.f32.xlu0 %v6130_v60  ;;  %v6134_v2 = vpop.f32.mrb[57].mxu1 }
 0x6ac   : > { %v6136_v17 = vpop.f32.mrb[58].mxu1 }
 0x6ad   : > { %v6138_v20 = vpop.f32.mrb[59].mxu1 }
 0x6af   : > { %2422 = vmax.xlane.f32.xlu1 %v6134_v2 }
 0x6b2   : > { %v6141_v23 = vpop.f32.mrb[60].mxu1 }
 0x6b3   : > { %2428 = vmax.xlane.f32.xlu1 %v6136_v17  ;;  %v6144_v12 = vpop.f32.mrb[61].mxu1 }
 0x6b4   : > { %2430 = vmax.xlane.f32.xlu0 %v6144_v12  ;;  %v6147_v30 = vpop.f32.mrb[62].mxu1 }
 0x6b5   : > { %v6149_v8 = vpop.f32.mrb[63].mxu1 }
 0x6b7   : > { %2424 = vmax.xlane.f32.xlu1 %v6138_v20 }
 0x6bb   : > { %2434 = vmax.xlane.f32.xlu1 %v6141_v23 }
 0x6bf   : > { %2436 = vmax.xlane.f32.xlu1 %v6147_v30 }
 0x6ca   : > { %2802 = vrot.lane.b32.xlu0 %v5572_v1, %s5132_s14  ;;  %v6187_v1 = vpop.permute.xlu0 %2794 }
 0x6d0   : > { %2800 = vrot.lane.b32.xlu1 %v5574_v3, %s5132_s14  ;;  %v6193_v3 = vpop.permute.xlu0 %2798 }
 0x6d4   : > { %2770 = vrot.lane.b32.xlu1 %v5598_v26, %s5132_s14 }
 0x6d8   : > { %2774 = vrot.lane.b32.xlu1 %v5618_v40, %s5132_s14 }
 0x6dc   : > { %2778 = vrot.lane.b32.xlu1 %v5634_v55, %s5132_s14 }
 0x6e0   : > { %2782 = vrot.lane.b32.xlu1 %v5646_v0, %s5132_s14 }
 0x6e4   : > { %3083 = vrot.lane.b32.xlu1 %v5580_v11, %s5132_s14  ;;  %v6195_v11 = vpop.permute.xlu1 %2796 }
 0x6e8   : > { %3089 = vrot.lane.b32.xlu1 %v5616_v39, %s5132_s14 }
 0x6e9   : > { %2432 = vmax.xlane.f32.xlu0 %v6149_v8 }
 0x6ff   : > { %2804 = vrot.lane.b32.xlu0 %v5586_v16, %s5132_s14 }
 0x703   : > { %2806 = vrot.lane.b32.xlu0 %v5582_v13, %s5132_s14 }
 0x707   : > { %2768 = vrot.lane.b32.xlu0 %v5602_v29, %s5132_s14 }
 0x70b   : > { %2772 = vrot.lane.b32.xlu0 %v5620_v42, %s5132_s14 }
 0x70f   : > { %2776 = vrot.lane.b32.xlu0 %v5636_v57, %s5132_s14 }
 0x713   : > { %2780 = vrot.lane.b32.xlu0 %v5648_v4, %s5132_s14 }
 0x717   : > { %3081 = vrot.lane.b32.xlu0 %v5584_v15, %s5132_s14 }
 0x71b   : > { %3085 = vrot.lane.b32.xlu0 %v5600_v28, %s5132_s14 }
 0x71f   : > { %3087 = vrot.lane.b32.xlu0 %v5595_v24, %s5132_s14 }
 0x723   : > { %3091 = vrot.lane.b32.xlu0 %v5613_v36, %s5132_s14 }
 0x728   : > { %v2411_v13 = vpop.xlane.xlu0 %2410 }
 0x729   : > { %v2440_v26 = vsub.f32 %v4217_v37, %v2411_v13 }
 0x72b   : > { %v2409_v16 = vpop.xlane.xlu1 %2408  ;;  %v2458_v42 = vmul.f32 1.442695, %v2440_v26 }
 0x72c   : > { %v2439_v29 = vsub.f32 %v2346_v62, %v2409_v16  ;;  %v2407_v15 = vpop.xlane.xlu0 %2406 }
 0x72d   : > { %v2438_v39 = vsub.f32 %v2343_v5, %v2407_v15 }
 0x72e   : > { %v2456_v40 = vmul.f32 1.442695, %v2439_v29 }
 0x72f   : > { %v2454_v28 = vmul.f32 1.442695, %v2438_v39 }
 0x730   : > { %4631 = vpow2.f32 %v2456_v40  ;;  %v2413_v55 = vpop.xlane.xlu0 %2412  ;;  %v2419_v57 = vpop.xlane.xlu1 %2418 }
 0x731   : > { %4633 = vpow2.f32 %v2454_v28  ;;  %v2441_v24 = vsub.f32 %v6116_v38, %v2413_v55  ;;  %v2444_v51 = vsub.f32 %v6118_v7, %v2419_v57 }
 0x732   : > { %4635 = vpow2.f32 %v2458_v42 }
 0x733   : > { %v2460_v36 = vmul.f32 1.442695, %v2441_v24  ;;  %v2466_v26 = vmul.f32 1.442695, %v2444_v51  ;;  %v2833_v24 = vsel %vm1231_vm0, %v6080_v32, 0 }
 0x734   : > { %v2417_v0 = vpop.xlane.xlu0 %2416  ;;  %v2415_v4 = vpop.xlane.xlu1 %2414 }
 0x735   : > { %4637 = vpow2.f32 %v2460_v36  ;;  %v2443_v62 = vsub.f32 %v6126_v25, %v2417_v0  ;;  %v2442_v37 = vsub.f32 %v6122_v41, %v2415_v4 }
 0x737   : > { %v2464_v5 = vmul.f32 1.442695, %v2443_v62  ;;  %v2462_v13 = vmul.f32 1.442695, %v2442_v37 }
 0x738   : > { %v2421_v16 = vpop.xlane.xlu1 %2420  ;;  %v2427_v51 = vpop.xlane.xlu0 %2426 }
 0x739   : > { %4639 = vpow2.f32 %v2464_v5  ;;  %v2445_v29 = vsub.f32 %v6124_v47, %v2421_v16  ;;  %v2448_v57 = vsub.f32 %v6130_v60, %v2427_v51 }
 0x73a   : > { %v6202_v15 = vpop.eup %4631  ;;  %4641 = vpow2.f32 %v2462_v13 }
 0x73b   : > { %v6204_v38 = vpop.eup %4633  ;;  %v2468_v39 = vmul.f32 1.442695, %v2445_v29  ;;  %4643 = vpow2.f32 %v2466_v26  ;;  %v2474_v60 = vmul.f32 1.442695, %v2448_v57 }
 0x73c   : > { %v2423_v40 = vpop.xlane.xlu1 %2422  ;;  %v2518_v7 = vpack.c.bf16 %v6202_v15, %v6204_v38  ;;  %v6208_v25 = vpop.eup %4635 }
 0x73d   : > { %4645 = vpow2.f32 %v2468_v39  ;;  %v2446_v47 = vsub.f32 %v6134_v2, %v2423_v40 }
 0x73e   : > { %4247 = vmatprep.mubr.bf16.mxu0 %v2518_v7  ;;  %v2839_v7 = vsel %vm1231_vm0, %v6195_v11, 0 }
 0x73f   : > { %v6210_v41 = vpop.eup %4637  ;;  %v2470_v0 = vmul.f32 1.442695, %v2446_v47 }
 0x740   : > { %v2429_v28 = vpop.xlane.xlu1 %2428  ;;  %v2519_v42 = vpack.c.bf16 %v6210_v41, %v6208_v25 }
 0x741   : > { %v2449_v55 = vsub.f32 %v6136_v17, %v2429_v28  ;;  %4647 = vpow2.f32 %v2470_v0 }
 0x742   : > { %4248 = vmatmul.mubr.bf16.vlgmr.msra.gmra.mrb[64].mxu0 %v2519_v42  ;;  %v2842_v42 = vsel %vm1231_vm0, %v6193_v3, 0 }
 0x743   : > { %v6219_v36 = vpop.eup %4639  ;;  %4264 = vmatpush3.bf16.xpose.msra.mxu0 %v2833_v24  ;;  %v2476_v62 = vmul.f32 1.442695, %v2449_v55 }
 0x744   : > { %v6221_v4 = vpop.eup %4641  ;;  %4384 = vmatprep.subr.msk.bf16.mxu0 %vm1231_vm0, %v6187_v1  ;;  %v2425_v2 = vpop.xlane.xlu1 %2424 }
 0x745   : > { %v2447_v37 = vsub.f32 %v6138_v20, %v2425_v2  ;;  %v2520_v17 = vpack.c.bf16 %v6219_v36, %v6221_v4  ;;  %v6228_v5 = vpop.eup %4643  ;;  %4649 = vpow2.f32 %v2476_v62  ;;  %v2836_v20 = vsel %vm1231_vm0, %v6187_v1, 0 }
 0x747   : > { %v2472_v32 = vmul.f32 1.442695, %v2447_v37  ;;  %4251 = vmatprep.mubr.bf16.mxu0 %v2520_v17  ;;  %v6230_v13 = vpop.eup %4645 }
 0x748   : > { %v2521_v16 = vpack.c.bf16 %v6230_v13, %v6228_v5  ;;  %v2435_v26 = vpop.xlane.xlu1 %2434 }
 0x749   : > { %4651 = vpow2.f32 %v2472_v32 }
 0x74a   : > { %4653 = vpow2.f32 %v2474_v60  ;;  %4252 = vmatmul.mubr.bf16.gmra.mrb[68].mxu0 %v2521_v16 }
 0x74b   : > { %4266 = vmatpush3.bf16.xpose.msra.mxu0 %v2836_v20  ;;  %v6238_v29 = vpop.eup %4647 }
 0x74c   : > { %4385 = vmatprep.subr.msk.bf16.mxu0 %vm1231_vm0, %v6195_v11  ;;  %v2437_v28 = vpop.xlane.xlu1 %2436  ;;  %v2431_v11 = vpop.xlane.xlu0 %2430 }
 0x74d   : > { %v2450_v62 = vsub.f32 %v6144_v12, %v2431_v11  ;;  %v2453_v2 = vsub.f32 %v6147_v30, %v2437_v28 }
 0x74f   : > { %v6240_v39 = vpop.eup %4649  ;;  %v2478_v37 = vmul.f32 1.442695, %v2450_v62  ;;  %v2484_v17 = vmul.f32 1.442695, %v2453_v2 }
 0x750   : > { %v2801_v55 = vpop.permute.xlu1 %2800  ;;  %v2803_v24 = vpop.permute.xlu0 %2802 }
 0x751   : > { %v2845_v57 = vsel %vm1231_vm0, %v2801_v55, 0  ;;  %v2848_v0 = vsel %vm1231_vm0, %v2803_v24, 0  ;;  %4655 = vpow2.f32 %v2478_v37 }
 0x752   : > { %4657 = vpow2.f32 %v2484_v17 }
 0x753   : > { %v6242_v40 = vpop.eup %4651  ;;  %4268 = vmatpush3.bf16.xpose.msra.mxu0 %v2839_v7 }
 0x754   : > { %v6246_v51 = vpop.eup %4653  ;;  %v2522_v1 = vpack.c.bf16 %v6242_v40, %v6238_v29  ;;  %4386 = vmatprep.subr.msk.bf16.mxu0 %vm1231_vm0, %v6193_v3  ;;  %v2452_v3 = vsub.f32 %v6141_v23, %v2435_v26  ;;  %v2771_v12 = vpop.permute.xlu1 %2770 }
 0x755   : > { %v2523_v47 = vpack.c.bf16 %v6240_v39, %v6246_v51 }
 0x756   : > { %4255 = vmatprep.mubr.bf16.mxu0 %v2522_v1  ;;  %v2482_v16 = vmul.f32 1.442695, %v2452_v3 }
 0x757   : > { %4256 = vmatmul.mubr.bf16.gmra.mrb[72].mxu0 %v2523_v47 }
 0x758   : > { %v2775_v23 = vpop.permute.xlu1 %2774 }
 0x75b   : > { %4270 = vmatpush3.bf16.xpose.msra.mxu0 %v2842_v42  ;;  %v6267_v47 = vpop.eup %4655 }
 0x75c   : > { %4387 = vmatprep.subr.msk.bf16.mxu0 %vm1231_vm0, %v2801_v55  ;;  %v6270_v28 = vpop.eup %4657 }
 0x763   : > { %4272 = vmatpush3.bf16.xpose.msra.mxu0 %v2845_v57 }
 0x764   : > { %4388 = vmatprep.subr.msk.bf16.mxu0 %vm1231_vm0, %v2803_v24 }
 0x76b   : > { %4274 = vmatpush3.bf16.xpose.msra.mxu0 %v2848_v0  ;;  %v2779_v0 = vpop.permute.xlu1 %2778 }
 0x76f   : > { %v2783_v2 = vpop.permute.xlu1 %2782 }
 0x773   : > { %v3084_v17 = vpop.permute.xlu1 %3083 }
 0x776   : > { %v2433_v60 = vpop.xlane.xlu0 %2432 }
 0x777   : > { %v2451_v32 = vsub.f32 %v6149_v8, %v2433_v60 }
 0x779   : > { %v2480_v20 = vmul.f32 1.442695, %v2451_v32 }
 0x77a   : > { %v2805_v7 = vpop.permute.xlu0 %2804 }
 0x77b   : > { %4659 = vpow2.f32 %v2480_v20  ;;  %4389 = vmatprep.subr.msk.bf16.mxu0 %vm1231_vm0, %v2805_v7  ;;  %v2851_v1 = vsel %vm1231_vm0, %v2805_v7, 0 }
 0x77c   : > { %4661 = vpow2.f32 %v2482_v16  ;;  %4276 = vmatpush3.bf16.xpose.msra.mxu0 %v2851_v1  ;;  %v3090_v16 = vpop.permute.xlu1 %3089 }
 0x77e   : > { %v2807_v30 = vpop.permute.xlu0 %2806 }
 0x77f   : > { %4390 = vmatprep.subr.msk.bf16.mxu0 %vm1231_vm0, %v2807_v30  ;;  %v2854_v8 = vsel %vm1231_vm0, %v2807_v30, 0 }
 0x782   : > { %v2769_v26 = vpop.permute.xlu0 %2768 }
 0x784   : > { %4278 = vmatpush3.bf16.xpose.msra.mxu0 %v2854_v8 }
 0x785   : > { %v6272_v42 = vpop.eup %4659 }
 0x786   : > { %v6274_v55 = vpop.eup %4661  ;;  %v2773_v11 = vpop.permute.xlu0 %2772  ;;  %v2524_v57 = vpack.c.bf16 %v6272_v42, %v6267_v47 }
 0x787   : > { %v2525_v24 = vpack.c.bf16 %v6270_v28, %v6274_v55 }
 0x788   : > { %4259 = vmatprep.mubr.bf16.mxu0 %v2524_v57 }
 0x789   : > { %4260 = vmatmul.mubr.bf16.gmra.mrb[76].mxu0 %v2525_v24 }
 0x78a   : > { %v2777_v62 = vpop.permute.xlu0 %2776  ;;  %4279 = vmatprep.mubr.msk.bf16.mxu0 %vm1231_vm0, %v2769_v26 }
 0x78e   : > { %v2781_v3 = vpop.permute.xlu0 %2780 }
 0x791   : > { %4280 = vmatmul.mubr.msk.bf16.vlgmr.msra.gmra.mrb[80].mxu0 %vm1231_vm0, %v2771_v12 }
 0x792   : > { %v3082_v37 = vpop.permute.xlu0 %3081  ;;  %4283 = vmatprep.mubr.msk.bf16.mxu0 %vm1231_vm0, %v2773_v11 }
 0x793   : > { %4295 = vmatprep.subr.bf16.mxu1 %v3082_v37 }
 0x794   : > { %4296 = vmatpush3.bf16.msra.mxu1 %v3082_v37 }
 0x795   : > { %4297 = vmatprep.subr.bf16.mxu1 %v3084_v17 }
 0x796   : > { %v3086_v60 = vpop.permute.xlu0 %3085 }
 0x798   : > { %4298 = vmatpush3.bf16.msra.mxu1 %v3084_v17 }
 0x799   : > { %4284 = vmatmul.mubr.msk.bf16.gmra.mrb[84].mxu0 %vm1231_vm0, %v2775_v23  ;;  %4299 = vmatprep.subr.bf16.mxu1 %v3086_v60 }
 0x79a   : > { %4287 = vmatprep.mubr.msk.bf16.mxu0 %vm1231_vm0, %v2777_v62  ;;  %v3088_v32 = vpop.permute.xlu0 %3087 }
 0x79c   : > { %4300 = vmatpush3.bf16.msra.mxu1 %v3086_v60 }
 0x79d   : > { %4301 = vmatprep.subr.bf16.mxu1 %v3088_v32 }
 0x79e   : > { %v3092_v20 = vpop.permute.xlu0 %3091 }
 0x7a0   : > { %4302 = vmatpush3.bf16.msra.mxu1 %v3088_v32 }
 0x7a1   : > { %4288 = vmatmul.mubr.msk.bf16.gmra.mrb[88].mxu0 %vm1231_vm0, %v2779_v0  ;;  %4303 = vmatprep.subr.bf16.mxu1 %v3090_v16 }
 0x7a2   : > { %4291 = vmatprep.mubr.msk.bf16.mxu0 %vm1231_vm0, %v2781_v3 }
 0x7a4   : > { %4304 = vmatpush3.bf16.msra.mxu1 %v3090_v16 }
 0x7a5   : > { %4305 = vmatprep.subr.bf16.mxu1 %v3092_v20 }
 0x7a8   : > { %4306 = vmatpush3.bf16.msra.mxu1 %v3092_v20 }
 0x7a9   : > { %4292 = vmatmul.mubr.msk.bf16.gmra.mrb[92].mxu0 %vm1231_vm0, %v2783_v2 }
 0x815   : > { %v6288_v7 = vpop.f32.mrb[64].mxu0 }
 0x816   : > { %v6290_v1 = vpop.f32.mrb[65].mxu0 }
 0x817   : > { %v6292_v12 = vpop.f32.mrb[66].mxu0 }
 0x818   : > { %6830 = vst [vmem:[#allocation70_spill] sm:$0xff] %v6292_v12  ;;  %v6294_v30 = vpop.f32.mrb[67].mxu0 }
 0x81d   : > { %v6296_v23 = vpop.f32.mrb[68].mxu0 }
 0x81e   : > { %6831 = vst [vmem:[#allocation71_spill] sm:$0xff] %v6296_v23  ;;  %v6298_v26 = vpop.f32.mrb[69].mxu0 }
 0x81f   : > { %6832 = vst [vmem:[#allocation72_spill] sm:$0xff] %v6298_v26  ;;  %v6300_v8 = vpop.f32.mrb[70].mxu0 }
 0x820   : > { %6833 = vst [vmem:[#allocation73_spill] sm:$0xff] %v6300_v8  ;;  %v6302_v11 = vpop.f32.mrb[71].mxu0 }
 0x821   : > { %6834 = vst [vmem:[#allocation74_spill] sm:$0xff] %v6302_v11 }
 0x82a   : > { %v6304_v57 = vpop.f32.mrb[72].mxu0 }
 0x82b   : > { %6835 = vst [vmem:[#allocation75_spill] sm:$0xff] %v6304_v57  ;;  %v6306_v24 = vpop.f32.mrb[73].mxu0 }
 0x82c   : > { %v6308_v0 = vpop.f32.mrb[74].mxu0 }
 0x82d   : > { %6836 = vst [vmem:[#allocation76_spill] sm:$0xff] %v6308_v0  ;;  %v6310_v62 = vpop.f32.mrb[75].mxu0 }
 0x82e   : > { %6837 = vst [vmem:[#allocation77_spill] sm:$0xff] %v6310_v62 }
 0x85c   : > { %v6312_v2 = vpop.f32.mrb[76].mxu0 }
 0x85d   : > { %6838 = vst [vmem:[#allocation78_spill] sm:$0xff] %v6312_v2  ;;  %v6314_v3 = vpop.f32.mrb[77].mxu0 }
 0x85e   : > { %6839 = vst [vmem:[#allocation79_spill] sm:$0xff] %v6314_v3  ;;  %v6316_v37 = vpop.f32.mrb[78].mxu0 }
 0x85f   : > { %6840 = vst [vmem:[#allocation80_spill] sm:$0xff] %v6316_v37  ;;  %v6318_v17 = vpop.f32.mrb[79].mxu0 }
 0x860   : > { %6841 = vst [vmem:[#allocation81_spill] sm:$0xff] %v6318_v17 }
 0x864   : > { %v6320_v60 = vpop.f32.mrb[80].mxu0 }
 0x865   : > { %2957 = vmax.xlane.f32.xlu1 %v6320_v60  ;;  %v6323_v32 = vpop.f32.mrb[81].mxu0 }
 0x866   : > { %2953 = vmax.xlane.f32.xlu0 %v6323_v32  ;;  %v6326_v16 = vpop.f32.mrb[82].mxu0 }
 0x867   : > { %v6328_v20 = vpop.f32.mrb[83].mxu0 }
 0x869   : > { %2959 = vmax.xlane.f32.xlu1 %v6326_v16 }
 0x86c   : > { %v6331_v0 = vpop.f32.mrb[84].mxu0 }
 0x86d   : > { %2955 = vmax.xlane.f32.xlu1 %v6328_v20  ;;  %v6334_v37 = vpop.f32.mrb[85].mxu0 }
 0x86e   : > { %2961 = vmax.xlane.f32.xlu0 %v6334_v37  ;;  %v6337_v17 = vpop.f32.mrb[86].mxu0 }
 0x86f   : > { %v6339_v62 = vpop.f32.mrb[87].mxu0 }
 0x871   : > { %2965 = vmax.xlane.f32.xlu1 %v6331_v0 }
 0x874   : > { %v6342_v2 = vpop.f32.mrb[88].mxu0 }
 0x875   : > { %2967 = vmax.xlane.f32.xlu1 %v6337_v17  ;;  %v6345_v8 = vpop.f32.mrb[89].mxu0 }
 0x876   : > { %v6347_v23 = vpop.f32.mrb[90].mxu0 }
 0x877   : > { %2975 = vmax.xlane.f32.xlu0 %v6347_v23  ;;  %v6350_v3 = vpop.f32.mrb[91].mxu0 }
 0x879   : > { %2963 = vmax.xlane.f32.xlu1 %v6339_v62 }
 0x87b   : > { %2971 = vmax.xlane.f32.xlu0 %v6350_v3 }
 0x87c   : > { %v6354_v11 = vpop.f32.mrb[92].mxu0 }
 0x87d   : > { %2973 = vmax.xlane.f32.xlu1 %v6342_v2  ;;  %v6357_v26 = vpop.f32.mrb[93].mxu0 }
 0x87e   : > { %v6359_v57 = vpop.f32.mrb[94].mxu0 }
 0x87f   : > { %2983 = vmax.xlane.f32.xlu0 %v6359_v57  ;;  %v6362_v12 = vpop.f32.mrb[95].mxu0 }
 0x881   : > { %2969 = vmax.xlane.f32.xlu1 %v6345_v8 }
 0x883   : > { %2979 = vmax.xlane.f32.xlu0 %v6362_v12 }
 0x892   : > { %3093 = vrot.lane.b32.xlu1 %v5632_v54, %s5132_s14 }
 0x899   : > { %3095 = vrot.lane.b32.xlu0 %v5629_v49, %s5132_s14 }
 0x8b6   : > { %2977 = vmax.xlane.f32.xlu1 %v6357_v26 }
 0x8b8   : > { %1941 = vadd.xlane.f32.xlu0 %v5994_v44 }
 0x8ba   : > { %2981 = vmax.xlane.f32.xlu1 %v6354_v11 }
 0x8bc   : > { %1947 = vadd.xlane.f32.xlu0 %v6013_v61 }
 0x8be   : > { %1939 = vadd.xlane.f32.xlu1 %v5996_v31 }
 0x8c0   : > { %1951 = vadd.xlane.f32.xlu0 %v6020_v21 }
 0x8c2   : > { %1943 = vadd.xlane.f32.xlu1 %v6000_v14 }
 0x8c4   : > { %2494 = vadd.xlane.f32.xlu0 %v6221_v4 }
 0x8c6   : > { %1945 = vadd.xlane.f32.xlu1 %v6002_v35 }
 0x8c8   : > { %2498 = vadd.xlane.f32.xlu0 %v6228_v5 }
 0x8ca   : > { %2486 = vadd.xlane.f32.xlu1 %v6204_v38 }
 0x8cc   : > { %1955 = vadd.xlane.f32.xlu0 %v6030_v48 }
 0x8ce   : > { %2488 = vadd.xlane.f32.xlu1 %v6202_v15 }
 0x8d0   : > { %1959 = vadd.xlane.f32.xlu0 %v6038_v45 }
 0x8d2   : > { %2490 = vadd.xlane.f32.xlu1 %v6208_v25 }
 0x8d4   : > { %2502 = vadd.xlane.f32.xlu0 %v6238_v29 }
 0x8d6   : > { %2492 = vadd.xlane.f32.xlu1 %v6210_v41 }
 0x8d8   : > { %2506 = vadd.xlane.f32.xlu0 %v6246_v51 }
 0x8da   : > { %1949 = vadd.xlane.f32.xlu1 %v6011_v58 }
 0x8dc   : > { %1963 = vadd.xlane.f32.xlu0 %v6059_v10 }
 0x8de   : > { %1953 = vadd.xlane.f32.xlu1 %v6022_v27 }
 0x8e0   : > { %1967 = vadd.xlane.f32.xlu0 %v6066_v63 }
 0x8e2   : > { %2496 = vadd.xlane.f32.xlu1 %v6219_v36 }
 0x8e4   : > { %2510 = vadd.xlane.f32.xlu0 %v6267_v47 }
 0x8e6   : > { %2500 = vadd.xlane.f32.xlu1 %v6230_v13 }
 0x8e8   : > { %2514 = vadd.xlane.f32.xlu0 %v6274_v55 }
 0x8ea   : > { %1957 = vadd.xlane.f32.xlu1 %v6034_v22 }
 0x8ec   : > { %1457 = vadd.xlane.f32.xlu0 %v5768_v50 }
 0x8ee   : > { %1961 = vadd.xlane.f32.xlu1 %v6032_v33 }
 0x8f0   : > { %1461 = vadd.xlane.f32.xlu0 %v5774_v59 }
 0x8f2   : > { %2504 = vadd.xlane.f32.xlu1 %v6242_v40  ;;  %v2958_v49 = vpop.xlane.xlu1 %2957 }
 0x8f3   : > { %v2987_v54 = vsub.f32 %v6320_v60, %v2958_v49  ;;  %v2954_v44 = vpop.xlane.xlu0 %2953 }
 0x8f4   : > { %1465 = vadd.xlane.f32.xlu0 %v5798_v18  ;;  %v2985_v14 = vsub.f32 %v6323_v32, %v2954_v44 }
 0x8f5   : > { %v3005_v31 = vmul.f32 1.442695, %v2987_v54 }
 0x8f6   : > { %2508 = vadd.xlane.f32.xlu1 %v6240_v39  ;;  %v2960_v35 = vpop.xlane.xlu1 %2959  ;;  %v3001_v58 = vmul.f32 1.442695, %v2985_v14 }
 0x8f7   : > { %4663 = vpow2.f32 %v3005_v31  ;;  %v2988_v50 = vsub.f32 %v6326_v16, %v2960_v35 }
 0x8f8   : > { %1469 = vadd.xlane.f32.xlu0 %v5800_v9 }
 0x8f9   : > { %v3007_v59 = vmul.f32 1.442695, %v2988_v50 }
 0x8fa   : > { %1965 = vadd.xlane.f32.xlu1 %v6064_v53  ;;  %v2956_v61 = vpop.xlane.xlu1 %2955 }
 0x8fb   : > { %4665 = vpow2.f32 %v3007_v59  ;;  %v2986_v21 = vsub.f32 %v6328_v20, %v2956_v61  ;;  %v2962_v18 = vpop.xlane.xlu0 %2961 }
 0x8fc   : > { %4667 = vpow2.f32 %v3001_v58  ;;  %v2989_v48 = vsub.f32 %v6334_v37, %v2962_v18  ;;  %v6842_v58 = vld [vmem:[#allocation34_spill] sm:$0xff] }
 0x8fd   : > { %v3003_v27 = vmul.f32 1.442695, %v2986_v21 }
 0x8fe   : > { %1969 = vadd.xlane.f32.xlu1 %v6062_v46  ;;  %v2966_v33 = vpop.xlane.xlu1 %2965  ;;  %v3009_v10 = vmul.f32 1.442695, %v2989_v48 }
 0x8ff   : > { %4669 = vpow2.f32 %v3003_v27  ;;  %v2991_v22 = vsub.f32 %v6331_v0, %v2966_v33  ;;  %v6843_v33 = vld [vmem:[#allocation37_spill] sm:$0xff] }
 0x901   : > { %v6412_v9 = vpop.eup %4663  ;;  %v3013_v45 = vmul.f32 1.442695, %v2991_v22 }
 0x902   : > { %2512 = vadd.xlane.f32.xlu1 %v6272_v42  ;;  %3037 = vadd.xlane.f32.xlu0 %v6412_v9  ;;  %v2968_v53 = vpop.xlane.xlu1 %2967 }
 0x903   : > { %4671 = vpow2.f32 %v3013_v45  ;;  %v2992_v63 = vsub.f32 %v6337_v17, %v2968_v53  ;;  %v6844_v45 = vld [vmem:[#allocation36_spill] sm:$0xff] }
 0x904   : > { %v2976_v15 = vpop.xlane.xlu0 %2975  ;;  %4673 = vpow2.f32 %v3009_v10 }
 0x905   : > { %v4666_v38 = vpop.eup %4665  ;;  %v3015_v25 = vmul.f32 1.442695, %v2992_v63  ;;  %v2996_v46 = vsub.f32 %v6347_v23, %v2976_v15 }
 0x906   : > { %2516 = vadd.xlane.f32.xlu1 %v6270_v28  ;;  %v2964_v41 = vpop.xlane.xlu1 %2963  ;;  %v3066_v36 = vpack.c.bf16 %v4666_v38, %v6412_v9  ;;  %v4668_v5 = vpop.eup %4667 }
 0x907   : > { %4675 = vpow2.f32 %v3015_v25  ;;  %v2990_v4 = vsub.f32 %v6339_v62, %v2964_v41  ;;  %v3023_v40 = vmul.f32 1.442695, %v2996_v46 }
 0x908   : > { %v2972_v13 = vpop.xlane.xlu0 %2971 }
 0x909   : > { %v4670_v29 = vpop.eup %4669  ;;  %v3011_v39 = vmul.f32 1.442695, %v2990_v4  ;;  %v2994_v51 = vsub.f32 %v6350_v3, %v2972_v13 }
 0x90a   : > { %1459 = vadd.xlane.f32.xlu1 %v5772_v56  ;;  %v2974_v47 = vpop.xlane.xlu1 %2973  ;;  %v3065_v42 = vpack.c.bf16 %v4670_v29, %v4668_v5 }
 0x90b   : > { %4677 = vpow2.f32 %v3011_v39  ;;  %v2995_v28 = vsub.f32 %v6342_v2, %v2974_v47  ;;  %v3019_v62 = vmul.f32 1.442695, %v2994_v51 }
 0x90c   : > { %v2984_v55 = vpop.xlane.xlu0 %2983  ;;  %4311 = vmatprep.mubr.bf16.mxu1 %v3065_v42  ;;  %4679 = vpow2.f32 %v3023_v40 }
 0x90d   : > { %v4672_v23 = vpop.eup %4671  ;;  %v3021_v0 = vmul.f32 1.442695, %v2995_v28 }
 0x90e   : > { %1463 = vadd.xlane.f32.xlu1 %v5770_v52  ;;  %3045 = vadd.xlane.f32.xlu0 %v4672_v23  ;;  %v2970_v37 = vpop.xlane.xlu1 %2969  ;;  %v4674_v17 = vpop.eup %4673 }
 0x90f   : > { %4681 = vpow2.f32 %v3021_v0  ;;  %v2993_v3 = vsub.f32 %v6345_v8, %v2970_v37  ;;  %v6847_v0 = vld [vmem:[#allocation55_spill] sm:$0xff]  ;;  %v6848_v37 = vld [vmem:[#allocation56_spill] sm:$0xff] }
 0x910   : > { %v2980_v56 = vpop.xlane.xlu0 %2979  ;;  %4683 = vpow2.f32 %v3019_v62 }
 0x911   : > { %v4676_v60 = vpop.eup %4675  ;;  %v3017_v32 = vmul.f32 1.442695, %v2993_v3  ;;  %v2998_v50 = vsub.f32 %v6362_v12, %v2980_v56 }
 0x912   : > { %1467 = vadd.xlane.f32.xlu1 %v5806_v19  ;;  %3041 = vadd.xlane.f32.xlu0 %v4674_v17  ;;  %v3094_v2 = vpop.permute.xlu1 %3093  ;;  %v3068_v16 = vpack.c.bf16 %v4676_v60, %v4672_v23  ;;  %v6846_v23 = vld [vmem:[#allocation32_spill] sm:$0xff] }
 0x913   : > { %4685 = vpow2.f32 %v3017_v32  ;;  %4307 = vmatprep.subr.bf16.mxu1 %v3094_v2  ;;  %v3027_v59 = vmul.f32 1.442695, %v2998_v50 }
 0x914   : > { %v3096_v20 = vpop.permute.xlu0 %3095  ;;  %4308 = vmatpush3.bf16.msra.mxu1 %v3094_v2 }
 0x915   : > { %v4678_v52 = vpop.eup %4677  ;;  %4309 = vmatprep.subr.bf16.mxu1 %v3096_v20 }
 0x916   : > { %1471 = vadd.xlane.f32.xlu1 %v5802_v6  ;;  %v3067_v49 = vpack.c.bf16 %v4678_v52, %v4674_v17  ;;  %v4680_v8 = vpop.eup %4679  ;;  %v3000_v6 = vsub.f32 %v6359_v57, %v2984_v55 }
 0x918   : > { %4310 = vmatpush3.bf16.msra.mxu1 %v3096_v20  ;;  %v3031_v35 = vmul.f32 1.442695, %v3000_v6 }
 0x919   : > { %v4682_v54 = vpop.eup %4681 }
 0x91a   : > { %3033 = vadd.xlane.f32.xlu1 %v4668_v5  ;;  %3053 = vadd.xlane.f32.xlu0 %v4682_v54  ;;  %v3070_v44 = vpack.c.bf16 %v4680_v8, %v4682_v54  ;;  %v4684_v19 = vpop.eup %4683  ;;  %4687 = vpow2.f32 %v3031_v35 }
 0x91b   : > { %4312 = vmatmul.mubr.bf16.vlgmr.msra.gmra.mrb[64].mxu1 %v3066_v36  ;;  %4689 = vpow2.f32 %v3027_v59 }
 0x91c   : > { %4315 = vmatprep.mubr.bf16.mxu1 %v3067_v49 }
 0x91d   : > { %v4686_v31 = vpop.eup %4685 }
 0x91e   : > { %3039 = vadd.xlane.f32.xlu1 %v4666_v38  ;;  %3049 = vadd.xlane.f32.xlu0 %v4686_v31  ;;  %v3069_v14 = vpack.c.bf16 %v4684_v19, %v4686_v31 }
 0x922   : > { %3035 = vadd.xlane.f32.xlu1 %v4670_v29  ;;  %v6845_v29 = vld [vmem:[#allocation57_spill] sm:$0xff] }
 0x923   : > { %4316 = vmatmul.mubr.bf16.gmra.mrb[68].mxu1 %v3068_v16 }
 0x924   : > { %4319 = vmatprep.mubr.bf16.mxu1 %v3069_v14  ;;  %v4688_v61 = vpop.eup %4687  ;;  %v6851_v14 = vld [vmem:[#allocation38_spill] sm:$0xff] }
 0x925   : > { %v4690_v21 = vpop.eup %4689 }
 0x926   : > { %3047 = vadd.xlane.f32.xlu1 %v4676_v60  ;;  %v6849_v60 = vld [vmem:[#allocation33_spill] sm:$0xff] }
 0x92a   : > { %3043 = vadd.xlane.f32.xlu1 %v4678_v52  ;;  %v6850_v52 = vld [vmem:[#allocation35_spill] sm:$0xff] }
 0x92b   : > { %4320 = vmatmul.mubr.bf16.gmra.mrb[72].mxu1 %v3070_v44 }
 0x92e   : > { %3055 = vadd.xlane.f32.xlu1 %v4680_v8 }
 0x932   : > { %3051 = vadd.xlane.f32.xlu1 %v4684_v19 }
 0x936   : > { %1475 = vadd.xlane.f32.xlu1 %v5809_v34 }
 0x93a   : > { %1479 = vadd.xlane.f32.xlu1 %v6842_v58 }
 0x93e   : > { %3063 = vadd.xlane.f32.xlu1 %v4688_v61 }
 0x942   : > { %3059 = vadd.xlane.f32.xlu1 %v4690_v21 }
 0x943   : > { %v2978_v18 = vpop.xlane.xlu1 %2977 }
 0x944   : > { %v2997_v57 = vsub.f32 %v6357_v26, %v2978_v18 }
 0x945   : > { %v1942_v27 = vpop.xlane.xlu0 %1941 }
 0x946   : > { %v3025_v48 = vmul.f32 1.442695, %v2997_v57  ;;  %1483 = vadd.xlane.f32.xlu1 %v6843_v33  ;;  %v6853_v33 = vld [vmem:[#allocation75_spill] sm:$0xff] }
 0x947   : > { %v2982_v12 = vpop.xlane.xlu1 %2981 }
 0x948   : > { %4691 = vpow2.f32 %v3025_v48  ;;  %v2999_v22 = vsub.f32 %v6354_v11, %v2982_v12 }
 0x949   : > { %v1948_v9 = vpop.xlane.xlu0 %1947  ;;  %4693 = vrcp.f32 %v1942_v27 }
 0x94a   : > { %v3029_v34 = vmul.f32 1.442695, %v2999_v22  ;;  %1487 = vadd.xlane.f32.xlu1 %v6844_v45 }
 0x94b   : > { %v1940_v10 = vpop.xlane.xlu1 %1939 }
 0x94c   : > { %4695 = vpow2.f32 %v3029_v34  ;;  %v6854_v34 = vld [vmem:[#allocation59_spill] sm:$0xff] }
 0x94d   : > { %4697 = vrcp.f32 %v1940_v10  ;;  %v1952_v53 = vpop.xlane.xlu0 %1951  ;;  %v6855_v10 = vld [vmem:[#allocation61_spill] sm:$0xff] }
 0x94f   : > { %v1944_v63 = vpop.xlane.xlu1 %1943 }
 0x950   : > { %4699 = vrcp.f32 %v1944_v63 }
 0x951   : > { %v2495_v15 = vpop.xlane.xlu0 %2494 }
 0x952   : > { %v4692_v26 = vpop.eup %4691 }
 0x953   : > { %v1946_v38 = vpop.xlane.xlu1 %1945  ;;  %v3071_v25 = vpack.c.bf16 %v4690_v21, %v4692_v26  ;;  %v4694_v46 = vpop.eup %4693  ;;  %v6852_v21 = vld [vmem:[#allocation70_spill] sm:$0xff] }
 0x954   : > { %4701 = vrcp.f32 %v1946_v38  ;;  %v6440_v39 = vmul.f32 %v4694_v46, %v6845_v29 }
 0x955   : > { %v2499_v41 = vpop.xlane.xlu0 %2498  ;;  %4323 = vmatprep.mubr.bf16.mxu1 %v3071_v25 }
 0x956   : > { %v4696_v11 = vpop.eup %4695 }
 0x957   : > { %v4698_v36 = vpop.eup %4697  ;;  %3061 = vadd.xlane.f32.xlu0 %v4696_v11  ;;  %v2487_v4 = vpop.xlane.xlu1 %2486  ;;  %v3072_v5 = vpack.c.bf16 %v4688_v61, %v4696_v11  ;;  %v6857_v11 = vld [vmem:[#allocation58_spill] sm:$0xff] }
 0x958   : > { %v6437_v13 = vmul.f32 %v4698_v36, %v6086_v43  ;;  %4703 = vrcp.f32 %v2487_v4  ;;  %v6858_v4 = vld [vmem:[#allocation60_spill] sm:$0xff] }
 0x959   : > { %v6442_v40 = vpop.xlane.xlu0 %1955  ;;  %4324 = vmatmul.mubr.bf16.gmra.mrb[76].mxu1 %v3072_v5 }
 0x95a   : > { %v2140_v51 = vpack.c.bf16 %v6440_v39, %v6437_v13  ;;  %v4700_v42 = vpop.eup %4699  ;;  %v6868_v39 = vld [vmem:[#allocation62_spill] sm:$0xff] }
 0x95b   : > { %3057 = vadd.xlane.f32.xlu0 %v4692_v26  ;;  %v2489_v47 = vpop.xlane.xlu1 %2488  ;;  %v2113_v62 = vmul.f32 %v4700_v42, %v6847_v0  ;;  %v6856_v26 = vld [vmem:[#allocation67_spill] sm:$0xff]  ;;  %v6859_v42 = vld [vmem:[#allocation66_spill] sm:$0xff]  ;;  %v6860_v0 = vld [vmem:[#allocation72_spill] sm:$0xff] }
 0x95c   : > { %4705 = vrcp.f32 %v2489_v47 }
 0x95d   : > { %v6446_v28 = vpop.xlane.xlu0 %1959 }
 0x95e   : > { %v4702_v55 = vpop.eup %4701 }
 0x95f   : > { %1473 = vadd.xlane.f32.xlu0 %v6846_v23  ;;  %v2491_v43 = vpop.xlane.xlu1 %2490  ;;  %v2115_v3 = vmul.f32 %v4702_v55, %v6848_v37  ;;  %v6861_v37 = vld [vmem:[#allocation74_spill] sm:$0xff] }
 0x960   : > { %4707 = vrcp.f32 %v2491_v43 }
 0x961   : > { %v2503_v17 = vpop.xlane.xlu0 %2502  ;;  %v2141_v56 = vpack.c.bf16 %v2115_v3, %v2113_v62 }
 0x962   : > { %4709 = vrcp.f32 %v2503_v17  ;;  %v4704_v2 = vpop.eup %4703 }
 0x963   : > { %1477 = vadd.xlane.f32.xlu0 %v6849_v60  ;;  %2158 = vrot.lane.b32.xlu1 %v2141_v56, %s5132_s14  ;;  %v2493_v32 = vpop.xlane.xlu1 %2492  ;;  %v2656_v8 = vmul.f32 %v4704_v2, %v6290_v1  ;;  %v6862_v60 = vld [vmem:[#allocation79_spill] sm:$0xff] }
 0x964   : > { %4711 = vrcp.f32 %v2493_v32 }
 0x965   : > { %4713 = vrcp.f32 %v1948_v9  ;;  %v2507_v16 = vpop.xlane.xlu0 %2506 }
 0x966   : > { %v4706_v20 = vpop.eup %4705  ;;  %4715 = vrcp.f32 %v2507_v16 }
 0x967   : > { %1481 = vadd.xlane.f32.xlu0 %v6850_v52  ;;  %v1950_v49 = vpop.xlane.xlu1 %1949  ;;  %v2658_v54 = vmul.f32 %v4706_v20, %v6294_v30  ;;  %v6863_v52 = vld [vmem:[#allocation71_spill] sm:$0xff] }
 0x968   : > { %4717 = vrcp.f32 %v1950_v49 }
 0x969   : > { %4719 = vrcp.f32 %v1952_v53  ;;  %v1964_v44 = vpop.xlane.xlu0 %1963  ;;  %v2687_v19 = vpack.c.bf16 %v2658_v54, %v2656_v8 }
 0x96a   : > { %4721 = vrcp.f32 %v1964_v44  ;;  %v4708_v31 = vpop.eup %4707 }
 0x96b   : > { %1485 = vadd.xlane.f32.xlu0 %v6851_v14  ;;  %2703 = vrot.lane.b32.xlu1 %v2687_v19, %s5131_s13  ;;  %v1954_v6 = vpop.xlane.xlu1 %1953  ;;  %v2660_v61 = vmul.f32 %v4708_v31, %v6288_v7  ;;  %v6865_v19 = vld [vmem:[#allocation78_spill] sm:$0xff] }
 0x96c   : > { %v4710_v35 = vpop.eup %4709  ;;  %4723 = vrcp.f32 %v1954_v6 }
 0x96d   : > { %4725 = vrcp.f32 %v2495_v15  ;;  %v1968_v50 = vpop.xlane.xlu0 %1967  ;;  %v6459_v59 = vmul.f32 %v4710_v35, %v6306_v24  ;;  %v6866_v35 = vld [vmem:[#allocation63_spill] sm:$0xff] }
 0x96e   : > { %v4712_v1 = vpop.eup %4711  ;;  %4727 = vrcp.f32 %v1968_v50 }
 0x96f   : > { %v4714_v30 = vpop.eup %4713  ;;  %v2497_v58 = vpop.xlane.xlu1 %2496  ;;  %v2662_v18 = vmul.f32 %v4712_v1, %v6852_v21  ;;  %v6867_v1 = vld [vmem:[#allocation65_spill] sm:$0xff] }
 0x970   : > { %v4716_v57 = vpop.eup %4715  ;;  %4729 = vrcp.f32 %v2497_v58  ;;  %v2117_v45 = vmul.f32 %v4714_v30, %v6854_v34 }
 0x971   : > { %4731 = vrcp.f32 %v2499_v41  ;;  %v2511_v27 = vpop.xlane.xlu0 %2510  ;;  %v2688_v48 = vpack.c.bf16 %v2662_v18, %v2660_v61  ;;  %v6464_v12 = vmul.f32 %v4716_v57, %v6853_v33  ;;  %v6869_v18 = vld [vmem:[#allocation64_spill] sm:$0xff] }
 0x972   : > { %v4718_v22 = vpop.eup %4717  ;;  %4733 = vrcp.f32 %v2511_v27 }
 0x973   : > { %v4720_v24 = vpop.eup %4719  ;;  %v2501_v9 = vpop.xlane.xlu1 %2500  ;;  %v2119_v53 = vmul.f32 %v4718_v22, %v6855_v10 }
 0x974   : > { %v4722_v63 = vpop.eup %4721  ;;  %4735 = vrcp.f32 %v2501_v9  ;;  %v2121_v36 = vmul.f32 %v4720_v24, %v6857_v11  ;;  %v6870_v24 = vld [vmem:[#allocation77_spill] sm:$0xff] }
 0x975   : > { %4737 = vrcp.f32 %v6442_v40  ;;  %v2515_v7 = vpop.xlane.xlu0 %2514  ;;  %v2142_v15 = vpack.c.bf16 %v2119_v53, %v2117_v45  ;;  %v6470_v38 = vmul.f32 %v4722_v63, %v6856_v26  ;;  %v6871_v53 = vld [vmem:[#allocation76_spill] sm:$0xff] }
 0x976   : > { %v4724_v25 = vpop.eup %4723  ;;  %4739 = vrcp.f32 %v2515_v7 }
 0x977   : > { %v4726_v46 = vpop.eup %4725  ;;  %2160 = vrot.lane.b32.xlu1 %v2142_v15, %s5132_s14  ;;  %v1958_v41 = vpop.xlane.xlu1 %1957  ;;  %v2123_v5 = vmul.f32 %v4724_v25, %v6858_v4 }
 0x978   : > { %v4728_v29 = vpop.eup %4727  ;;  %4741 = vrcp.f32 %v1958_v41  ;;  %v2664_v62 = vmul.f32 %v4726_v46, %v6860_v0  ;;  %v6872_v46 = vld [vmem:[#allocation69_spill] sm:$0xff] }
 0x979   : > { %v2143_v47 = vpack.c.bf16 %v2123_v5, %v2121_v36  ;;  %v6476_v40 = vmul.f32 %v4728_v29, %v6859_v42  ;;  %4743 = vrcp.f32 %v6446_v28  ;;  %v6864_v28 = vld [vmem:[#allocation73_spill] sm:$0xff]  ;;  %v6873_v5 = vld [vmem:[#allocation68_spill] sm:$0xff] }
 0x97a   : > { %v4730_v55 = vpop.eup %4729 }
 0x97b   : > { %v4732_v23 = vpop.eup %4731  ;;  %v1962_v43 = vpop.xlane.xlu1 %1961  ;;  %v2666_v3 = vmul.f32 %v4730_v55, %v6861_v37 }
 0x97c   : > { %v4734_v17 = vpop.eup %4733  ;;  %4745 = vrcp.f32 %v1962_v43  ;;  %v2668_v49 = vmul.f32 %v4732_v23, %v6863_v52  ;;  %v6874_v43 = vld [vmem:[#allocation81_spill] sm:$0xff]  ;;  %v6876_v52 = vld [vmem:[#allocation40_spill] sm:$0xff] }
 0x97d   : > { %v2689_v56 = vpack.c.bf16 %v2666_v3, %v2664_v62  ;;  %v6482_v32 = vmul.f32 %v4734_v17, %v6862_v60 }
 0x97e   : > { %v4736_v2 = vpop.eup %4735 }
 0x97f   : > { %v4738_v16 = vpop.eup %4737  ;;  %2707 = vrot.lane.b32.xlu1 %v2689_v56, %s5131_s13  ;;  %v2505_v20 = vpop.xlane.xlu1 %2504  ;;  %v2670_v8 = vmul.f32 %v4736_v2, %v6864_v28  ;;  %v6875_v56 = vld [vmem:[#allocation80_spill] sm:$0xff]  ;;  %v6877_v28 = vld [vmem:[#allocation42_spill] sm:$0xff] }
 0x980   : > { %v4740_v54 = vpop.eup %4739  ;;  %4747 = vrcp.f32 %v2505_v20  ;;  %v2125_v50 = vmul.f32 %v4738_v16, %v6866_v35  ;;  %v6878_v35 = vld [vmem:[#allocation39_spill] sm:$0xff] }
 0x981   : > { %2156 = vrot.lane.b32.xlu0 %v2140_v51, %s5132_s14  ;;  %v2690_v44 = vpack.c.bf16 %v2670_v8, %v2668_v49  ;;  %v6492_v31 = vmul.f32 %v4740_v54, %v6865_v19 }
 0x982   : > { %v4742_v14 = vpop.eup %4741 }
 0x983   : > { %v2509_v6 = vpop.xlane.xlu1 %2508  ;;  %v2127_v30 = vmul.f32 %v4742_v14, %v6867_v1  ;;  %v4744_v58 = vpop.eup %4743  ;;  %v6879_v1 = vld [vmem:[#allocation41_spill] sm:$0xff] }
 0x984   : > { %4749 = vrcp.f32 %v2509_v6  ;;  %v2129_v51 = vmul.f32 %v4744_v58, %v6868_v39 }
 0x985   : > { %2705 = vrot.lane.b32.xlu0 %v2688_v48, %s5131_s13  ;;  %v2144_v61 = vpack.c.bf16 %v2127_v30, %v2125_v50  ;;  %v1458_v48 = vpop.xlane.xlu0 %1457 }
 0x986   : > { %v4746_v21 = vpop.eup %4745 }
 0x987   : > { %2164 = vrot.lane.b32.xlu1 %v2144_v61, %s5132_s14  ;;  %v1966_v13 = vpop.xlane.xlu1 %1965  ;;  %v2131_v57 = vmul.f32 %v4746_v21, %v6869_v18 }
 0x988   : > { %4751 = vrcp.f32 %v1966_v13 }
 0x989   : > { %2162 = vrot.lane.b32.xlu0 %v2143_v47, %s5132_s14  ;;  %v2145_v27 = vpack.c.bf16 %v2131_v57, %v2129_v51  ;;  %v1462_v26 = vpop.xlane.xlu0 %1461  ;;  %v6880_v51 = vld [vmem:[#allocation44_spill] sm:$0xff]  ;;  %v6881_v57 = vld [vmem:[#allocation46_spill] sm:$0xff] }
 0x98a   : > { %v4748_v33 = vpop.eup %4747 }
 0x98b   : > { %v1970_v22 = vpop.xlane.xlu1 %1969  ;;  %v6502_v9 = vmul.f32 %v4748_v33, %v6870_v24  ;;  %v6882_v24 = vld [vmem:[#allocation43_spill] sm:$0xff] }
 0x98c   : > { %4753 = vrcp.f32 %v1970_v22 }
 0x98d   : > { %2709 = vrot.lane.b32.xlu0 %v2690_v44, %s5131_s13  ;;  %v2691_v34 = vpack.c.bf16 %v6502_v9, %v6459_v59  ;;  %v1466_v47 = vpop.xlane.xlu0 %1465 }
 0x98e   : > { %v4750_v45 = vpop.eup %4749 }
 0x98f   : > { %v2513_v10 = vpop.xlane.xlu1 %2512  ;;  %v6508_v63 = vmul.f32 %v4750_v45, %v6871_v53  ;;  %v6883_v45 = vld [vmem:[#allocation45_spill] sm:$0xff] }
 0x990   : > { %4755 = vrcp.f32 %v2513_v10 }
 0x991   : > { %2166 = vrot.lane.b32.xlu0 %v2145_v27, %s5132_s14  ;;  %v2692_v7 = vpack.c.bf16 %v6508_v63, %v6464_v12  ;;  %v1470_v3 = vpop.xlane.xlu0 %1469 }
 0x992   : > { %v4752_v15 = vpop.eup %4751 }
 0x993   : > { %v2517_v25 = vpop.xlane.xlu1 %2516  ;;  %v6514_v41 = vmul.f32 %v4752_v15, %v6872_v46  ;;  %v4560_v46 = vld [vmem:[#allocation17 + $0x8] sm:$0xff]  }
 0x994   : > { %4757 = vrcp.f32 %v2517_v25  ;;  %v4559_v25 = vld [vmem:[#allocation17] sm:$0xff]  }
 0x995   : > { %v2146_v11 = vpack.c.bf16 %v6514_v41, %v6470_v38  ;;  %4759 = vrcp.f32 %v1458_v48  ;;  %4327 = vmatprep.subr.bf16.mxu1 %v4559_v25 }
 0x996   : > { %v4754_v36 = vpop.eup %4753  ;;  %4328 = vmatpush3.bf16.msra.mxu1 %v4559_v25 }
 0x997   : > { %v1460_v4 = vpop.xlane.xlu1 %1459  ;;  %v6519_v29 = vmul.f32 %v4754_v36, %v6873_v5  ;;  %4329 = vmatprep.subr.bf16.mxu1 %v4560_v46 }
 0x998   : > { %4761 = vrcp.f32 %v1460_v4  ;;  %v4561_v4 = vld [vmem:[#allocation17 + $0x10] sm:$0xff]  }
 0x999   : > { %v2147_v42 = vpack.c.bf16 %v6519_v29, %v6476_v40  ;;  %4763 = vrcp.f32 %v1462_v26 }
 0x99a   : > { %v4756_v55 = vpop.eup %4755  ;;  %4330 = vmatpush3.bf16.msra.mxu1 %v4560_v46 }
 0x99b   : > { %v1464_v23 = vpop.xlane.xlu1 %1463  ;;  %v6524_v0 = vmul.f32 %v4756_v55, %v6874_v43  ;;  %4331 = vmatprep.subr.bf16.mxu1 %v4561_v4 }
 0x99c   : > { %4765 = vrcp.f32 %v1464_v23  ;;  %v4563_v23 = vld [vmem:[#allocation17 + $0x20] sm:$0xff]  }
 0x99d   : > { %v2693_v37 = vpack.c.bf16 %v6524_v0, %v6482_v32  ;;  %4767 = vrcp.f32 %v1466_v47  ;;  %v4562_v47 = vld [vmem:[#allocation17 + $0x18] sm:$0xff]  }
 0x99e   : > { %v4758_v62 = vpop.eup %4757  ;;  %4332 = vmatpush3.bf16.msra.mxu1 %v4561_v4 }
 0x99f   : > { %v1468_v17 = vpop.xlane.xlu1 %1467  ;;  %v6529_v60 = vmul.f32 %v4758_v62, %v6875_v56  ;;  %v4760_v2 = vpop.eup %4759  ;;  %4333 = vmatprep.subr.bf16.mxu1 %v4562_v47  ;;  %v4564_v62 = vld [vmem:[#allocation17 + $0x28] sm:$0xff]  }
 0x9a0   : > { %4769 = vrcp.f32 %v1468_v17  ;;  %v1595_v49 = vmul.f32 %v4760_v2, %v6876_v52  ;;  %v3038_v56 = vpop.xlane.xlu0 %3037 }
 0x9a1   : > { %v2694_v16 = vpack.c.bf16 %v6529_v60, %v6492_v31  ;;  %4771 = vrcp.f32 %v1470_v3 }
 0x9a2   : > { %v4762_v20 = vpop.eup %4761  ;;  %4334 = vmatpush3.bf16.msra.mxu1 %v4562_v47 }
 0x9a3   : > { %v1597_v8 = vmul.f32 %v4762_v20, %v6877_v28  ;;  %v1472_v54 = vpop.xlane.xlu1 %1471  ;;  %v4764_v44 = vpop.eup %4763  ;;  %4335 = vmatprep.subr.bf16.mxu1 %v4563_v23 }
 0x9a4   : > { %4773 = vrcp.f32 %v1472_v54  ;;  %v1599_v50 = vmul.f32 %v4764_v44, %v6878_v35  ;;  %v3046_v20 = vpop.xlane.xlu0 %3045 }
 0x9a5   : > { %v1626_v19 = vpack.c.bf16 %v1597_v8, %v1595_v49  ;;  %4775 = vrcp.f32 %v3038_v56  ;;  %v6885_v56 = vld [vmem:[#allocation48_spill] sm:$0xff] }
 0x9a6   : > { %v4766_v14 = vpop.eup %4765  ;;  %4336 = vmatpush3.bf16.msra.mxu1 %v4563_v23 }
 0x9a7   : > { %v3034_v6 = vpop.xlane.xlu1 %3033  ;;  %1634 = vst.msk [vmem:[#allocation5] sm:$0xff] %vm1231_vm0, %v1626_v19  ;;  %v1601_v30 = vmul.f32 %v4766_v14, %v6879_v1  ;;  %v4768_v58 = vpop.eup %4767  ;;  %4337 = vmatprep.subr.bf16.mxu1 %v4564_v62  ;;  %v4565_v1 = vld [vmem:[#allocation17 + $0x30] sm:$0xff]  }
 0x9a8   : > { %v1603_v18 = vmul.f32 %v4768_v58, %v6880_v51  ;;  %v3042_v49 = vpop.xlane.xlu0 %3041  ;;  %4777 = vrcp.f32 %v3034_v6  ;;  %v4566_v58 = vld [vmem:[#allocation17 + $0x38] sm:$0xff]  }
 0x9a9   : > { %v1627_v61 = vpack.c.bf16 %v1601_v30, %v1599_v50 }
 0x9aa   : > { %v4770_v21 = vpop.eup %4769  ;;  %4338 = vmatpush3.bf16.msra.mxu1 %v4564_v62  ;;  %v6884_v62 = vld [vmem:[#allocation50_spill] sm:$0xff] }
 0x9ab   : > { %v3040_v13 = vpop.xlane.xlu1 %3039  ;;  %v4772_v39 = vpop.eup %4771  ;;  %v1605_v27 = vmul.f32 %v4770_v21, %v6881_v57  ;;  %1635 = vst.msk [vmem:[#allocation5 + $0x8] sm:$0xff] %vm1231_vm0, %v1627_v61  ;;  %4339 = vmatprep.subr.bf16.mxu1 %v4565_v1 }
 0x9ac   : > { %v1607_v48 = vmul.f32 %v4772_v39, %v6882_v24  ;;  %v3054_v8 = vpop.xlane.xlu0 %3053  ;;  %4779 = vrcp.f32 %v3040_v13 }
 0x9ad   : > { %v1628_v22 = vpack.c.bf16 %v1605_v27, %v1603_v18 }
 0x9ae   : > { %v4774_v33 = vpop.eup %4773  ;;  %4340 = vmatpush3.bf16.msra.mxu1 %v4565_v1 }
 0x9af   : > { %v1609_v10 = vmul.f32 %v4774_v33, %v6883_v45  ;;  %v3036_v53 = vpop.xlane.xlu1 %3035  ;;  %1636 = vst.msk [vmem:[#allocation5 + $0x10] sm:$0xff] %vm1231_vm0, %v1628_v22  ;;  %v4776_v6 = vpop.eup %4775  ;;  %4341 = vmatprep.subr.bf16.mxu1 %v4566_v58 }
 0x9b0   : > { %v3050_v44 = vpop.xlane.xlu0 %3049  ;;  %4781 = vrcp.f32 %v3036_v53 }
 0x9b1   : > { %v1629_v15 = vpack.c.bf16 %v1609_v10, %v1607_v48  ;;  %4783 = vrcp.f32 %v3046_v20 }
 0x9b2   : > { %4785 = vrcp.f32 %v3042_v49  ;;  %v4778_v21 = vpop.eup %4777  ;;  %4342 = vmatpush3.bf16.msra.mxu1 %v4566_v58 }
 0x9b3   : > { %v3048_v26 = vpop.xlane.xlu1 %3047  ;;  %1637 = vst.msk [vmem:[#allocation5 + $0x18] sm:$0xff] %vm1231_vm0, %v1629_v15 }
 0x9b6   : > { %v4780_v39 = vpop.eup %4779 }
 0x9b7   : > { %v3044_v36 = vpop.xlane.xlu1 %3043 }
 0x9ba   : > { %v4782_v57 = vpop.eup %4781 }
 0x9bb   : > { %v6545_v5 = vpop.xlane.xlu1 %3055  ;;  %v4784_v10 = vpop.eup %4783 }
 0x9bc   : > { %v4786_v15 = vpop.eup %4785 }
 0x9bf   : > { %v6547_v55 = vpop.xlane.xlu1 %3051 }
 0x9c3   : > { %v1476_v43 = vpop.xlane.xlu1 %1475 }
 0x9c4   : > { %4787 = vrcp.f32 %v1476_v43 }
 0x9c5   : > { %4789 = vrcp.f32 %v3048_v26 }
 0x9c7   : > { %v1480_v3 = vpop.xlane.xlu1 %1479 }
 0x9cb   : > { %v6549_v17 = vpop.xlane.xlu1 %3063 }
 0x9ce   : > { %v4788_v46 = vpop.eup %4787 }
 0x9cf   : > { %v6551_v2 = vpop.xlane.xlu1 %3059 }
 0x9d3   : > { %v1484_v52 = vpop.xlane.xlu1 %1483 }
 0x9d7   : > { %v1488_v28 = vpop.xlane.xlu1 %1487 }
 0x9db   : > { %v2159_v54 = vpop.permute.xlu1 %2158 }
 0x9dc   : > { %2182 = vst.msk [vmem:[#allocation5 + $0x8] sm:$0xff] %vm2180_vm1, %v2159_v54 }
 0x9df   : > { %v6556_v14 = vpop.permute.xlu1 %2703 }
 0x9e4   : > { %v6554_v19 = vpop.xlane.xlu0 %3061 }
 0x9e8   : > { %v6558_v35 = vpop.xlane.xlu0 %3057 }
 0x9e9   : > { %v2161_v50 = vpop.permute.xlu1 %2160 }
 0x9ea   : > { %2183 = vst.msk [vmem:[#allocation5 + $0x10] sm:$0xff] %vm2180_vm1, %v2161_v50 }
 0x9ec   : > { %v1474_v30 = vpop.xlane.xlu0 %1473 }
 0x9ed   : > { %4791 = vrcp.f32 %v1474_v30 }
 0x9ee   : > { %4793 = vrcp.f32 %v3044_v36  ;;  %v4313_v61 = vpop.f32.mrb[64].mxu1  ;;  %v4790_v36 = vpop.eup %4789 }
 0x9ef   : > { %4795 = vrcp.f32 %v1480_v3  ;;  %v3139_v13 = vpop.f32.mrb[65].mxu1  ;;  %v3207_v27 = vmul.f32 %v4776_v6, %v4313_v61  ;;  %v1613_v3 = vmul.f32 %v4788_v46, %v6884_v62  ;;  %v6886_v61 = vld [vmem:[#allocation49_spill] sm:$0xff]  ;;  %v6891_v62 = vld [vmem:[#allocation51_spill] sm:$0xff] }
 0x9f0   : > { %4797 = vrcp.f32 %v3054_v8  ;;  %v4314_v51 = vpop.f32.mrb[66].mxu1  ;;  %v1478_v18 = vpop.xlane.xlu0 %1477  ;;  %v3203_v48 = vmul.f32 %v4778_v21, %v3139_v13  ;;  %v6887_v13 = vld [vmem:[#allocation47_spill] sm:$0xff] }
 0x9f1   : > { %v3209_v33 = vmul.f32 %v4780_v39, %v4314_v51  ;;  %4799 = vrcp.f32 %v1478_v18  ;;  %v3142_v22 = vpop.f32.mrb[67].mxu1  ;;  %v2708_v24 = vpop.permute.xlu1 %2707 }
 0x9f2   : > { %4801 = vrcp.f32 %v3050_v44  ;;  %v3205_v45 = vmul.f32 %v4782_v57, %v3142_v22  ;;  %2730 = vst.msk [vmem:[#allocation5 + $0x10] sm:$0xff] %vm2727_vm2, %v2708_v24  ;;  %v6889_v24 = vld [vmem:[#allocation52_spill] sm:$0xff] }
 0x9f3   : > { %4803 = vrcp.f32 %v1484_v52  ;;  %v3235_v53 = vpack.c.bf16 %v3209_v33, %v3207_v27  ;;  %v6888_v33 = vld [vmem:[#allocation54_spill] sm:$0xff] }
 0x9f4   : > { %4805 = vrcp.f32 %v6545_v5  ;;  %v3234_v26 = vpack.c.bf16 %v3205_v45, %v3203_v48  ;;  %v1482_v25 = vpop.xlane.xlu0 %1481 }
 0x9f5   : > { %4807 = vrcp.f32 %v1482_v25  ;;  %3252 = vrot.lane.b32.xlu0 %v3235_v53, %s5130_s11 }
 0x9f6   : > { %4809 = vrcp.f32 %v6547_v55  ;;  %v4317_v4 = vpop.f32.mrb[68].mxu1  ;;  %3250 = vrot.lane.b32.xlu1 %v3234_v26, %s5130_s11 }
 0x9f7   : > { %v4792_v47 = vpop.eup %4791  ;;  %4811 = vrcp.f32 %v1488_v28  ;;  %v3155_v23 = vpop.f32.mrb[69].mxu1  ;;  %v3215_v8 = vmul.f32 %v4784_v10, %v4317_v4 }
 0x9f8   : > { %v4794_v43 = vpop.eup %4793  ;;  %v1611_v5 = vmul.f32 %v4792_v47, %v6885_v56  ;;  %v4318_v20 = vpop.f32.mrb[70].mxu1  ;;  %v3211_v28 = vmul.f32 %v4786_v15, %v3155_v23  ;;  %v6890_v23 = vld [vmem:[#allocation53_spill] sm:$0xff] }
 0x9f9   : > { %v1486_v52 = vpop.xlane.xlu0 %1485  ;;  %v4796_v49 = vpop.eup %4795  ;;  %v3217_v54 = vmul.f32 %v4790_v36, %v4318_v20  ;;  %2713 = vrot.lane.b32.xlu0 %v2692_v7, %s5131_s13 }
 0x9fa   : > { %4813 = vrcp.f32 %v1486_v52  ;;  %v3158_v44 = vpop.f32.mrb[71].mxu1  ;;  %v4798_v55 = vpop.eup %4797  ;;  %v1630_v1 = vpack.c.bf16 %v1613_v3, %v1611_v5  ;;  %2711 = vrot.lane.b32.xlu1 %v2691_v34, %s5131_s13  ;;  %v1617_v21 = vmul.f32 %v4796_v49, %v6886_v61 }
 0x9fb   : > { %v3213_v50 = vmul.f32 %v4794_v43, %v3158_v44  ;;  %v4800_v30 = vpop.eup %4799  ;;  %v3237_v58 = vpack.c.bf16 %v3217_v54, %v3215_v8  ;;  %v2165_v12 = vpop.permute.xlu1 %2164  ;;  %4815 = vrcp.f32 %v6549_v17 }
 0x9fc   : > { %v4802_v6 = vpop.eup %4801  ;;  %v1615_v39 = vmul.f32 %v4800_v30, %v6887_v13  ;;  %1638 = vst.msk [vmem:[#allocation5 + $0x20] sm:$0xff] %vm1231_vm0, %v1630_v1  ;;  %4817 = vrcp.f32 %v6551_v2 }
 0x9fd   : > { %v3236_v51 = vpack.c.bf16 %v3213_v50, %v3211_v28  ;;  %v2157_v63 = vpop.permute.xlu0 %2156  ;;  %v4804_v7 = vpop.eup %4803  ;;  %2185 = vst.msk [vmem:[#allocation5 + $0x20] sm:$0xff] %vm2180_vm1, %v2165_v12  ;;  %3256 = vrot.lane.b32.xlu0 %v3237_v58, %s5130_s11  ;;  %4819 = vrcp.f32 %v6554_v19 }
 0x9fe   : > { %2181 = vst.msk [vmem:[#allocation5] sm:$0xff] %vm2180_vm1, %v2157_v63  ;;  %v4806_v59 = vpop.eup %4805  ;;  %v4321_v9 = vpop.f32.mrb[72].mxu1  ;;  %v1631_v34 = vpack.c.bf16 %v1617_v21, %v1615_v39  ;;  %v1621_v22 = vmul.f32 %v4804_v7, %v6888_v33  ;;  %4821 = vrcp.f32 %v6558_v35 }
 0x9ff   : > { %2728 = vst.msk [vmem:[#allocation5] sm:$0xff] %vm2727_vm2, %v6556_v14  ;;  %3254 = vrot.lane.b32.xlu1 %v3236_v51, %s5130_s11  ;;  %v4808_v18 = vpop.eup %4807  ;;  %v3171_v57 = vpop.f32.mrb[73].mxu1  ;;  %v3223_v15 = vmul.f32 %v4798_v55, %v4321_v9 }
 0xa00   : > { %v4810_v27 = vpop.eup %4809  ;;  %v1619_v48 = vmul.f32 %v4808_v18, %v6889_v24  ;;  %v4322_v45 = vpop.f32.mrb[74].mxu1  ;;  %1639 = vst.msk [vmem:[#allocation5 + $0x28] sm:$0xff] %vm1231_vm0, %v1631_v34  ;;  %v3219_v25 = vmul.f32 %v4802_v6, %v3171_v57  ;;  %v3765_v34 = vld [vmem:[%s6892_s21] ss:$0 sm:$0xff] }
 0xa01   : > { %v2706_v10 = vpop.permute.xlu0 %2705  ;;  %v4812_v53 = vpop.eup %4811  ;;  %v3225_v26 = vmul.f32 %v4806_v59, %v4322_v45  ;;  %2170 = vrot.lane.b32.xlu0 %v2147_v42, %s5132_s14 }
 0xa02   : > { %2729 = vst.msk [vmem:[#allocation5 + $0x8] sm:$0xff] %vm2727_vm2, %v2706_v10  ;;  %v3174_v14 = vpop.f32.mrb[75].mxu1  ;;  %v1632_v36 = vpack.c.bf16 %v1621_v22, %v1619_v48  ;;  %v1625_v43 = vmul.f32 %v4812_v53, %v6890_v23 }
 0xa03   : > { %v3221_v46 = vmul.f32 %v4810_v27, %v3174_v14  ;;  %2168 = vrot.lane.b32.xlu1 %v2146_v11, %s5132_s14  ;;  %v3239_v47 = vpack.c.bf16 %v3225_v26, %v3223_v15 }
 0xa04   : > { %v4814_v4 = vpop.eup %4813  ;;  %1640 = vst.msk [vmem:[#allocation5 + $0x30] sm:$0xff] %vm1231_vm0, %v1632_v36 }
 0xa05   : > { %v1623_v3 = vmul.f32 %v4814_v4, %v6891_v62  ;;  %v3238_v56 = vpack.c.bf16 %v3221_v46, %v3219_v25  ;;  %v2163_v5 = vpop.permute.xlu0 %2162  ;;  %3260 = vrot.lane.b32.xlu0 %v3239_v47, %s5130_s11  ;;  %v4816_v11 = vpop.eup %4815 }
 0xa06   : > { %2184 = vst.msk [vmem:[#allocation5 + $0x18] sm:$0xff] %vm2180_vm1, %v2163_v5  ;;  %v4818_v31 = vpop.eup %4817 }
 0xa07   : > { %3258 = vrot.lane.b32.xlu1 %v3238_v56, %s5130_s11  ;;  %v1633_v40 = vpack.c.bf16 %v1625_v43, %v1623_v3  ;;  %v4820_v60 = vpop.eup %4819 }
 0xa08   : > { %v4822_v20 = vpop.eup %4821 }
 0xa09   : > { %v2710_v38 = vpop.permute.xlu0 %2709  ;;  %1641 = vst.msk [vmem:[#allocation5 + $0x38] sm:$0xff] %vm1231_vm0, %v1633_v40  ;;  %2717 = vrot.lane.b32.xlu0 %v2694_v16, %s5131_s13 }
 0xa0a   : > { %2731 = vst.msk [vmem:[#allocation5 + $0x18] sm:$0xff] %vm2727_vm2, %v2710_v38 }
 0xa0b   : > { %2715 = vrot.lane.b32.xlu1 %v2693_v37, %s5131_s13 }
 0xa0d   : > { %v2167_v41 = vpop.permute.xlu0 %2166 }
 0xa0e   : > { %2186 = vst.msk [vmem:[#allocation5 + $0x28] sm:$0xff] %vm2180_vm1, %v2167_v41 }
 0xa2c   : > { %v4325_v29 = vpop.f32.mrb[76].mxu1 }
 0xa2d   : > { %v3187_v42 = vpop.f32.mrb[77].mxu1  ;;  %v3231_v32 = vmul.f32 %v4820_v60, %v4325_v29 }
 0xa2e   : > { %v4326_v16 = vpop.f32.mrb[78].mxu1  ;;  %v3227_v52 = vmul.f32 %v4822_v20, %v3187_v42 }
 0xa2f   : > { %v3233_v0 = vmul.f32 %v4816_v11, %v4326_v16  ;;  %v3190_v37 = vpop.f32.mrb[79].mxu1 }
 0xa30   : > { %v3229_v49 = vmul.f32 %v4818_v31, %v3190_v37 }
 0xa31   : > { %v3241_v8 = vpack.c.bf16 %v3233_v0, %v3231_v32 }
 0xa32   : > { %v3240_v17 = vpack.c.bf16 %v3229_v49, %v3227_v52 }
 0xa33   : > { %3264 = vrot.lane.b32.xlu0 %v3241_v8, %s5130_s11 }
 0xa34   : > { %3262 = vrot.lane.b32.xlu1 %v3240_v17, %s5130_s11 }
 0xa67   : > { %v3253_v2 = vpop.permute.xlu0 %3252 }
 0xa68   : > { %3276 = vst.msk [vmem:[#allocation5 + $0x8] sm:$0xff] %vm3274_vm3, %v3253_v2  ;;  %v3251_v19 = vpop.permute.xlu1 %3250 }
 0xa69   : > { %3275 = vst.msk [vmem:[#allocation5] sm:$0xff] %vm3274_vm3, %v3251_v19 }
 0xa6b   : > { %v2714_v35 = vpop.permute.xlu0 %2713 }
 0xa6c   : > { %2733 = vst.msk [vmem:[#allocation5 + $0x28] sm:$0xff] %vm2727_vm2, %v2714_v35  ;;  %v2712_v54 = vpop.permute.xlu1 %2711 }
 0xa6d   : > { %2732 = vst.msk [vmem:[#allocation5 + $0x20] sm:$0xff] %vm2727_vm2, %v2712_v54 }
 0xa6f   : > { %v3257_v44 = vpop.permute.xlu0 %3256  ;;  %v3284_v50 = vld [vmem:[#allocation5 + $0x8] sm:$0xff] }
 0xa70   : > { %3278 = vst.msk [vmem:[#allocation5 + $0x18] sm:$0xff] %vm3274_vm3, %v3257_v44  ;;  %v3283_v28 = vld [vmem:[#allocation5] sm:$0xff] }
 0xa71   : > { %v3255_v55 = vpop.permute.xlu1 %3254  ;;  %4343 = vmatprep.mubr.bf16.mxu1 %v3283_v28 }
 0xa72   : > { %3277 = vst.msk [vmem:[#allocation5 + $0x10] sm:$0xff] %vm3274_vm3, %v3255_v55  ;;  %4344 = vmatmul.mubr.bf16.vlgmr.msra.gmra.mrb[80].mxu1 %v3284_v50 }
 0xa73   : > { %v2171_v1 = vpop.permute.xlu0 %2170 }
 0xa74   : > { %2188 = vst.msk [vmem:[#allocation5 + $0x38] sm:$0xff] %vm2180_vm1, %v2171_v1 }
 0xa75   : > { %v2169_v30 = vpop.permute.xlu1 %2168 }
 0xa76   : > { %2187 = vst.msk [vmem:[#allocation5 + $0x30] sm:$0xff] %vm2180_vm1, %v2169_v30 }
 0xa77   : > { %v3261_v58 = vpop.permute.xlu0 %3260  ;;  %v3286_v21 = vld [vmem:[#allocation5 + $0x18] sm:$0xff] }
 0xa78   : > { %3280 = vst.msk [vmem:[#allocation5 + $0x28] sm:$0xff] %vm3274_vm3, %v3261_v58 }
 0xa79   : > { %v3259_v6 = vpop.permute.xlu1 %3258  ;;  %v3285_v61 = vld [vmem:[#allocation5 + $0x10] sm:$0xff] }
 0xa7a   : > { %3279 = vst.msk [vmem:[#allocation5 + $0x20] sm:$0xff] %vm3274_vm3, %v3259_v6  ;;  %4347 = vmatprep.mubr.bf16.mxu1 %v3285_v61 }
 0xa7b   : > { %4348 = vmatmul.mubr.bf16.gmra.mrb[84].mxu1 %v3286_v21  ;;  %v2718_v13 = vpop.permute.xlu0 %2717 }
 0xa7c   : > { %2735 = vst.msk [vmem:[#allocation5 + $0x38] sm:$0xff] %vm2727_vm2, %v2718_v13 }
 0xa7d   : > { %v2716_v39 = vpop.permute.xlu1 %2715 }
 0xa7e   : > { %2734 = vst.msk [vmem:[#allocation5 + $0x30] sm:$0xff] %vm2727_vm2, %v2716_v39 }
 0xa7f   : > { %v3288_v12 = vld [vmem:[#allocation5 + $0x28] sm:$0xff] }
 0xa81   : > { %v3287_v51 = vld [vmem:[#allocation5 + $0x20] sm:$0xff] }
 0xa82   : > { %4351 = vmatprep.mubr.bf16.mxu1 %v3287_v51 }
 0xa83   : > { %4352 = vmatmul.mubr.bf16.gmra.mrb[88].mxu1 %v3288_v12 }
 0xaa5   : > { %v3265_v63 = vpop.permute.xlu0 %3264 }
 0xaa6   : > { %3282 = vst.msk [vmem:[#allocation5 + $0x38] sm:$0xff] %vm3274_vm3, %v3265_v63  ;;  %v3263_v7 = vpop.permute.xlu1 %3262 }
 0xaa7   : > { %3281 = vst.msk [vmem:[#allocation5 + $0x30] sm:$0xff] %vm3274_vm3, %v3263_v7 }
 0xaad   : > { %v3290_v9 = vld [vmem:[#allocation5 + $0x38] sm:$0xff] }
 0xaae   : > { %v3289_v59 = vld [vmem:[#allocation5 + $0x30] sm:$0xff] }
 0xaaf   : > { %4355 = vmatprep.mubr.bf16.mxu1 %v3289_v59 }
 0xab0   : > { %4356 = vmatmul.mubr.bf16.gmra.mrb[92].mxu1 %v3290_v9 }
 0xb45   : > { %v4345_v18 = vpop.f32.mrb[80].mxu1 }
 0xb46   : > { %v3405_v57 = vadd.f32 %v4345_v18, %v3765_v34  ;;  %v3396_v27 = vpop.f32.mrb[81].mxu1 }
 0xb47   : > { %v3397_v33 = vadd.f32 %v3765_v34, %v3396_v27  ;;  %v4346_v22 = vpop.f32.mrb[82].mxu1 }
 0xb48   : > { %3461 = vst [vmem:[%s6638_s27 + $0x10] sm:$0xff] %v3405_v57  ;;  %v3408_v24 = vadd.f32 %v4346_v22, %v3765_v34  ;;  %v3399_v48 = vpop.f32.mrb[83].mxu1 }
 0xb49   : > { %3459 = vst [vmem:[%s6638_s27] sm:$0xff] %v3397_v33  ;;  %v3400_v45 = vadd.f32 %v3765_v34, %v3399_v48 }
 0xb4a   : > { %3462 = vst [vmem:[%s6638_s27 + $0x18] sm:$0xff] %v3408_v24 }
 0xb4b   : > { %3460 = vst [vmem:[%s6638_s27 + $0x8] sm:$0xff] %v3400_v45 }
 0xb4e   : > { %v4349_v10 = vpop.f32.mrb[84].mxu1 }
 0xb4f   : > { %v3421_v53 = vadd.f32 %v4349_v10, %v3765_v34  ;;  %v3412_v15 = vpop.f32.mrb[85].mxu1 }
 0xb50   : > { %v3413_v26 = vadd.f32 %v3765_v34, %v3412_v15  ;;  %v4350_v14 = vpop.f32.mrb[86].mxu1 }
 0xb51   : > { %3465 = vst [vmem:[%s6638_s27 + $0x30] sm:$0xff] %v3421_v53  ;;  %v3424_v25 = vadd.f32 %v4350_v14, %v3765_v34  ;;  %v3415_v46 = vpop.f32.mrb[87].mxu1 }
 0xb52   : > { %3463 = vst [vmem:[%s6638_s27 + $0x20] sm:$0xff] %v3413_v26  ;;  %v3416_v36 = vadd.f32 %v3765_v34, %v3415_v46 }
 0xb53   : > { %3466 = vst [vmem:[%s6638_s27 + $0x38] sm:$0xff] %v3424_v25 }
 0xb54   : > { %3464 = vst [vmem:[%s6638_s27 + $0x28] sm:$0xff] %v3416_v36 }
 0xb56   : > { %v4353_v4 = vpop.f32.mrb[88].mxu1 }
 0xb57   : > { %v3437_v47 = vadd.f32 %v4353_v4, %v3765_v34  ;;  %v3428_v23 = vpop.f32.mrb[89].mxu1 }
 0xb58   : > { %v3429_v43 = vadd.f32 %v3765_v34, %v3428_v23  ;;  %v4354_v62 = vpop.f32.mrb[90].mxu1 }
 0xb59   : > { %3469 = vst [vmem:[%s6638_s27 + $0x50] sm:$0xff] %v3437_v47  ;;  %v3440_v3 = vadd.f32 %v4354_v62, %v3765_v34  ;;  %v3431_v56 = vpop.f32.mrb[91].mxu1 }
 0xb5a   : > { %3467 = vst [vmem:[%s6638_s27 + $0x40] sm:$0xff] %v3429_v43  ;;  %v3432_v5 = vadd.f32 %v3765_v34, %v3431_v56 }
 0xb5b   : > { %3470 = vst [vmem:[%s6638_s27 + $0x58] sm:$0xff] %v3440_v3 }
 0xb5c   : > { %3468 = vst [vmem:[%s6638_s27 + $0x48] sm:$0xff] %v3432_v5 }
 0xb83   : > { %v4357_v40 = vpop.f32.mrb[92].mxu1 }
 0xb84   : > { %v3453_v38 = vadd.f32 %v4357_v40, %v3765_v34  ;;  %v3444_v41 = vpop.f32.mrb[93].mxu1 }
 0xb85   : > { %v3445_v11 = vadd.f32 %v3765_v34, %v3444_v41  ;;  %v4358_v29 = vpop.f32.mrb[94].mxu1 }
 0xb86   : > { %3473 = vst [vmem:[%s6638_s27 + $0x70] sm:$0xff] %v3453_v38  ;;  %v3456_v31 = vadd.f32 %v4358_v29, %v3765_v34  ;;  %v3447_v42 = vpop.f32.mrb[95].mxu1 }
 0xb87   : > { %3471 = vst [vmem:[%s6638_s27 + $0x60] sm:$0xff] %v3445_v11  ;;  %v3448_v60 = vadd.f32 %v3765_v34, %v3447_v42 }
 0xb88   : > { %3474 = vst [vmem:[%s6638_s27 + $0x78] sm:$0xff] %v3456_v31 }
 0xb89   : > { %3472 = vst [vmem:[%s6638_s27 + $0x68] sm:$0xff] %v3448_v60 }
 0xb8a   : > { %5038 = shalt.err (!%p5035_p0)
}
 0xb8b   : > { %s5039_s19 = scalar_lea.hbm %s6658_s10, 2048  ;;  %s5043_s13 = scalar_lea.hbm %s6896_s17, 4096 }
 0xb8c   : > { %p5040_p8 = scmp.ne.s32.totalorder %s6658_s10, %s5039_s19  ;;  %p5044_p2 = scmp.lt.u32.totalorder %s6658_s10, %s6896_s17 }
 0xb8d   : > { %p5045_p10 = scmp.lt.u32.totalorder %s5043_s13, %s5039_s19  ;;  %p5047_p7 = scmp.lt.u32.totalorder %s5039_s19, %s6658_s10 }
 0xb8e   : > { %p5041_p3 = pnand %p5040_p8, %p6897_p6 }
 0xb8f   : > { %p5046_p5 = por %p5045_p10, %p5044_p2 }
 0xb90   : > { %p5042_p11 = pneg %p5041_p3 }
 0xb91   : > { %p5048_p4 = por %p5047_p7, %p5046_p5 }
 0xb93   : > { %p5049_p1 = pnand %p5048_p4, %p5042_p11 }
 0xb95   : > { %5052 = shalt.err (!%p5049_p1)
}
 0xb96   : > { %s5134_s24 = smov 128   ;;  %s5135_s12 = smov 8  }
 0xb97   : > { %4413 = dma.vmem_to_hbm [thread:$0]  (%p6897_p6), %s6660_s1, 2048, %s6658_s10, %s3476_s16, %s5134_s24, %s5134_s24, %s5135_s12  }
 0xb98 PF: > { %s6898_s21 = sld [smem:[#allocation24_spill]]  ;;  %s6899_s27 = sld [smem:[#allocation28_spill]] }
 0xb99   : > { %s6900_s8 = sld [smem:[#allocation27_spill]] }
 0xb9e   : > { %s3506_s9 = sand.u32 1, %s6898_s21   ;;  %p6901_p13 = scmp.ne.s32.totalorder %s6899_s27, 0 }
 0xb9f   : > { %p6902_p12 = scmp.ge.s32.totalorder %s6900_s8, 2  ;;  %s3507_s26 = scalar_lea.sflag [#allocation8], %s3506_s9 }
 0xba1   : > { %p4439_p9 = pnand %p6902_p12, %p6901_p13 }
 0xba3   : > { %5094 = dma.done.wait (!%p4439_p9), %s3507_s26, 2048  }
 0xba4   : > { %5096 = vsyncadd (!%p4439_p9), %s3507_s26, 4294965248  ;;  %s29_s10 = sadd.s32 1, %s6900_s8   ;;  %s6903_s20 = sld [smem:[#allocation31_spill]] }
 0xba5   : > { %p26_p0 = scmp.ge.s32.totalorder %s29_s10, 4   ;;  %s6904_s30 = sld [smem:[#allocation26_spill]] }
 0xba6   : > { %s6905_s9 = sld [smem:[#allocation29_spill]]  ;;  %s6906_s27 = smov %s5103_s28 }
 0xba7   : > { %s6907_s28 = smov %s5107_s29  ;;  %28 = sbr.rel (!%p26_p0) target bundleno = 16 (0x10), region = 141 }
 0xbaa   : > { %s6908_s29 = smov %s6903_s20 }
 0xbae   :  { %3512 = vsyncpa [#allocation7], 1 }
 0xbaf   :  { %3514 = vsyncpa [#allocation7 + $0x1], 1 }
 0xbb0   :  { %3515 = vsyncpa [#allocation10], 1 }
 0xbb1   :  { %3517 = vsyncpa [#allocation10 + $0x1], 1 }
 0xbb2   :  { %3518 = vsyncpa [#allocation13], 1 }
 0xbb3   :  { %3519 = vsyncpa [#allocation16], 1 }
 0xbb4   :  { %3520 = vsyncpa [#allocation8], 1 }
 0xbb5   :  { %3522 = vsyncpa [#allocation8 + $0x1], 1 }

</bundles_post_ra>
